<compile_context>
chip_gen: v7x
topology: tpu7x:2x2x1
jax: 0.10.0
libtpu: 0.0.40
codegen_flags: <defaults>
</compile_context>

<pallas_src>
import functools

import jax
import jax.numpy as jnp
from jax.experimental import pallas as pl
from jax.experimental.pallas import tpu as pltpu


# --------------------------------------------------------------------------
# Fused kernel: whole ResidualBlocksWithInputConv forward for one batch image.
# Activations are channel-major values (C, H*W); intermediates never touch HBM.
# --------------------------------------------------------------------------
def _fused_group_kernel(x_ref, mask_ref, w_in_ref, b_in_ref,
                        w1_ref, b1_ref, w2_ref, b2_ref,
                        cw1_ref, cb1_ref, cw2_ref, cb2_ref,
                        w_tail_ref, b_tail_ref, o_ref,
                        *, H, W, nb, cdt):
    f32 = jnp.float32
    HW = H * W

    # Hoisted once (JAX does not CSE broadcasts/slices; reuse across all convs / blocks).
    m_all = mask_ref[...]                                   # (9, HW) 0/1 in compute dtype
    mrows = [m_all[k:k + 1, :] for k in range(9)]           # 8 border masks (+ unused center)
    ones_col = jnp.ones((HW, 1), f32)                       # MXU global-average-pool operand

    def im2col(h_cdt):
        # (Cin, HW) -> (9*Cin, HW): dx/dy shifts are lane rotations with zero border masks;
        # tap order (dy, dx, cin) matches the packed weight K-row order.
        taps = []
        for dy in (-1, 0, 1):
            for dx in (-1, 0, 1):
                s = dy * W + dx
                t = h_cdt if s == 0 else jnp.roll(h_cdt, -s, axis=1)
                if not (dy == 0 and dx == 0):
                    t = t * mrows[(dy + 1) * 3 + (dx + 1)]
                taps.append(t)
        return jnp.concatenate(taps, axis=0)

    def conv3x3(h_cdt, w, b):
        # Single K=9*Cin matmul, f32 accumulation, lane-dense N = H*W output.
        return jnp.dot(w, im2col(h_cdt), preferred_element_type=f32) + b   # (Cout, HW) f32

    # ---- input conv + LeakyReLU(0.1) ----
    feat = conv3x3(x_ref[...].astype(cdt), w_in_ref[...], b_in_ref[...])
    feat = jnp.where(feat >= 0.0, feat, 0.1 * feat)

    # ---- nb fused RCABlocks (conv-ReLU-conv, channel attention, residual add) ----
    h = feat
    for blk in range(nb):                                   # static unroll; see TODO for large nb
        r = conv3x3(h.astype(cdt), w1_ref[blk], b1_ref[blk])
        r = jnp.maximum(r, 0.0)
        r = conv3x3(r.astype(cdt), w2_ref[blk], b2_ref[blk])
        # channel attention: global average pool as a ones-matmul, tiny FC stack in f32
        pooled = jnp.dot(r, ones_col, preferred_element_type=f32) * (1.0 / HW)   # (C, 1)
        y = jnp.dot(cw1_ref[blk], pooled, preferred_element_type=f32) + cb1_ref[blk]
        y = jnp.maximum(y, 0.0)
        y = jnp.dot(cw2_ref[blk], y, preferred_element_type=f32) + cb2_ref[blk]
        y = jax.nn.sigmoid(y)                               # (C, 1) channel gate
        h = r * y + h

    # ---- tail conv fused with the RCAGroup residual ----
    out = conv3x3(h.astype(cdt), w_tail_ref[...], b_tail_ref[...]) + feat
    o_ref[...] = out.astype(o_ref.dtype)


# --------------------------------------------------------------------------
# Host-side weight packing (done once) and border-mask construction.
# --------------------------------------------------------------------------
def _pack_conv_w(w, cdt):
    # HWIO (3,3,Cin,Cout) -> (Cout, 9*Cin); K rows ordered (dy, dx, cin) = im2col tap order.
    kh, kw, cin, cout = w.shape
    return jnp.transpose(w.reshape(kh * kw * cin, cout)).astype(cdt)


def _col(v):
    return v.reshape(-1, 1).astype(jnp.float32)


def pack_params(params, cdt=jnp.bfloat16):
    """Pack/cast all weights once; reuse the result across forwards."""
    blocks = params["blocks"]
    return {
        "w_in": _pack_conv_w(params["w_in"], cdt), "b_in": _col(params["b_in"]),
        "w_tail": _pack_conv_w(params["w_tail"], cdt), "b_tail": _col(params["b_tail"]),
        "w1": jnp.stack([_pack_conv_w(b["w1"], cdt) for b in blocks]),
        "b1": jnp.stack([_col(b["b1"]) for b in blocks]),
        "w2": jnp.stack([_pack_conv_w(b["w2"], cdt) for b in blocks]),
        "b2": jnp.stack([_col(b["b2"]) for b in blocks]),
        "cw1": jnp.stack([b["ca_w1"].T.astype(jnp.float32) for b in blocks]),
        "cb1": jnp.stack([_col(b["ca_b1"]) for b in blocks]),
        "cw2": jnp.stack([b["ca_w2"].T.astype(jnp.float32) for b in blocks]),
        "cb2": jnp.stack([_col(b["ca_b2"]) for b in blocks]),
    }


def _tap_masks(H, W, cdt):
    # 0/1 masks that restore 'SAME' zero padding after the circular lane rolls wrap.
    p = jnp.arange(H * W, dtype=jnp.int32)
    row, col = p // W, p % W
    masks = []
    for dy in (-1, 0, 1):
        for dx in (-1, 0, 1):
            ok = (row + dy >= 0) & (row + dy < H) & (col + dx >= 0) & (col + dx < W)
            masks.append(ok)
    return jnp.stack(masks).astype(cdt)                     # (9, H*W)


# --------------------------------------------------------------------------
# Full module forward (NCHW interface, like PyTorch). One pallas_call, grid over batch.
# --------------------------------------------------------------------------
def residual_blocks_with_input_conv(feat_nchw, params, compute_dtype=jnp.bfloat16,
                                    packed=None):
    cdt = compute_dtype
    N, Cin, H, W = feat_nchw.shape
    HW = H * W
    p = pack_params(params, cdt) if packed is None else packed
    C = p["w_in"].shape[0]
    nb = p["w1"].shape[0]
    Cr = p["cw1"].shape[1]

    x = feat_nchw.reshape(N, Cin, HW)                       # channel-major: spatial on lanes
    masks = _tap_masks(H, W, cdt)

    kernel = functools.partial(_fused_group_kernel, H=H, W=W, nb=nb, cdt=cdt)

    def const_spec(shape):                                  # VMEM-resident across grid steps
        nd = len(shape)
        return pl.BlockSpec(shape, lambda n, _nd=nd: (0,) * _nd)

    out = pl.pallas_call(
        kernel,
        out_shape=jax.ShapeDtypeStruct((N, C, HW), feat_nchw.dtype),
        grid_spec=pltpu.PrefetchScalarGridSpec(
            num_scalar_prefetch=0,
            grid=(N,),
            in_specs=[
                pl.BlockSpec((None, Cin, HW), lambda n: (n, 0, 0)),
                const_spec((9, HW)),
                const_spec((C, 9 * Cin)), const_spec((C, 1)),
                const_spec((nb, C, 9 * C)), const_spec((nb, C, 1)),
                const_spec((nb, C, 9 * C)), const_spec((nb, C, 1)),
                const_spec((nb, Cr, C)), const_spec((nb, Cr, 1)),
                const_spec((nb, C, Cr)), const_spec((nb, C, 1)),
                const_spec((C, 9 * C)), const_spec((C, 1)),
            ],
            out_specs=pl.BlockSpec((None, C, HW), lambda n: (n, 0, 0)),
        ),
        compiler_params=pltpu.CompilerParams(
            dimension_semantics=("parallel",),
            vmem_limit_bytes=32 * 1024 * 1024,
        ),
    )(x, masks, p["w_in"], p["b_in"],
      p["w1"], p["b1"], p["w2"], p["b2"],
      p["cw1"], p["cb1"], p["cw2"], p["cb2"],
      p["w_tail"], p["b_tail"])
    return out.reshape(N, C, H, W)


# --------------------------------------------------------------------------
# Deterministic synthetic parameter init (shapes from the module __init__).
# --------------------------------------------------------------------------
def init_params(key, in_channels, out_channels, num_blocks, reduction=16):
    cr = max(out_channels // reduction, 1)
    keys = jax.random.split(key, 4 + 6 * num_blocks)
    ki = iter(range(len(keys)))

    def w(shape, k):
        return 0.1 * jax.random.normal(keys[k], shape, jnp.float32)

    params = {
        "w_in": w((3, 3, in_channels, out_channels), next(ki)),
        "b_in": w((out_channels,), next(ki)),
        "w_tail": w((3, 3, out_channels, out_channels), next(ki)),
        "b_tail": w((out_channels,), next(ki)),
        "blocks": [],
    }
    for _ in range(num_blocks):
        params["blocks"].append({
            "w1": w((3, 3, out_channels, out_channels), next(ki)),
            "b1": w((out_channels,), next(ki)),
            "w2": w((3, 3, out_channels, out_channels), next(ki)),
            "b2": w((out_channels,), next(ki)),
            "ca_w1": w((out_channels, cr), next(ki)),
            "ca_b1": jnp.zeros((cr,), jnp.float32),
            "ca_w2": w((cr, out_channels), next(ki)),
            "ca_b2": jnp.zeros((out_channels,), jnp.float32),
        })
    return params


# --------------------------------------------------------------------------
# Pure-JAX reference (numerical sanity check).
# --------------------------------------------------------------------------
def _conv3x3_ref(x, w, b, act):
    y = jax.lax.conv_general_dilated(
        x, w, (1, 1), "SAME",
        dimension_numbers=("NHWC", "HWIO", "NHWC"),
        precision=jax.lax.Precision.HIGHEST) + b
    if act == "lrelu":
        y = jnp.where(y >= 0, y, 0.1 * y)
    elif act == "relu":
        y = jnp.maximum(y, 0.0)
    return y


def reference_forward(feat_nchw, params):
    x = jnp.transpose(feat_nchw, (0, 2, 3, 1))
    feat = _conv3x3_ref(x, params["w_in"], params["b_in"], "lrelu")
    h = feat
    for blk in params["blocks"]:
        r = _conv3x3_ref(h, blk["w1"], blk["b1"], "relu")
        r = _conv3x3_ref(r, blk["w2"], blk["b2"], "none")
        pooled = jnp.mean(r, axis=(1, 2))
        y = jnp.maximum(pooled @ blk["ca_w1"] + blk["ca_b1"], 0.0)
        y = jax.nn.sigmoid(y @ blk["ca_w2"] + blk["ca_b2"])
        h = r * y[:, None, None, :] + h
    tail = _conv3x3_ref(h, params["w_tail"], params["b_tail"], "none")
    return jnp.transpose(tail + feat, (0, 3, 1, 2))


if __name__ == "__main__":
    N, IN_CH, OUT_CH, NUM_BLOCKS = 2, 4, 32, 2
    H = W = 16

    key = jax.random.PRNGKey(0)
    k_x, k_p = jax.random.split(key)
    feat = jax.random.normal(k_x, (N, IN_CH, H, W), jnp.float32)   # PyTorch-style NCHW input
    params = init_params(k_p, IN_CH, OUT_CH, NUM_BLOCKS)

    ref = jax.block_until_ready(reference_forward(feat, params))

    # f32-MXU path: tight numerical check of the fused kernel.
    out_f32 = jax.block_until_ready(
        residual_blocks_with_input_conv(feat, params, compute_dtype=jnp.float32))
    assert out_f32.shape == (N, OUT_CH, H, W), out_f32.shape
    assert jnp.all(jnp.isfinite(out_f32))
    assert jnp.allclose(out_f32, ref, atol=2e-3, rtol=2e-3), \
        float(jnp.max(jnp.abs(out_f32 - ref)))

    # Default bf16-MXU / f32-accumulate path: looser check (bf16 operand rounding).
    out = jax.block_until_ready(residual_blocks_with_input_conv(feat, params))
    assert out.shape == (N, OUT_CH, H, W), out.shape
    assert jnp.all(jnp.isfinite(out))
    max_err = float(jnp.max(jnp.abs(out - ref)))
    rel_err = float(jnp.linalg.norm(out - ref) / jnp.linalg.norm(ref))
    assert max_err < 0.3 and rel_err < 0.05, (max_err, rel_err)

    print("KERNEL_OK")
</pallas_src>

<mosaic_0001>
module attributes {stable_mosaic.version = 11 : i64} {
  func.func @_fused_group_kernel(%arg0: i32, %arg1: memref<1x4x256xf32, #tpu.memory_space<vmem>>, %arg2: memref<9x256xf32, #tpu.memory_space<vmem>>, %arg3: memref<32x36xf32, #tpu.memory_space<vmem>>, %arg4: memref<32x1xf32, #tpu.memory_space<vmem>>, %arg5: memref<2x32x288xf32, #tpu.memory_space<vmem>>, %arg6: memref<2x32x1xf32, #tpu.memory_space<vmem>>, %arg7: memref<2x32x288xf32, #tpu.memory_space<vmem>>, %arg8: memref<2x32x1xf32, #tpu.memory_space<vmem>>, %arg9: memref<2x2x32xf32, #tpu.memory_space<vmem>>, %arg10: memref<2x2x1xf32, #tpu.memory_space<vmem>>, %arg11: memref<2x32x2xf32, #tpu.memory_space<vmem>>, %arg12: memref<2x32x1xf32, #tpu.memory_space<vmem>>, %arg13: memref<32x288xf32, #tpu.memory_space<vmem>>, %arg14: memref<32x1xf32, #tpu.memory_space<vmem>>, %arg15: memref<1x32x256xf32, #tpu.memory_space<vmem>>) attributes {dimension_semantics = [#tpu.dimension_semantics<parallel>], iteration_bounds = array<i64: 2>, scalar_prefetch = 0 : i64, scratch_operands = 0 : i64, tpu.core_type = #tpu.core_type<tc>, window_params = [{transform_indices = @transform_0, window_bounds = array<i64: 1, 4, 256>}, {pipeline_mode = #tpu.pipeline_mode<synchronous>, transform_indices = @transform_1, window_bounds = array<i64: 9, 256>}, {pipeline_mode = #tpu.pipeline_mode<synchronous>, transform_indices = @transform_2, window_bounds = array<i64: 32, 36>}, {pipeline_mode = #tpu.pipeline_mode<synchronous>, transform_indices = @transform_3, window_bounds = array<i64: 32, 1>}, {pipeline_mode = #tpu.pipeline_mode<synchronous>, transform_indices = @transform_4, window_bounds = array<i64: 2, 32, 288>}, {pipeline_mode = #tpu.pipeline_mode<synchronous>, transform_indices = @transform_5, window_bounds = array<i64: 2, 32, 1>}, {pipeline_mode = #tpu.pipeline_mode<synchronous>, transform_indices = @transform_6, window_bounds = array<i64: 2, 32, 288>}, {pipeline_mode = #tpu.pipeline_mode<synchronous>, transform_indices = @transform_7, window_bounds = array<i64: 2, 32, 1>}, {pipeline_mode = #tpu.pipeline_mode<synchronous>, transform_indices = @transform_8, window_bounds = array<i64: 2, 2, 32>}, {pipeline_mode = #tpu.pipeline_mode<synchronous>, transform_indices = @transform_9, window_bounds = array<i64: 2, 2, 1>}, {pipeline_mode = #tpu.pipeline_mode<synchronous>, transform_indices = @transform_10, window_bounds = array<i64: 2, 32, 2>}, {pipeline_mode = #tpu.pipeline_mode<synchronous>, transform_indices = @transform_11, window_bounds = array<i64: 2, 32, 1>}, {pipeline_mode = #tpu.pipeline_mode<synchronous>, transform_indices = @transform_12, window_bounds = array<i64: 32, 288>}, {pipeline_mode = #tpu.pipeline_mode<synchronous>, transform_indices = @transform_13, window_bounds = array<i64: 32, 1>}, {transform_indices = @transform_14, window_bounds = array<i64: 1, 32, 256>}]} {
    %c0 = arith.constant 0 : index
    %c0_0 = arith.constant 0 : index
    %0 = vector.load %arg2[%c0, %c0_0] : memref<9x256xf32, #tpu.memory_space<vmem>>, vector<9x256xf32>
    %1 = vector.extract_strided_slice %0 {offsets = [0, 0], sizes = [1, 256], strides = [1, 1]} : vector<9x256xf32> to vector<1x256xf32>
    %2 = vector.extract_strided_slice %0 {offsets = [1, 0], sizes = [1, 256], strides = [1, 1]} : vector<9x256xf32> to vector<1x256xf32>
    %3 = vector.extract_strided_slice %0 {offsets = [2, 0], sizes = [1, 256], strides = [1, 1]} : vector<9x256xf32> to vector<1x256xf32>
    %4 = vector.extract_strided_slice %0 {offsets = [3, 0], sizes = [1, 256], strides = [1, 1]} : vector<9x256xf32> to vector<1x256xf32>
    %5 = vector.extract_strided_slice %0 {offsets = [5, 0], sizes = [1, 256], strides = [1, 1]} : vector<9x256xf32> to vector<1x256xf32>
    %6 = vector.extract_strided_slice %0 {offsets = [6, 0], sizes = [1, 256], strides = [1, 1]} : vector<9x256xf32> to vector<1x256xf32>
    %7 = vector.extract_strided_slice %0 {offsets = [7, 0], sizes = [1, 256], strides = [1, 1]} : vector<9x256xf32> to vector<1x256xf32>
    %8 = vector.extract_strided_slice %0 {offsets = [8, 0], sizes = [1, 256], strides = [1, 1]} : vector<9x256xf32> to vector<1x256xf32>
    %cst = arith.constant 1.000000e+00 : f32
    %9 = vector.broadcast %cst : f32 to vector<256x1xf32>
    %c0_1 = arith.constant 0 : index
    %c0_2 = arith.constant 0 : index
    %c0_3 = arith.constant 0 : index
    %10 = vector.load %arg1[%c0_1, %c0_2, %c0_3] : memref<1x4x256xf32, #tpu.memory_space<vmem>>, vector<1x4x256xf32>
    %11 = vector.shape_cast %10 : vector<1x4x256xf32> to vector<4x256xf32>
    %c0_4 = arith.constant 0 : index
    %c0_5 = arith.constant 0 : index
    %12 = vector.load %arg3[%c0_4, %c0_5] : memref<32x36xf32, #tpu.memory_space<vmem>>, vector<32x36xf32>
    %c0_6 = arith.constant 0 : index
    %c0_7 = arith.constant 0 : index
    %13 = vector.load %arg4[%c0_6, %c0_7] : memref<32x1xf32, #tpu.memory_space<vmem>>, vector<32x1xf32>
    %14 = vector.extract_strided_slice %11 {offsets = [0, 239], sizes = [4, 17], strides = [1, 1]} : vector<4x256xf32> to vector<4x17xf32>
    %15 = vector.extract_strided_slice %11 {offsets = [0, 0], sizes = [4, 239], strides = [1, 1]} : vector<4x256xf32> to vector<4x239xf32>
    %16 = tpu.concatenate %14, %15 in 1 : vector<4x17xf32>, vector<4x239xf32> -> vector<4x256xf32>
    %17 = vector.broadcast %1 : vector<1x256xf32> to vector<4x256xf32>
    %18 = arith.mulf %16, %17 : vector<4x256xf32>
    %19 = vector.extract_strided_slice %11 {offsets = [0, 240], sizes = [4, 16], strides = [1, 1]} : vector<4x256xf32> to vector<4x16xf32>
    %20 = vector.extract_strided_slice %11 {offsets = [0, 0], sizes = [4, 240], strides = [1, 1]} : vector<4x256xf32> to vector<4x240xf32>
    %21 = tpu.concatenate %19, %20 in 1 : vector<4x16xf32>, vector<4x240xf32> -> vector<4x256xf32>
    %22 = vector.broadcast %2 : vector<1x256xf32> to vector<4x256xf32>
    %23 = arith.mulf %21, %22 : vector<4x256xf32>
    %24 = vector.extract_strided_slice %11 {offsets = [0, 241], sizes = [4, 15], strides = [1, 1]} : vector<4x256xf32> to vector<4x15xf32>
    %25 = vector.extract_strided_slice %11 {offsets = [0, 0], sizes = [4, 241], strides = [1, 1]} : vector<4x256xf32> to vector<4x241xf32>
    %26 = tpu.concatenate %24, %25 in 1 : vector<4x15xf32>, vector<4x241xf32> -> vector<4x256xf32>
    %27 = vector.broadcast %3 : vector<1x256xf32> to vector<4x256xf32>
    %28 = arith.mulf %26, %27 : vector<4x256xf32>
    %29 = vector.extract_strided_slice %11 {offsets = [0, 255], sizes = [4, 1], strides = [1, 1]} : vector<4x256xf32> to vector<4x1xf32>
    %30 = vector.extract_strided_slice %11 {offsets = [0, 0], sizes = [4, 255], strides = [1, 1]} : vector<4x256xf32> to vector<4x255xf32>
    %31 = tpu.concatenate %29, %30 in 1 : vector<4x1xf32>, vector<4x255xf32> -> vector<4x256xf32>
    %32 = vector.broadcast %4 : vector<1x256xf32> to vector<4x256xf32>
    %33 = arith.mulf %31, %32 : vector<4x256xf32>
    %34 = vector.extract_strided_slice %11 {offsets = [0, 1], sizes = [4, 255], strides = [1, 1]} : vector<4x256xf32> to vector<4x255xf32>
    %35 = vector.extract_strided_slice %11 {offsets = [0, 0], sizes = [4, 1], strides = [1, 1]} : vector<4x256xf32> to vector<4x1xf32>
    %36 = tpu.concatenate %34, %35 in 1 : vector<4x255xf32>, vector<4x1xf32> -> vector<4x256xf32>
    %37 = vector.broadcast %5 : vector<1x256xf32> to vector<4x256xf32>
    %38 = arith.mulf %36, %37 : vector<4x256xf32>
    %39 = vector.extract_strided_slice %11 {offsets = [0, 15], sizes = [4, 241], strides = [1, 1]} : vector<4x256xf32> to vector<4x241xf32>
    %40 = vector.extract_strided_slice %11 {offsets = [0, 0], sizes = [4, 15], strides = [1, 1]} : vector<4x256xf32> to vector<4x15xf32>
    %41 = tpu.concatenate %39, %40 in 1 : vector<4x241xf32>, vector<4x15xf32> -> vector<4x256xf32>
    %42 = vector.broadcast %6 : vector<1x256xf32> to vector<4x256xf32>
    %43 = arith.mulf %41, %42 : vector<4x256xf32>
    %44 = vector.extract_strided_slice %11 {offsets = [0, 16], sizes = [4, 240], strides = [1, 1]} : vector<4x256xf32> to vector<4x240xf32>
    %45 = vector.extract_strided_slice %11 {offsets = [0, 0], sizes = [4, 16], strides = [1, 1]} : vector<4x256xf32> to vector<4x16xf32>
    %46 = tpu.concatenate %44, %45 in 1 : vector<4x240xf32>, vector<4x16xf32> -> vector<4x256xf32>
    %47 = vector.broadcast %7 : vector<1x256xf32> to vector<4x256xf32>
    %48 = arith.mulf %46, %47 : vector<4x256xf32>
    %49 = vector.extract_strided_slice %11 {offsets = [0, 17], sizes = [4, 239], strides = [1, 1]} : vector<4x256xf32> to vector<4x239xf32>
    %50 = vector.extract_strided_slice %11 {offsets = [0, 0], sizes = [4, 17], strides = [1, 1]} : vector<4x256xf32> to vector<4x17xf32>
    %51 = tpu.concatenate %49, %50 in 1 : vector<4x239xf32>, vector<4x17xf32> -> vector<4x256xf32>
    %52 = vector.broadcast %8 : vector<1x256xf32> to vector<4x256xf32>
    %53 = arith.mulf %51, %52 : vector<4x256xf32>
    %54 = tpu.concatenate %18, %23, %28, %33, %11, %38, %43, %48, %53 in 0 : vector<4x256xf32>, vector<4x256xf32>, vector<4x256xf32>, vector<4x256xf32>, vector<4x256xf32>, vector<4x256xf32>, vector<4x256xf32>, vector<4x256xf32>, vector<4x256xf32> -> vector<36x256xf32>
    %cst_8 = arith.constant dense<0.000000e+00> : vector<32x256xf32>
    %55 = tpu.matmul %12, %54, %cst_8 {dimension_numbers = #tpu.dot_dimension_numbers<[1], [0], [0], [1], [0, 0, 1, 1], [], []>} : vector<32x36xf32>, vector<36x256xf32>, vector<32x256xf32> -> vector<32x256xf32>
    %56 = vector.broadcast %13 : vector<32x1xf32> to vector<32x256xf32>
    %57 = arith.addf %55, %56 : vector<32x256xf32>
    %cst_9 = arith.constant 0.000000e+00 : f32
    %58 = vector.broadcast %cst_9 : f32 to vector<32x256xf32>
    %59 = arith.cmpf oge, %57, %58 : vector<32x256xf32>
    %cst_10 = arith.constant 1.000000e-01 : f32
    %60 = vector.broadcast %cst_10 : f32 to vector<32x256xf32>
    %61 = arith.mulf %60, %57 : vector<32x256xf32>
    %62 = arith.select %59, %57, %61 : vector<32x256xi1>, vector<32x256xf32>
    %c0_11 = arith.constant 0 : index
    %c0_12 = arith.constant 0 : index
    %c0_13 = arith.constant 0 : index
    %63 = vector.load %arg5[%c0_11, %c0_12, %c0_13] : memref<2x32x288xf32, #tpu.memory_space<vmem>>, vector<1x32x288xf32>
    %64 = vector.shape_cast %63 : vector<1x32x288xf32> to vector<32x288xf32>
    %c0_14 = arith.constant 0 : index
    %c0_15 = arith.constant 0 : index
    %c0_16 = arith.constant 0 : index
    %65 = vector.load %arg6[%c0_14, %c0_15, %c0_16] : memref<2x32x1xf32, #tpu.memory_space<vmem>>, vector<1x32x1xf32>
    %66 = vector.shape_cast %65 : vector<1x32x1xf32> to vector<32x1xf32>
    %67 = vector.extract_strided_slice %62 {offsets = [0, 239], sizes = [32, 17], strides = [1, 1]} : vector<32x256xf32> to vector<32x17xf32>
    %68 = vector.extract_strided_slice %62 {offsets = [0, 0], sizes = [32, 239], strides = [1, 1]} : vector<32x256xf32> to vector<32x239xf32>
    %69 = tpu.concatenate %67, %68 in 1 : vector<32x17xf32>, vector<32x239xf32> -> vector<32x256xf32>
    %70 = vector.broadcast %1 : vector<1x256xf32> to vector<32x256xf32>
    %71 = arith.mulf %69, %70 : vector<32x256xf32>
    %72 = vector.extract_strided_slice %62 {offsets = [0, 240], sizes = [32, 16], strides = [1, 1]} : vector<32x256xf32> to vector<32x16xf32>
    %73 = vector.extract_strided_slice %62 {offsets = [0, 0], sizes = [32, 240], strides = [1, 1]} : vector<32x256xf32> to vector<32x240xf32>
    %74 = tpu.concatenate %72, %73 in 1 : vector<32x16xf32>, vector<32x240xf32> -> vector<32x256xf32>
    %75 = vector.broadcast %2 : vector<1x256xf32> to vector<32x256xf32>
    %76 = arith.mulf %74, %75 : vector<32x256xf32>
    %77 = vector.extract_strided_slice %62 {offsets = [0, 241], sizes = [32, 15], strides = [1, 1]} : vector<32x256xf32> to vector<32x15xf32>
    %78 = vector.extract_strided_slice %62 {offsets = [0, 0], sizes = [32, 241], strides = [1, 1]} : vector<32x256xf32> to vector<32x241xf32>
    %79 = tpu.concatenate %77, %78 in 1 : vector<32x15xf32>, vector<32x241xf32> -> vector<32x256xf32>
    %80 = vector.broadcast %3 : vector<1x256xf32> to vector<32x256xf32>
    %81 = arith.mulf %79, %80 : vector<32x256xf32>
    %82 = vector.extract_strided_slice %62 {offsets = [0, 255], sizes = [32, 1], strides = [1, 1]} : vector<32x256xf32> to vector<32x1xf32>
    %83 = vector.extract_strided_slice %62 {offsets = [0, 0], sizes = [32, 255], strides = [1, 1]} : vector<32x256xf32> to vector<32x255xf32>
    %84 = tpu.concatenate %82, %83 in 1 : vector<32x1xf32>, vector<32x255xf32> -> vector<32x256xf32>
    %85 = vector.broadcast %4 : vector<1x256xf32> to vector<32x256xf32>
    %86 = arith.mulf %84, %85 : vector<32x256xf32>
    %87 = vector.extract_strided_slice %62 {offsets = [0, 1], sizes = [32, 255], strides = [1, 1]} : vector<32x256xf32> to vector<32x255xf32>
    %88 = vector.extract_strided_slice %62 {offsets = [0, 0], sizes = [32, 1], strides = [1, 1]} : vector<32x256xf32> to vector<32x1xf32>
    %89 = tpu.concatenate %87, %88 in 1 : vector<32x255xf32>, vector<32x1xf32> -> vector<32x256xf32>
    %90 = vector.broadcast %5 : vector<1x256xf32> to vector<32x256xf32>
    %91 = arith.mulf %89, %90 : vector<32x256xf32>
    %92 = vector.extract_strided_slice %62 {offsets = [0, 15], sizes = [32, 241], strides = [1, 1]} : vector<32x256xf32> to vector<32x241xf32>
    %93 = vector.extract_strided_slice %62 {offsets = [0, 0], sizes = [32, 15], strides = [1, 1]} : vector<32x256xf32> to vector<32x15xf32>
    %94 = tpu.concatenate %92, %93 in 1 : vector<32x241xf32>, vector<32x15xf32> -> vector<32x256xf32>
    %95 = vector.broadcast %6 : vector<1x256xf32> to vector<32x256xf32>
    %96 = arith.mulf %94, %95 : vector<32x256xf32>
    %97 = vector.extract_strided_slice %62 {offsets = [0, 16], sizes = [32, 240], strides = [1, 1]} : vector<32x256xf32> to vector<32x240xf32>
    %98 = vector.extract_strided_slice %62 {offsets = [0, 0], sizes = [32, 16], strides = [1, 1]} : vector<32x256xf32> to vector<32x16xf32>
    %99 = tpu.concatenate %97, %98 in 1 : vector<32x240xf32>, vector<32x16xf32> -> vector<32x256xf32>
    %100 = vector.broadcast %7 : vector<1x256xf32> to vector<32x256xf32>
    %101 = arith.mulf %99, %100 : vector<32x256xf32>
    %102 = vector.extract_strided_slice %62 {offsets = [0, 17], sizes = [32, 239], strides = [1, 1]} : vector<32x256xf32> to vector<32x239xf32>
    %103 = vector.extract_strided_slice %62 {offsets = [0, 0], sizes = [32, 17], strides = [1, 1]} : vector<32x256xf32> to vector<32x17xf32>
    %104 = tpu.concatenate %102, %103 in 1 : vector<32x239xf32>, vector<32x17xf32> -> vector<32x256xf32>
    %105 = vector.broadcast %8 : vector<1x256xf32> to vector<32x256xf32>
    %106 = arith.mulf %104, %105 : vector<32x256xf32>
    %107 = tpu.concatenate %71, %76, %81, %86, %62, %91, %96, %101, %106 in 0 : vector<32x256xf32>, vector<32x256xf32>, vector<32x256xf32>, vector<32x256xf32>, vector<32x256xf32>, vector<32x256xf32>, vector<32x256xf32>, vector<32x256xf32>, vector<32x256xf32> -> vector<288x256xf32>
    %cst_17 = arith.constant dense<0.000000e+00> : vector<32x256xf32>
    %108 = tpu.matmul %64, %107, %cst_17 {dimension_numbers = #tpu.dot_dimension_numbers<[1], [0], [0], [1], [0, 0, 1, 1], [], []>} : vector<32x288xf32>, vector<288x256xf32>, vector<32x256xf32> -> vector<32x256xf32>
    %109 = vector.broadcast %66 : vector<32x1xf32> to vector<32x256xf32>
    %110 = arith.addf %108, %109 : vector<32x256xf32>
    %cst_18 = arith.constant 0.000000e+00 : f32
    %111 = vector.broadcast %cst_18 : f32 to vector<32x256xf32>
    %112 = arith.maximumf %110, %111 : vector<32x256xf32>
    %c0_19 = arith.constant 0 : index
    %c0_20 = arith.constant 0 : index
    %c0_21 = arith.constant 0 : index
    %113 = vector.load %arg7[%c0_19, %c0_20, %c0_21] : memref<2x32x288xf32, #tpu.memory_space<vmem>>, vector<1x32x288xf32>
    %114 = vector.shape_cast %113 : vector<1x32x288xf32> to vector<32x288xf32>
    %c0_22 = arith.constant 0 : index
    %c0_23 = arith.constant 0 : index
    %c0_24 = arith.constant 0 : index
    %115 = vector.load %arg8[%c0_22, %c0_23, %c0_24] : memref<2x32x1xf32, #tpu.memory_space<vmem>>, vector<1x32x1xf32>
    %116 = vector.shape_cast %115 : vector<1x32x1xf32> to vector<32x1xf32>
    %117 = vector.extract_strided_slice %112 {offsets = [0, 239], sizes = [32, 17], strides = [1, 1]} : vector<32x256xf32> to vector<32x17xf32>
    %118 = vector.extract_strided_slice %112 {offsets = [0, 0], sizes = [32, 239], strides = [1, 1]} : vector<32x256xf32> to vector<32x239xf32>
    %119 = tpu.concatenate %117, %118 in 1 : vector<32x17xf32>, vector<32x239xf32> -> vector<32x256xf32>
    %120 = vector.broadcast %1 : vector<1x256xf32> to vector<32x256xf32>
    %121 = arith.mulf %119, %120 : vector<32x256xf32>
    %122 = vector.extract_strided_slice %112 {offsets = [0, 240], sizes = [32, 16], strides = [1, 1]} : vector<32x256xf32> to vector<32x16xf32>
    %123 = vector.extract_strided_slice %112 {offsets = [0, 0], sizes = [32, 240], strides = [1, 1]} : vector<32x256xf32> to vector<32x240xf32>
    %124 = tpu.concatenate %122, %123 in 1 : vector<32x16xf32>, vector<32x240xf32> -> vector<32x256xf32>
    %125 = vector.broadcast %2 : vector<1x256xf32> to vector<32x256xf32>
    %126 = arith.mulf %124, %125 : vector<32x256xf32>
    %127 = vector.extract_strided_slice %112 {offsets = [0, 241], sizes = [32, 15], strides = [1, 1]} : vector<32x256xf32> to vector<32x15xf32>
    %128 = vector.extract_strided_slice %112 {offsets = [0, 0], sizes = [32, 241], strides = [1, 1]} : vector<32x256xf32> to vector<32x241xf32>
    %129 = tpu.concatenate %127, %128 in 1 : vector<32x15xf32>, vector<32x241xf32> -> vector<32x256xf32>
    %130 = vector.broadcast %3 : vector<1x256xf32> to vector<32x256xf32>
    %131 = arith.mulf %129, %130 : vector<32x256xf32>
    %132 = vector.extract_strided_slice %112 {offsets = [0, 255], sizes = [32, 1], strides = [1, 1]} : vector<32x256xf32> to vector<32x1xf32>
    %133 = vector.extract_strided_slice %112 {offsets = [0, 0], sizes = [32, 255], strides = [1, 1]} : vector<32x256xf32> to vector<32x255xf32>
    %134 = tpu.concatenate %132, %133 in 1 : vector<32x1xf32>, vector<32x255xf32> -> vector<32x256xf32>
    %135 = vector.broadcast %4 : vector<1x256xf32> to vector<32x256xf32>
    %136 = arith.mulf %134, %135 : vector<32x256xf32>
    %137 = vector.extract_strided_slice %112 {offsets = [0, 1], sizes = [32, 255], strides = [1, 1]} : vector<32x256xf32> to vector<32x255xf32>
    %138 = vector.extract_strided_slice %112 {offsets = [0, 0], sizes = [32, 1], strides = [1, 1]} : vector<32x256xf32> to vector<32x1xf32>
    %139 = tpu.concatenate %137, %138 in 1 : vector<32x255xf32>, vector<32x1xf32> -> vector<32x256xf32>
    %140 = vector.broadcast %5 : vector<1x256xf32> to vector<32x256xf32>
    %141 = arith.mulf %139, %140 : vector<32x256xf32>
    %142 = vector.extract_strided_slice %112 {offsets = [0, 15], sizes = [32, 241], strides = [1, 1]} : vector<32x256xf32> to vector<32x241xf32>
    %143 = vector.extract_strided_slice %112 {offsets = [0, 0], sizes = [32, 15], strides = [1, 1]} : vector<32x256xf32> to vector<32x15xf32>
    %144 = tpu.concatenate %142, %143 in 1 : vector<32x241xf32>, vector<32x15xf32> -> vector<32x256xf32>
    %145 = vector.broadcast %6 : vector<1x256xf32> to vector<32x256xf32>
    %146 = arith.mulf %144, %145 : vector<32x256xf32>
    %147 = vector.extract_strided_slice %112 {offsets = [0, 16], sizes = [32, 240], strides = [1, 1]} : vector<32x256xf32> to vector<32x240xf32>
    %148 = vector.extract_strided_slice %112 {offsets = [0, 0], sizes = [32, 16], strides = [1, 1]} : vector<32x256xf32> to vector<32x16xf32>
    %149 = tpu.concatenate %147, %148 in 1 : vector<32x240xf32>, vector<32x16xf32> -> vector<32x256xf32>
    %150 = vector.broadcast %7 : vector<1x256xf32> to vector<32x256xf32>
    %151 = arith.mulf %149, %150 : vector<32x256xf32>
    %152 = vector.extract_strided_slice %112 {offsets = [0, 17], sizes = [32, 239], strides = [1, 1]} : vector<32x256xf32> to vector<32x239xf32>
    %153 = vector.extract_strided_slice %112 {offsets = [0, 0], sizes = [32, 17], strides = [1, 1]} : vector<32x256xf32> to vector<32x17xf32>
    %154 = tpu.concatenate %152, %153 in 1 : vector<32x239xf32>, vector<32x17xf32> -> vector<32x256xf32>
    %155 = vector.broadcast %8 : vector<1x256xf32> to vector<32x256xf32>
    %156 = arith.mulf %154, %155 : vector<32x256xf32>
    %157 = tpu.concatenate %121, %126, %131, %136, %112, %141, %146, %151, %156 in 0 : vector<32x256xf32>, vector<32x256xf32>, vector<32x256xf32>, vector<32x256xf32>, vector<32x256xf32>, vector<32x256xf32>, vector<32x256xf32>, vector<32x256xf32>, vector<32x256xf32> -> vector<288x256xf32>
    %cst_25 = arith.constant dense<0.000000e+00> : vector<32x256xf32>
    %158 = tpu.matmul %114, %157, %cst_25 {dimension_numbers = #tpu.dot_dimension_numbers<[1], [0], [0], [1], [0, 0, 1, 1], [], []>} : vector<32x288xf32>, vector<288x256xf32>, vector<32x256xf32> -> vector<32x256xf32>
    %159 = vector.broadcast %116 : vector<32x1xf32> to vector<32x256xf32>
    %160 = arith.addf %158, %159 : vector<32x256xf32>
    %cst_26 = arith.constant dense<0.000000e+00> : vector<32x1xf32>
    %161 = tpu.matmul %160, %9, %cst_26 {dimension_numbers = #tpu.dot_dimension_numbers<[1], [0], [0], [1], [0, 0, 1, 1], [], []>} : vector<32x256xf32>, vector<256x1xf32>, vector<32x1xf32> -> vector<32x1xf32>
    %cst_27 = arith.constant 3.906250e-03 : f32
    %162 = vector.broadcast %cst_27 : f32 to vector<32x1xf32>
    %163 = arith.mulf %161, %162 : vector<32x1xf32>
    %c0_28 = arith.constant 0 : index
    %c0_29 = arith.constant 0 : index
    %c0_30 = arith.constant 0 : index
    %164 = vector.load %arg9[%c0_28, %c0_29, %c0_30] : memref<2x2x32xf32, #tpu.memory_space<vmem>>, vector<1x2x32xf32>
    %165 = vector.shape_cast %164 : vector<1x2x32xf32> to vector<2x32xf32>
    %cst_31 = arith.constant dense<0.000000e+00> : vector<2x1xf32>
    %166 = tpu.matmul %165, %163, %cst_31 {dimension_numbers = #tpu.dot_dimension_numbers<[1], [0], [0], [1], [0, 0, 1, 1], [], []>} : vector<2x32xf32>, vector<32x1xf32>, vector<2x1xf32> -> vector<2x1xf32>
    %c0_32 = arith.constant 0 : index
    %c0_33 = arith.constant 0 : index
    %c0_34 = arith.constant 0 : index
    %167 = vector.load %arg10[%c0_32, %c0_33, %c0_34] : memref<2x2x1xf32, #tpu.memory_space<vmem>>, vector<1x2x1xf32>
    %168 = vector.shape_cast %167 : vector<1x2x1xf32> to vector<2x1xf32>
    %169 = arith.addf %166, %168 : vector<2x1xf32>
    %cst_35 = arith.constant 0.000000e+00 : f32
    %170 = vector.broadcast %cst_35 : f32 to vector<2x1xf32>
    %171 = arith.maximumf %169, %170 : vector<2x1xf32>
    %c0_36 = arith.constant 0 : index
    %c0_37 = arith.constant 0 : index
    %c0_38 = arith.constant 0 : index
    %172 = vector.load %arg11[%c0_36, %c0_37, %c0_38] : memref<2x32x2xf32, #tpu.memory_space<vmem>>, vector<1x32x2xf32>
    %173 = vector.shape_cast %172 : vector<1x32x2xf32> to vector<32x2xf32>
    %cst_39 = arith.constant dense<0.000000e+00> : vector<32x1xf32>
    %174 = tpu.matmul %173, %171, %cst_39 {dimension_numbers = #tpu.dot_dimension_numbers<[1], [0], [0], [1], [0, 0, 1, 1], [], []>} : vector<32x2xf32>, vector<2x1xf32>, vector<32x1xf32> -> vector<32x1xf32>
    %c0_40 = arith.constant 0 : index
    %c0_41 = arith.constant 0 : index
    %c0_42 = arith.constant 0 : index
    %175 = vector.load %arg12[%c0_40, %c0_41, %c0_42] : memref<2x32x1xf32, #tpu.memory_space<vmem>>, vector<1x32x1xf32>
    %176 = vector.shape_cast %175 : vector<1x32x1xf32> to vector<32x1xf32>
    %177 = arith.addf %174, %176 : vector<32x1xf32>
    %178 = arith.negf %177 : vector<32x1xf32>
    %179 = math.exp %178 : vector<32x1xf32>
    %cst_43 = arith.constant 1.000000e+00 : f32
    %180 = vector.broadcast %cst_43 : f32 to vector<32x1xf32>
    %181 = arith.addf %180, %179 : vector<32x1xf32>
    %182 = arith.divf %180, %181 : vector<32x1xf32>
    %183 = vector.broadcast %182 : vector<32x1xf32> to vector<32x256xf32>
    %184 = arith.mulf %160, %183 : vector<32x256xf32>
    %185 = arith.addf %184, %62 : vector<32x256xf32>
    %c1 = arith.constant 1 : index
    %c0_44 = arith.constant 0 : index
    %c0_45 = arith.constant 0 : index
    %186 = vector.load %arg5[%c1, %c0_44, %c0_45] : memref<2x32x288xf32, #tpu.memory_space<vmem>>, vector<1x32x288xf32>
    %187 = vector.shape_cast %186 : vector<1x32x288xf32> to vector<32x288xf32>
    %c1_46 = arith.constant 1 : index
    %c0_47 = arith.constant 0 : index
    %c0_48 = arith.constant 0 : index
    %188 = vector.load %arg6[%c1_46, %c0_47, %c0_48] : memref<2x32x1xf32, #tpu.memory_space<vmem>>, vector<1x32x1xf32>
    %189 = vector.shape_cast %188 : vector<1x32x1xf32> to vector<32x1xf32>
    %190 = vector.extract_strided_slice %185 {offsets = [0, 239], sizes = [32, 17], strides = [1, 1]} : vector<32x256xf32> to vector<32x17xf32>
    %191 = vector.extract_strided_slice %185 {offsets = [0, 0], sizes = [32, 239], strides = [1, 1]} : vector<32x256xf32> to vector<32x239xf32>
    %192 = tpu.concatenate %190, %191 in 1 : vector<32x17xf32>, vector<32x239xf32> -> vector<32x256xf32>
    %193 = vector.broadcast %1 : vector<1x256xf32> to vector<32x256xf32>
    %194 = arith.mulf %192, %193 : vector<32x256xf32>
    %195 = vector.extract_strided_slice %185 {offsets = [0, 240], sizes = [32, 16], strides = [1, 1]} : vector<32x256xf32> to vector<32x16xf32>
    %196 = vector.extract_strided_slice %185 {offsets = [0, 0], sizes = [32, 240], strides = [1, 1]} : vector<32x256xf32> to vector<32x240xf32>
    %197 = tpu.concatenate %195, %196 in 1 : vector<32x16xf32>, vector<32x240xf32> -> vector<32x256xf32>
    %198 = vector.broadcast %2 : vector<1x256xf32> to vector<32x256xf32>
    %199 = arith.mulf %197, %198 : vector<32x256xf32>
    %200 = vector.extract_strided_slice %185 {offsets = [0, 241], sizes = [32, 15], strides = [1, 1]} : vector<32x256xf32> to vector<32x15xf32>
    %201 = vector.extract_strided_slice %185 {offsets = [0, 0], sizes = [32, 241], strides = [1, 1]} : vector<32x256xf32> to vector<32x241xf32>
    %202 = tpu.concatenate %200, %201 in 1 : vector<32x15xf32>, vector<32x241xf32> -> vector<32x256xf32>
    %203 = vector.broadcast %3 : vector<1x256xf32> to vector<32x256xf32>
    %204 = arith.mulf %202, %203 : vector<32x256xf32>
    %205 = vector.extract_strided_slice %185 {offsets = [0, 255], sizes = [32, 1], strides = [1, 1]} : vector<32x256xf32> to vector<32x1xf32>
    %206 = vector.extract_strided_slice %185 {offsets = [0, 0], sizes = [32, 255], strides = [1, 1]} : vector<32x256xf32> to vector<32x255xf32>
    %207 = tpu.concatenate %205, %206 in 1 : vector<32x1xf32>, vector<32x255xf32> -> vector<32x256xf32>
    %208 = vector.broadcast %4 : vector<1x256xf32> to vector<32x256xf32>
    %209 = arith.mulf %207, %208 : vector<32x256xf32>
    %210 = vector.extract_strided_slice %185 {offsets = [0, 1], sizes = [32, 255], strides = [1, 1]} : vector<32x256xf32> to vector<32x255xf32>
    %211 = vector.extract_strided_slice %185 {offsets = [0, 0], sizes = [32, 1], strides = [1, 1]} : vector<32x256xf32> to vector<32x1xf32>
    %212 = tpu.concatenate %210, %211 in 1 : vector<32x255xf32>, vector<32x1xf32> -> vector<32x256xf32>
    %213 = vector.broadcast %5 : vector<1x256xf32> to vector<32x256xf32>
    %214 = arith.mulf %212, %213 : vector<32x256xf32>
    %215 = vector.extract_strided_slice %185 {offsets = [0, 15], sizes = [32, 241], strides = [1, 1]} : vector<32x256xf32> to vector<32x241xf32>
    %216 = vector.extract_strided_slice %185 {offsets = [0, 0], sizes = [32, 15], strides = [1, 1]} : vector<32x256xf32> to vector<32x15xf32>
    %217 = tpu.concatenate %215, %216 in 1 : vector<32x241xf32>, vector<32x15xf32> -> vector<32x256xf32>
    %218 = vector.broadcast %6 : vector<1x256xf32> to vector<32x256xf32>
    %219 = arith.mulf %217, %218 : vector<32x256xf32>
    %220 = vector.extract_strided_slice %185 {offsets = [0, 16], sizes = [32, 240], strides = [1, 1]} : vector<32x256xf32> to vector<32x240xf32>
    %221 = vector.extract_strided_slice %185 {offsets = [0, 0], sizes = [32, 16], strides = [1, 1]} : vector<32x256xf32> to vector<32x16xf32>
    %222 = tpu.concatenate %220, %221 in 1 : vector<32x240xf32>, vector<32x16xf32> -> vector<32x256xf32>
    %223 = vector.broadcast %7 : vector<1x256xf32> to vector<32x256xf32>
    %224 = arith.mulf %222, %223 : vector<32x256xf32>
    %225 = vector.extract_strided_slice %185 {offsets = [0, 17], sizes = [32, 239], strides = [1, 1]} : vector<32x256xf32> to vector<32x239xf32>
    %226 = vector.extract_strided_slice %185 {offsets = [0, 0], sizes = [32, 17], strides = [1, 1]} : vector<32x256xf32> to vector<32x17xf32>
    %227 = tpu.concatenate %225, %226 in 1 : vector<32x239xf32>, vector<32x17xf32> -> vector<32x256xf32>
    %228 = vector.broadcast %8 : vector<1x256xf32> to vector<32x256xf32>
    %229 = arith.mulf %227, %228 : vector<32x256xf32>
    %230 = tpu.concatenate %194, %199, %204, %209, %185, %214, %219, %224, %229 in 0 : vector<32x256xf32>, vector<32x256xf32>, vector<32x256xf32>, vector<32x256xf32>, vector<32x256xf32>, vector<32x256xf32>, vector<32x256xf32>, vector<32x256xf32>, vector<32x256xf32> -> vector<288x256xf32>
    %cst_49 = arith.constant dense<0.000000e+00> : vector<32x256xf32>
    %231 = tpu.matmul %187, %230, %cst_49 {dimension_numbers = #tpu.dot_dimension_numbers<[1], [0], [0], [1], [0, 0, 1, 1], [], []>} : vector<32x288xf32>, vector<288x256xf32>, vector<32x256xf32> -> vector<32x256xf32>
    %232 = vector.broadcast %189 : vector<32x1xf32> to vector<32x256xf32>
    %233 = arith.addf %231, %232 : vector<32x256xf32>
    %cst_50 = arith.constant 0.000000e+00 : f32
    %234 = vector.broadcast %cst_50 : f32 to vector<32x256xf32>
    %235 = arith.maximumf %233, %234 : vector<32x256xf32>
    %c1_51 = arith.constant 1 : index
    %c0_52 = arith.constant 0 : index
    %c0_53 = arith.constant 0 : index
    %236 = vector.load %arg7[%c1_51, %c0_52, %c0_53] : memref<2x32x288xf32, #tpu.memory_space<vmem>>, vector<1x32x288xf32>
    %237 = vector.shape_cast %236 : vector<1x32x288xf32> to vector<32x288xf32>
    %c1_54 = arith.constant 1 : index
    %c0_55 = arith.constant 0 : index
    %c0_56 = arith.constant 0 : index
    %238 = vector.load %arg8[%c1_54, %c0_55, %c0_56] : memref<2x32x1xf32, #tpu.memory_space<vmem>>, vector<1x32x1xf32>
    %239 = vector.shape_cast %238 : vector<1x32x1xf32> to vector<32x1xf32>
    %240 = vector.extract_strided_slice %235 {offsets = [0, 239], sizes = [32, 17], strides = [1, 1]} : vector<32x256xf32> to vector<32x17xf32>
    %241 = vector.extract_strided_slice %235 {offsets = [0, 0], sizes = [32, 239], strides = [1, 1]} : vector<32x256xf32> to vector<32x239xf32>
    %242 = tpu.concatenate %240, %241 in 1 : vector<32x17xf32>, vector<32x239xf32> -> vector<32x256xf32>
    %243 = vector.broadcast %1 : vector<1x256xf32> to vector<32x256xf32>
    %244 = arith.mulf %242, %243 : vector<32x256xf32>
    %245 = vector.extract_strided_slice %235 {offsets = [0, 240], sizes = [32, 16], strides = [1, 1]} : vector<32x256xf32> to vector<32x16xf32>
    %246 = vector.extract_strided_slice %235 {offsets = [0, 0], sizes = [32, 240], strides = [1, 1]} : vector<32x256xf32> to vector<32x240xf32>
    %247 = tpu.concatenate %245, %246 in 1 : vector<32x16xf32>, vector<32x240xf32> -> vector<32x256xf32>
    %248 = vector.broadcast %2 : vector<1x256xf32> to vector<32x256xf32>
    %249 = arith.mulf %247, %248 : vector<32x256xf32>
    %250 = vector.extract_strided_slice %235 {offsets = [0, 241], sizes = [32, 15], strides = [1, 1]} : vector<32x256xf32> to vector<32x15xf32>
    %251 = vector.extract_strided_slice %235 {offsets = [0, 0], sizes = [32, 241], strides = [1, 1]} : vector<32x256xf32> to vector<32x241xf32>
    %252 = tpu.concatenate %250, %251 in 1 : vector<32x15xf32>, vector<32x241xf32> -> vector<32x256xf32>
    %253 = vector.broadcast %3 : vector<1x256xf32> to vector<32x256xf32>
    %254 = arith.mulf %252, %253 : vector<32x256xf32>
    %255 = vector.extract_strided_slice %235 {offsets = [0, 255], sizes = [32, 1], strides = [1, 1]} : vector<32x256xf32> to vector<32x1xf32>
    %256 = vector.extract_strided_slice %235 {offsets = [0, 0], sizes = [32, 255], strides = [1, 1]} : vector<32x256xf32> to vector<32x255xf32>
    %257 = tpu.concatenate %255, %256 in 1 : vector<32x1xf32>, vector<32x255xf32> -> vector<32x256xf32>
    %258 = vector.broadcast %4 : vector<1x256xf32> to vector<32x256xf32>
    %259 = arith.mulf %257, %258 : vector<32x256xf32>
    %260 = vector.extract_strided_slice %235 {offsets = [0, 1], sizes = [32, 255], strides = [1, 1]} : vector<32x256xf32> to vector<32x255xf32>
    %261 = vector.extract_strided_slice %235 {offsets = [0, 0], sizes = [32, 1], strides = [1, 1]} : vector<32x256xf32> to vector<32x1xf32>
    %262 = tpu.concatenate %260, %261 in 1 : vector<32x255xf32>, vector<32x1xf32> -> vector<32x256xf32>
    %263 = vector.broadcast %5 : vector<1x256xf32> to vector<32x256xf32>
    %264 = arith.mulf %262, %263 : vector<32x256xf32>
    %265 = vector.extract_strided_slice %235 {offsets = [0, 15], sizes = [32, 241], strides = [1, 1]} : vector<32x256xf32> to vector<32x241xf32>
    %266 = vector.extract_strided_slice %235 {offsets = [0, 0], sizes = [32, 15], strides = [1, 1]} : vector<32x256xf32> to vector<32x15xf32>
    %267 = tpu.concatenate %265, %266 in 1 : vector<32x241xf32>, vector<32x15xf32> -> vector<32x256xf32>
    %268 = vector.broadcast %6 : vector<1x256xf32> to vector<32x256xf32>
    %269 = arith.mulf %267, %268 : vector<32x256xf32>
    %270 = vector.extract_strided_slice %235 {offsets = [0, 16], sizes = [32, 240], strides = [1, 1]} : vector<32x256xf32> to vector<32x240xf32>
    %271 = vector.extract_strided_slice %235 {offsets = [0, 0], sizes = [32, 16], strides = [1, 1]} : vector<32x256xf32> to vector<32x16xf32>
    %272 = tpu.concatenate %270, %271 in 1 : vector<32x240xf32>, vector<32x16xf32> -> vector<32x256xf32>
    %273 = vector.broadcast %7 : vector<1x256xf32> to vector<32x256xf32>
    %274 = arith.mulf %272, %273 : vector<32x256xf32>
    %275 = vector.extract_strided_slice %235 {offsets = [0, 17], sizes = [32, 239], strides = [1, 1]} : vector<32x256xf32> to vector<32x239xf32>
    %276 = vector.extract_strided_slice %235 {offsets = [0, 0], sizes = [32, 17], strides = [1, 1]} : vector<32x256xf32> to vector<32x17xf32>
    %277 = tpu.concatenate %275, %276 in 1 : vector<32x239xf32>, vector<32x17xf32> -> vector<32x256xf32>
    %278 = vector.broadcast %8 : vector<1x256xf32> to vector<32x256xf32>
    %279 = arith.mulf %277, %278 : vector<32x256xf32>
    %280 = tpu.concatenate %244, %249, %254, %259, %235, %264, %269, %274, %279 in 0 : vector<32x256xf32>, vector<32x256xf32>, vector<32x256xf32>, vector<32x256xf32>, vector<32x256xf32>, vector<32x256xf32>, vector<32x256xf32>, vector<32x256xf32>, vector<32x256xf32> -> vector<288x256xf32>
    %cst_57 = arith.constant dense<0.000000e+00> : vector<32x256xf32>
    %281 = tpu.matmul %237, %280, %cst_57 {dimension_numbers = #tpu.dot_dimension_numbers<[1], [0], [0], [1], [0, 0, 1, 1], [], []>} : vector<32x288xf32>, vector<288x256xf32>, vector<32x256xf32> -> vector<32x256xf32>
    %282 = vector.broadcast %239 : vector<32x1xf32> to vector<32x256xf32>
    %283 = arith.addf %281, %282 : vector<32x256xf32>
    %cst_58 = arith.constant dense<0.000000e+00> : vector<32x1xf32>
    %284 = tpu.matmul %283, %9, %cst_58 {dimension_numbers = #tpu.dot_dimension_numbers<[1], [0], [0], [1], [0, 0, 1, 1], [], []>} : vector<32x256xf32>, vector<256x1xf32>, vector<32x1xf32> -> vector<32x1xf32>
    %cst_59 = arith.constant 3.906250e-03 : f32
    %285 = vector.broadcast %cst_59 : f32 to vector<32x1xf32>
    %286 = arith.mulf %284, %285 : vector<32x1xf32>
    %c1_60 = arith.constant 1 : index
    %c0_61 = arith.constant 0 : index
    %c0_62 = arith.constant 0 : index
    %287 = vector.load %arg9[%c1_60, %c0_61, %c0_62] : memref<2x2x32xf32, #tpu.memory_space<vmem>>, vector<1x2x32xf32>
    %288 = vector.shape_cast %287 : vector<1x2x32xf32> to vector<2x32xf32>
    %cst_63 = arith.constant dense<0.000000e+00> : vector<2x1xf32>
    %289 = tpu.matmul %288, %286, %cst_63 {dimension_numbers = #tpu.dot_dimension_numbers<[1], [0], [0], [1], [0, 0, 1, 1], [], []>} : vector<2x32xf32>, vector<32x1xf32>, vector<2x1xf32> -> vector<2x1xf32>
    %c1_64 = arith.constant 1 : index
    %c0_65 = arith.constant 0 : index
    %c0_66 = arith.constant 0 : index
    %290 = vector.load %arg10[%c1_64, %c0_65, %c0_66] : memref<2x2x1xf32, #tpu.memory_space<vmem>>, vector<1x2x1xf32>
    %291 = vector.shape_cast %290 : vector<1x2x1xf32> to vector<2x1xf32>
    %292 = arith.addf %289, %291 : vector<2x1xf32>
    %cst_67 = arith.constant 0.000000e+00 : f32
    %293 = vector.broadcast %cst_67 : f32 to vector<2x1xf32>
    %294 = arith.maximumf %292, %293 : vector<2x1xf32>
    %c1_68 = arith.constant 1 : index
    %c0_69 = arith.constant 0 : index
    %c0_70 = arith.constant 0 : index
    %295 = vector.load %arg11[%c1_68, %c0_69, %c0_70] : memref<2x32x2xf32, #tpu.memory_space<vmem>>, vector<1x32x2xf32>
    %296 = vector.shape_cast %295 : vector<1x32x2xf32> to vector<32x2xf32>
    %cst_71 = arith.constant dense<0.000000e+00> : vector<32x1xf32>
    %297 = tpu.matmul %296, %294, %cst_71 {dimension_numbers = #tpu.dot_dimension_numbers<[1], [0], [0], [1], [0, 0, 1, 1], [], []>} : vector<32x2xf32>, vector<2x1xf32>, vector<32x1xf32> -> vector<32x1xf32>
    %c1_72 = arith.constant 1 : index
    %c0_73 = arith.constant 0 : index
    %c0_74 = arith.constant 0 : index
    %298 = vector.load %arg12[%c1_72, %c0_73, %c0_74] : memref<2x32x1xf32, #tpu.memory_space<vmem>>, vector<1x32x1xf32>
    %299 = vector.shape_cast %298 : vector<1x32x1xf32> to vector<32x1xf32>
    %300 = arith.addf %297, %299 : vector<32x1xf32>
    %301 = arith.negf %300 : vector<32x1xf32>
    %302 = math.exp %301 : vector<32x1xf32>
    %cst_75 = arith.constant 1.000000e+00 : f32
    %303 = vector.broadcast %cst_75 : f32 to vector<32x1xf32>
    %304 = arith.addf %303, %302 : vector<32x1xf32>
    %305 = arith.divf %303, %304 : vector<32x1xf32>
    %306 = vector.broadcast %305 : vector<32x1xf32> to vector<32x256xf32>
    %307 = arith.mulf %283, %306 : vector<32x256xf32>
    %308 = arith.addf %307, %185 : vector<32x256xf32>
    %c0_76 = arith.constant 0 : index
    %c0_77 = arith.constant 0 : index
    %309 = vector.load %arg13[%c0_76, %c0_77] : memref<32x288xf32, #tpu.memory_space<vmem>>, vector<32x288xf32>
    %c0_78 = arith.constant 0 : index
    %c0_79 = arith.constant 0 : index
    %310 = vector.load %arg14[%c0_78, %c0_79] : memref<32x1xf32, #tpu.memory_space<vmem>>, vector<32x1xf32>
    %311 = vector.extract_strided_slice %308 {offsets = [0, 239], sizes = [32, 17], strides = [1, 1]} : vector<32x256xf32> to vector<32x17xf32>
    %312 = vector.extract_strided_slice %308 {offsets = [0, 0], sizes = [32, 239], strides = [1, 1]} : vector<32x256xf32> to vector<32x239xf32>
    %313 = tpu.concatenate %311, %312 in 1 : vector<32x17xf32>, vector<32x239xf32> -> vector<32x256xf32>
    %314 = vector.broadcast %1 : vector<1x256xf32> to vector<32x256xf32>
    %315 = arith.mulf %313, %314 : vector<32x256xf32>
    %316 = vector.extract_strided_slice %308 {offsets = [0, 240], sizes = [32, 16], strides = [1, 1]} : vector<32x256xf32> to vector<32x16xf32>
    %317 = vector.extract_strided_slice %308 {offsets = [0, 0], sizes = [32, 240], strides = [1, 1]} : vector<32x256xf32> to vector<32x240xf32>
    %318 = tpu.concatenate %316, %317 in 1 : vector<32x16xf32>, vector<32x240xf32> -> vector<32x256xf32>
    %319 = vector.broadcast %2 : vector<1x256xf32> to vector<32x256xf32>
    %320 = arith.mulf %318, %319 : vector<32x256xf32>
    %321 = vector.extract_strided_slice %308 {offsets = [0, 241], sizes = [32, 15], strides = [1, 1]} : vector<32x256xf32> to vector<32x15xf32>
    %322 = vector.extract_strided_slice %308 {offsets = [0, 0], sizes = [32, 241], strides = [1, 1]} : vector<32x256xf32> to vector<32x241xf32>
    %323 = tpu.concatenate %321, %322 in 1 : vector<32x15xf32>, vector<32x241xf32> -> vector<32x256xf32>
    %324 = vector.broadcast %3 : vector<1x256xf32> to vector<32x256xf32>
    %325 = arith.mulf %323, %324 : vector<32x256xf32>
    %326 = vector.extract_strided_slice %308 {offsets = [0, 255], sizes = [32, 1], strides = [1, 1]} : vector<32x256xf32> to vector<32x1xf32>
    %327 = vector.extract_strided_slice %308 {offsets = [0, 0], sizes = [32, 255], strides = [1, 1]} : vector<32x256xf32> to vector<32x255xf32>
    %328 = tpu.concatenate %326, %327 in 1 : vector<32x1xf32>, vector<32x255xf32> -> vector<32x256xf32>
    %329 = vector.broadcast %4 : vector<1x256xf32> to vector<32x256xf32>
    %330 = arith.mulf %328, %329 : vector<32x256xf32>
    %331 = vector.extract_strided_slice %308 {offsets = [0, 1], sizes = [32, 255], strides = [1, 1]} : vector<32x256xf32> to vector<32x255xf32>
    %332 = vector.extract_strided_slice %308 {offsets = [0, 0], sizes = [32, 1], strides = [1, 1]} : vector<32x256xf32> to vector<32x1xf32>
    %333 = tpu.concatenate %331, %332 in 1 : vector<32x255xf32>, vector<32x1xf32> -> vector<32x256xf32>
    %334 = vector.broadcast %5 : vector<1x256xf32> to vector<32x256xf32>
    %335 = arith.mulf %333, %334 : vector<32x256xf32>
    %336 = vector.extract_strided_slice %308 {offsets = [0, 15], sizes = [32, 241], strides = [1, 1]} : vector<32x256xf32> to vector<32x241xf32>
    %337 = vector.extract_strided_slice %308 {offsets = [0, 0], sizes = [32, 15], strides = [1, 1]} : vector<32x256xf32> to vector<32x15xf32>
    %338 = tpu.concatenate %336, %337 in 1 : vector<32x241xf32>, vector<32x15xf32> -> vector<32x256xf32>
    %339 = vector.broadcast %6 : vector<1x256xf32> to vector<32x256xf32>
    %340 = arith.mulf %338, %339 : vector<32x256xf32>
    %341 = vector.extract_strided_slice %308 {offsets = [0, 16], sizes = [32, 240], strides = [1, 1]} : vector<32x256xf32> to vector<32x240xf32>
    %342 = vector.extract_strided_slice %308 {offsets = [0, 0], sizes = [32, 16], strides = [1, 1]} : vector<32x256xf32> to vector<32x16xf32>
    %343 = tpu.concatenate %341, %342 in 1 : vector<32x240xf32>, vector<32x16xf32> -> vector<32x256xf32>
    %344 = vector.broadcast %7 : vector<1x256xf32> to vector<32x256xf32>
    %345 = arith.mulf %343, %344 : vector<32x256xf32>
    %346 = vector.extract_strided_slice %308 {offsets = [0, 17], sizes = [32, 239], strides = [1, 1]} : vector<32x256xf32> to vector<32x239xf32>
    %347 = vector.extract_strided_slice %308 {offsets = [0, 0], sizes = [32, 17], strides = [1, 1]} : vector<32x256xf32> to vector<32x17xf32>
    %348 = tpu.concatenate %346, %347 in 1 : vector<32x239xf32>, vector<32x17xf32> -> vector<32x256xf32>
    %349 = vector.broadcast %8 : vector<1x256xf32> to vector<32x256xf32>
    %350 = arith.mulf %348, %349 : vector<32x256xf32>
    %351 = tpu.concatenate %315, %320, %325, %330, %308, %335, %340, %345, %350 in 0 : vector<32x256xf32>, vector<32x256xf32>, vector<32x256xf32>, vector<32x256xf32>, vector<32x256xf32>, vector<32x256xf32>, vector<32x256xf32>, vector<32x256xf32>, vector<32x256xf32> -> vector<288x256xf32>
    %cst_80 = arith.constant dense<0.000000e+00> : vector<32x256xf32>
    %352 = tpu.matmul %309, %351, %cst_80 {dimension_numbers = #tpu.dot_dimension_numbers<[1], [0], [0], [1], [0, 0, 1, 1], [], []>} : vector<32x288xf32>, vector<288x256xf32>, vector<32x256xf32> -> vector<32x256xf32>
    %353 = vector.broadcast %310 : vector<32x1xf32> to vector<32x256xf32>
    %354 = arith.addf %352, %353 : vector<32x256xf32>
    %355 = arith.addf %354, %62 : vector<32x256xf32>
    %c0_81 = arith.constant 0 : index
    %c0_82 = arith.constant 0 : index
    %c0_83 = arith.constant 0 : index
    %356 = vector.load %arg15[%c0_81, %c0_82, %c0_83] : memref<1x32x256xf32, #tpu.memory_space<vmem>>, vector<1x32x256xf32>
    %357 = vector.shape_cast %356 : vector<1x32x256xf32> to vector<32x256xf32>
    %358 = vector.shape_cast %355 : vector<32x256xf32> to vector<1x32x256xf32>
    tpu.vector_store %arg15[%c0_81, %c0_82, %c0_83], %358 {strides = array<i32>} : memref<1x32x256xf32, #tpu.memory_space<vmem>>, vector<1x32x256xf32>,
    return
  }
  func.func @transform_0(%arg0: i32) -> (i32, i32, i32) {
    %c0_i32 = arith.constant 0 : i32
    %c0_i32_0 = arith.constant 0 : i32
    %c0_i32_1 = arith.constant 0 : i32
    return %arg0, %c0_i32, %c0_i32_0 : i32, i32, i32
  }
  func.func @transform_1(%arg0: i32) -> (i32, i32) {
    %c0_i32 = arith.constant 0 : i32
    %c0_i32_0 = arith.constant 0 : i32
    %c0_i32_1 = arith.constant 0 : i32
    return %c0_i32, %c0_i32_0 : i32, i32
  }
  func.func @transform_2(%arg0: i32) -> (i32, i32) {
    %c0_i32 = arith.constant 0 : i32
    %c0_i32_0 = arith.constant 0 : i32
    %c0_i32_1 = arith.constant 0 : i32
    return %c0_i32, %c0_i32_0 : i32, i32
  }
  func.func @transform_3(%arg0: i32) -> (i32, i32) {
    %c0_i32 = arith.constant 0 : i32
    %c0_i32_0 = arith.constant 0 : i32
    %c0_i32_1 = arith.constant 0 : i32
    return %c0_i32, %c0_i32_0 : i32, i32
  }
  func.func @transform_4(%arg0: i32) -> (i32, i32, i32) {
    %c0_i32 = arith.constant 0 : i32
    %c0_i32_0 = arith.constant 0 : i32
    %c0_i32_1 = arith.constant 0 : i32
    %c0_i32_2 = arith.constant 0 : i32
    return %c0_i32, %c0_i32_0, %c0_i32_1 : i32, i32, i32
  }
  func.func @transform_5(%arg0: i32) -> (i32, i32, i32) {
    %c0_i32 = arith.constant 0 : i32
    %c0_i32_0 = arith.constant 0 : i32
    %c0_i32_1 = arith.constant 0 : i32
    %c0_i32_2 = arith.constant 0 : i32
    return %c0_i32, %c0_i32_0, %c0_i32_1 : i32, i32, i32
  }
  func.func @transform_6(%arg0: i32) -> (i32, i32, i32) {
    %c0_i32 = arith.constant 0 : i32
    %c0_i32_0 = arith.constant 0 : i32
    %c0_i32_1 = arith.constant 0 : i32
    %c0_i32_2 = arith.constant 0 : i32
    return %c0_i32, %c0_i32_0, %c0_i32_1 : i32, i32, i32
  }
  func.func @transform_7(%arg0: i32) -> (i32, i32, i32) {
    %c0_i32 = arith.constant 0 : i32
    %c0_i32_0 = arith.constant 0 : i32
    %c0_i32_1 = arith.constant 0 : i32
    %c0_i32_2 = arith.constant 0 : i32
    return %c0_i32, %c0_i32_0, %c0_i32_1 : i32, i32, i32
  }
  func.func @transform_8(%arg0: i32) -> (i32, i32, i32) {
    %c0_i32 = arith.constant 0 : i32
    %c0_i32_0 = arith.constant 0 : i32
    %c0_i32_1 = arith.constant 0 : i32
    %c0_i32_2 = arith.constant 0 : i32
    return %c0_i32, %c0_i32_0, %c0_i32_1 : i32, i32, i32
  }
  func.func @transform_9(%arg0: i32) -> (i32, i32, i32) {
    %c0_i32 = arith.constant 0 : i32
    %c0_i32_0 = arith.constant 0 : i32
    %c0_i32_1 = arith.constant 0 : i32
    %c0_i32_2 = arith.constant 0 : i32
    return %c0_i32, %c0_i32_0, %c0_i32_1 : i32, i32, i32
  }
  func.func @transform_10(%arg0: i32) -> (i32, i32, i32) {
    %c0_i32 = arith.constant 0 : i32
    %c0_i32_0 = arith.constant 0 : i32
    %c0_i32_1 = arith.constant 0 : i32
    %c0_i32_2 = arith.constant 0 : i32
    return %c0_i32, %c0_i32_0, %c0_i32_1 : i32, i32, i32
  }
  func.func @transform_11(%arg0: i32) -> (i32, i32, i32) {
    %c0_i32 = arith.constant 0 : i32
    %c0_i32_0 = arith.constant 0 : i32
    %c0_i32_1 = arith.constant 0 : i32
    %c0_i32_2 = arith.constant 0 : i32
    return %c0_i32, %c0_i32_0, %c0_i32_1 : i32, i32, i32
  }
  func.func @transform_12(%arg0: i32) -> (i32, i32) {
    %c0_i32 = arith.constant 0 : i32
    %c0_i32_0 = arith.constant 0 : i32
    %c0_i32_1 = arith.constant 0 : i32
    return %c0_i32, %c0_i32_0 : i32, i32
  }
  func.func @transform_13(%arg0: i32) -> (i32, i32) {
    %c0_i32 = arith.constant 0 : i32
    %c0_i32_0 = arith.constant 0 : i32
    %c0_i32_1 = arith.constant 0 : i32
    return %c0_i32, %c0_i32_0 : i32, i32
  }
  func.func @transform_14(%arg0: i32) -> (i32, i32, i32) {
    %c0_i32 = arith.constant 0 : i32
    %c0_i32_0 = arith.constant 0 : i32
    %c0_i32_1 = arith.constant 0 : i32
    return %arg0, %c0_i32, %c0_i32_0 : i32, i32, i32
  }
}

</mosaic_0001>

<bundles_post_ra>
// kernel: tpu_custom_call.1
= control target key start
LH: loop header
LB: loop body
LE: loop exit
PB: predicated region body
PF: predicated region fallthrough
CT: control target
= control target key end

     0   :  { %s8144_s0 = inlined_call_operand.hbm [shape: f32[2,4,256], index: 0, kind: input, shape index: {}]   ;;  %s8145_s1 = inlined_call_operand.vmem [shape: f32[9,256], index: 1, kind: input, shape index: {}]   ;;  %s8146_s2 = inlined_call_operand.vmem [shape: f32[32,36], index: 2, kind: input, shape index: {}]   ;;  %s8147_s3 = inlined_call_operand.vmem [shape: f32[32,1], index: 3, kind: input, shape index: {}]   ;;  %s8148_s4 = inlined_call_operand.vmem [shape: f32[2,32,288], index: 4, kind: input, shape index: {}]   ;;  %s8149_s5 = inlined_call_operand.vmem [shape: f32[2,32,1], index: 5, kind: input, shape index: {}]   ;;  %s8150_s6 = inlined_call_operand.hbm [shape: f32[2,32,288], index: 6, kind: input, shape index: {}]   ;;  %s8151_s7 = inlined_call_operand.vmem [shape: f32[2,32,1], index: 7, kind: input, shape index: {}]   ;;  %s8152_s8 = inlined_call_operand.vmem [shape: f32[2,2,32], index: 8, kind: input, shape index: {}]   ;;  %s8153_s9 = inlined_call_operand.vmem [shape: f32[2,2,1], index: 9, kind: input, shape index: {}]   ;;  %s8154_s10 = inlined_call_operand.vmem [shape: f32[2,32,2], index: 10, kind: input, shape index: {}]   ;;  %s8155_s11 = inlined_call_operand.vmem [shape: f32[2,32,1], index: 11, kind: input, shape index: {}]   ;;  %s8156_s12 = inlined_call_operand.vmem [shape: f32[32,288], index: 12, kind: input, shape index: {}]   ;;  %s8157_s13 = inlined_call_operand.vmem [shape: f32[32,1], index: 13, kind: input, shape index: {}]   ;;  %s8158_s14 = inlined_call_operand.hbm [shape: f32[2,32,256], index: 14, kind: output, shape index: {}]  }
   0x1   :  { %8208 = sst [smem:[#allocation28_spill]] %s8144_s0 }
   0x2   :  { %8209 = sst [smem:[#allocation29_spill]] %s8146_s2 }
   0x3   :  { %8210 = sst [smem:[#allocation30_spill]] %s8147_s3 }
   0x4   :  { %8211 = sst [smem:[#allocation31_spill]] %s8150_s6 }
   0x5   :  { %8212 = sst [smem:[#allocation32_spill]] %s8155_s11 }
   0x6   :  { %8213 = sst [smem:[#allocation33_spill]] %s8156_s12 }
   0x7   :  { %8214 = sst [smem:[#allocation34_spill]] %s8157_s13 }
   0x8   :  { %8215 = sst [smem:[#allocation35_spill]] %s8158_s14 }
   0x9   :  { %19 = vsyncpa [#allocation3], 0 }
   0xa   :  { %21 = vsyncpa [#allocation3 + $0x1], 0 }
   0xb   :  { %22 = vsyncpa [#allocation6], 0 }
   0xc   :  { %23 = vsyncpa [#allocation4], 0 }
   0xd   :  { %25 = vsyncpa [#allocation4 + $0x1], 0  ;;  %s5668_s29 = smov 0   ;;  %s5670_s30 = smov 0  }
   0xe   :  { %s5672_s15 = smov 0   ;;  %s5674_s16 = smov 0  }
   0xf LB: > { %8216 = sst [smem:[#allocation11_spill]] %s5560_s29  ;;  %s5689_s17 = sadd.s32 4294967295, %s5572_s16   ;;  %s5572_s16 = sphi %s5674_s16, %s8284_s16   ;;  %s5568_s15 = sphi %s5672_s15, %s8287_s15   ;;  %s5564_s30 = sphi %s5670_s30, %s8286_s30   ;;  %s5560_s29 = sphi %s5668_s29, %s8285_s29  }
  0x10   : > { %s4596_s18 = sadd.s32 4294967294, %s5572_s16   ;;  %p51_p0 = scmp.ne.s32.totalorder %s5564_s30, %s5560_s29 }
  0x11   : > { %p8165_p1 = scmp.eq.s32.totalorder %s5689_s17, 0  ;;  %p354_p3 = scmp.eq.s32.totalorder %s4596_s18, 1 }
  0x12   : > { %p4597_p5 = scmp.ge.s32.totalorder %s5572_s16, 1  ;;  %p361_p7 = scmp.lt.s32.totalorder %s5572_s16, 3 }
  0x13   : > { %p5698_p4 = por %p8165_p1, %p51_p0  ;;  %p5703_p6 = por %p354_p3, %p51_p0 }
  0x14   : > { %p5708_p8 = pnand %p4597_p5, %p361_p7  ;;  %s5574_s22 = smov [#allocation5]  }
  0x15   : > { %s8217_s19 = scalar_select %p5698_p4, 1, 0 }
  0x16   : > { %s8218_s20 = scalar_select %p5703_p6, 1, 0 }
  0x17   : > { %s8220_s21 = scalar_select %p5708_p8, 1, 0 }
  0x18   : > { %8219 = sst [smem:[#allocation12_spill]] %s8218_s20  ;;  %s388_s23 = sshll.u32 %s5574_s22, 4  ;;  %s5712_s23 = int_to_ptr.vmem [resolvable:$true] %s388_s23 }
  0x19   : > { %p5338_p9 = pneg %p5708_p8  ;;  %s5724_s25 = sadd.s32 1, %s5572_s16  }
  0x1a   : > { %8222 = sst [smem:[#allocation13_spill]] %s5724_s25  ;;  %s38_s26 = sadd.s32 1, %s5568_s15 }
  0x1b   : > { %p5719_p11 = pnand %p5338_p9, %p8165_p1  ;;  %s35_s27 = ssub.s32 %s5572_s16, %s5724_s25 }
  0x1c   : > { %s8223_s6 = sld [smem:[#allocation31_spill]] }
  0x1d   : > { %p5446_p13 = pneg %p5719_p11 }
  0x22   : > { %s5444_s22 = scalar_lea.hbm %s8223_s6, 3072 }
  0x23   : > { %p5445_p12 = scmp.ne.s32.totalorder %s8223_s6, %s5444_s22  ;;  %p5451_p5 = scmp.lt.u32.totalorder %s5444_s22, %s8223_s6 }
  0x25   : > { %p5447_p0 = pnand %p5446_p13, %p5445_p12 }
  0x27   : > { %p5448_p3 = pneg %p5447_p0 }
  0x29   : > { %p5453_p7 = pnand %p5451_p5, %p5448_p3 }
  0x2b   : > { %5456 = shalt.err (!%p5453_p7)
}
  0x2c   : > { %s5457_s25 = scalar_lea.vmem %s5712_s23, 3072  ;;  %p5465_p2 = scmp.lt.s32.totalorder %s5712_s23, %s5712_s23 }
  0x2d   : > { %p5458_p9 = scmp.ne.s32.totalorder %s5712_s23, %s5457_s25  ;;  %p5466_p6 = scmp.lt.s32.totalorder %s5457_s25, %s5457_s25 }
  0x2f   : > { %p5460_p10 = pnand %p5458_p9, %p5446_p13  ;;  %p5467_p4 = por %p5466_p6, %p5465_p2 }
  0x31   : > { %p5461_p1 = pneg %p5460_p10 }
  0x33   : > { %p5468_p8 = pnand %p5467_p4, %p5461_p1 }
  0x35   : > { %5471 = shalt.err (!%p5468_p8)
}
  0x36   : > { %s5575_s29 = smov 384   ;;  %s5576_s13 = smov 24  }
  0x37   : > { %5341 = dma.hbm_to_vmem [thread:$0]  (!%p5719_p11), %s8223_s6, 3072, %s5712_s23, [#allocation6], %s5575_s29, %s5575_s29, %s5576_s13  }
  0x38   : > { %p36_p2 = scmp.eq.s32.totalorder %s35_s27, 0  ;;  %p45_p1 = scmp.ne.s32.totalorder %s5568_s15, %s5564_s30 }
  0x39   : > { %p46_p4 = scmp.eq.s32.totalorder %s5572_s16, 0  ;;  %p5351_p6 = scmp.lt.s32.totalorder %s5572_s16, 2 }
  0x3a   : > { %s5755_s25 = scalar_select %p36_p2, %s5568_s15, %s38_s26  }
  0x3b   : > { %p47_p8 = por %p46_p4, %p45_p1  ;;  %p8224_p10 = scmp.eq.s32.totalorder %s5689_s17, 1 }
  0x3c   : > { %s423_s18 = sand.u32 1, %s5568_s15   ;;  %s4690_s22 = sshll.u32 %s5572_s16, 7 }
  0x3d   : > { %p5759_p12 = por %p8224_p10, %p45_p1  ;;  %s4600_s12 = sshll.u32 %s423_s18, 3 }
  0x3e   : > { %s8226_s0 = sld [smem:[#allocation28_spill]]  ;;  %s427_s23 = scalar_lea.vmem [#allocation2], %s4600_s12 }
  0x3f   : > { %s435_s26 = sshll.u32 %s427_s23, 4  ;;  %p5770_p11 = pnand %p5351_p6, %p47_p8  ;;  %s5774_s26 = int_to_ptr.vmem [resolvable:$true] %s435_s26 }
  0x40   : > { %s424_s29 = scalar_lea.sflag [#allocation3], %s423_s18 }
  0x41   : > { %p5474_p0 = pneg %p5770_p11 }
  0x44   : > { %s5768_s14 = scalar_lea.hbm %s8226_s0, %s4690_s22  ;;  %s5477_s20 = scalar_lea.hbm %s8226_s0, 256 }
  0x45   : > { %s5472_s13 = scalar_lea.hbm %s5768_s14, 128  ;;  %p5478_p7 = scmp.lt.u32.totalorder %s5768_s14, %s8226_s0 }
  0x46   : > { %p5473_p13 = scmp.ne.s32.totalorder %s5768_s14, %s5472_s13  ;;  %p5479_p9 = scmp.lt.u32.totalorder %s5477_s20, %s5472_s13 }
  0x47   : > { %p5481_p1 = scmp.lt.u32.totalorder %s5472_s13, %s5768_s14 }
  0x48   : > { %p5475_p3 = pnand %p5474_p0, %p5473_p13  ;;  %p5480_p2 = por %p5479_p9, %p5478_p7 }
  0x4a   : > { %p5476_p5 = pneg %p5475_p3  ;;  %p5482_p4 = por %p5481_p1, %p5480_p2 }
  0x4c   : > { %p5483_p6 = pnand %p5482_p4, %p5476_p5 }
  0x4e   : > { %5486 = shalt.err (!%p5483_p6)
}
  0x4f   : > { %s5487_s18 = scalar_lea.vmem %s5774_s26, 128  ;;  %s5577_s23 = smov [#allocation2]  }
  0x50   : > { %p5488_p8 = scmp.ne.s32.totalorder %s5774_s26, %s5487_s18  ;;  %s5492_s11 = sshll.u32 %s5577_s23, 4  ;;  %s5493_s11 = int_to_ptr.vmem [resolvable:$false] %s5492_s11 }
  0x51   : > { %s5494_s12 = scalar_lea.vmem %s5493_s11, 256  ;;  %p5495_p3 = scmp.lt.s32.totalorder %s5774_s26, %s5493_s11 }
  0x52   : > { %p5490_p10 = pnand %p5488_p8, %p5474_p0  ;;  %p5496_p7 = scmp.lt.s32.totalorder %s5494_s12, %s5487_s18 }
  0x54   : > { %p5491_p13 = pneg %p5490_p10  ;;  %p5497_p9 = por %p5496_p7, %p5495_p3 }
  0x56   : > { %p5498_p2 = pnand %p5497_p9, %p5491_p13 }
  0x58   : > { %5501 = shalt.err (!%p5498_p2)
}
  0x59   : > { %5345 = dma.hbm_to_vmem [thread:$0]  (!%p5770_p11), %s5768_s14, 128, %s5774_s26, %s424_s29  }
  0x5a   : > { %p8228_p5 = scmp.ne.s32.totalorder %s8220_s21, 0 }
  0x5c   : > { %444 = sbr.rel (%p8228_p5) target bundleno = 4474 (0x117a), region = 76 }
  0x63   : > { %s5804_s13 = sand.u32 1, %s5564_s30   ;;  %p8229_p0 = scmp.ne.s32.totalorder %s8217_s19, 0 }
  0x64   : > { %s4604_s20 = sshll.u32 %s5804_s13, 3  ;;  %s447_s22 = scalar_lea.sflag [#allocation3], %s5804_s13 }
  0x65   : > { %s450_s24 = scalar_lea.vmem [#allocation2], %s4604_s20 }
  0x66   : > { %5547 = dma.done.wait (%p8229_p0), %s447_s22, 128  }
  0x67   : > { %5549 = vsyncadd (%p8229_p0), %s447_s22, 4294967168  ;;  %p8230_p1 = scmp.eq.s32.totalorder %s5689_s17, 0 }
  0x69   : > { %5551 = dma.done.wait (%p8230_p1), [#allocation6], 3072   ;;  %p8231_p11 = pmov %p8230_p1 }
  0x6a   : > { %v5816_v0 = vld [vmem:[%s450_s24] sm:$0xff]  ;;  %s8174_s21 = smov 1   ;;  %s8180_s14 = smov 16   ;;  %v8186_v2 = vmov 0.0   ;;  %v5587_v5 = vmov 0   ;;  %v524_v8 = vlaneseq  ;;  %vm539_vm0 = vcmask 130048  }
  0x6b   : > { %5553 = vsyncadd (%p8231_p11), [#allocation6], 4294964224  ;;  %577 = vrot.lane.b32.xlu1 %v5816_v0, %s8174_s21  ;;  %537 = vrot.lane.b32.xlu0 %v5816_v0, %s8180_s14  ;;  %v5824_v1 = vcombine.high %v5816_v0, %v5816_v0  ;;  %s8184_s19 = smov 17   ;;  %s8176_s26 = smov 15   ;;  %v5873_v13 = vld [vmem:[%s8145_s1] sm:$0xff]  ;;  %v5878_v14 = vld [vmem:[%s8145_s1 + $0x8] sm:$0xff] }
  0x6c   : > { %s8182_s27 = smov 127   ;;  %s8170_s29 = smov 112   ;;  %811 = vmatprep.mubr.f32.mxu0 %v8186_v2  ;;  %5403 = vset.pattern.permute.xlu0 %v5587_v5  ;;  %v5867_v9 = vshrl.u32 %v524_v8, 7  ;;  %vm579_vm1 = vcmask 7168   ;;  %vm519_vm2 = vcmask 138240   ;;  %vm559_vm3 = vcmask 121856  }
  0x6d   : > { %s8172_s18 = smov 113   ;;  %s8178_s23 = smov 111   ;;  %5404 = vset.pattern.permute.xlu1 %v5587_v5  ;;  %vm699_vm4 = vcmask 1043456   ;;  %vm598_vm5 = vcmask 1039360   ;;  %vm638_vm6 = vcmask 916480   ;;  %vm618_vm7 = vcmask 924672  }
  0x6e   : > { %s8232_s3 = sld [smem:[#allocation30_spill]]  ;;  %v546_v12 = vsub.s32 1, %v5867_v9  ;;  %v586_v15 = vsub.s32 3, %v5867_v9  ;;  %v526_v20 = vsub.s32 0, %v5867_v9  ;;  %v566_v25 = vsub.s32 2, %v5867_v9  ;;  %s8233_s2 = sld [smem:[#allocation29_spill]] }
  0x6f   : > { %517 = vrot.lane.b32.xlu1 %v5816_v0, %s8184_s19  ;;  %534 = vrot.lane.b32.xlu0 %v5824_v1, %s8180_s14  ;;  %v606_v40 = vsub.s32 5, %v5867_v9  ;;  %v646_v45 = vsub.s32 7, %v5867_v9  ;;  %vm658_vm8 = vcmask 908288   ;;  %vm728_vm9 = vcmask 293888   ;;  %s8237_s11 = smov 1   ;;  %s8243_s12 = smov 113  }
  0x70   : > { %v5882_v18 = vrot.slane %v5873_v13, %v546_v12  ;;  %v5885_v19 = vrot.slane %v5878_v14, %v546_v12  ;;  %v5891_v23 = vrot.slane %v5873_v13, %v586_v15  ;;  %v5894_v24 = vrot.slane %v5878_v14, %v586_v15  ;;  %s8245_s20 = smov 16   ;;  %s8251_s0 = smov 127  }
  0x71   : > { %v5900_v30 = vrot.slane %v5873_v13, %v526_v20  ;;  %v5903_v31 = vrot.slane %v5878_v14, %v526_v20  ;;  %v5912_v38 = vrot.slane %v5873_v13, %v566_v25  ;;  %v5915_v39 = vrot.slane %v5878_v14, %v566_v25  ;;  %s5591_s6 = smov [#allocation7]  }
  0x72   : > { %v5926_v54 = vrot.slane %v5873_v13, %v606_v40  ;;  %v5929_v55 = vrot.slane %v5878_v14, %v606_v40  ;;  %v5938_v5 = vrot.slane %v5873_v13, %v646_v45 }
  0x73   : > { %574 = vrot.lane.b32.xlu1 %v5824_v1, %s8174_s21  ;;  %514 = vrot.lane.b32.xlu0 %v5824_v1, %s8184_s19  ;;  %s8246_s21 = smov 15  }
  0x74   : > { %v508_v3 = vld [vmem:[%s8232_s3] sm:$0xff]  ;;  %v509_v4 = vld [vmem:[%s8232_s3 + $0x8] sm:$0xff]  ;;  %v511_v6 = vld [vmem:[%s8232_s3 + $0x18] sm:$0xff] }
  0x75   : > { %v510_v7 = vld [vmem:[%s8232_s3 + $0x10] sm:$0xff]  ;;  %s4500_s3 = scalar_lea.sflag [#allocation4], %s5804_s13 }
  0x77   : > { %557 = vrot.lane.b32.xlu1 %v5816_v0, %s8176_s26  ;;  %554 = vrot.lane.b32.xlu0 %v5824_v1, %s8176_s26 }
  0x7b   : > { %596 = vrot.lane.b32.xlu1 %v5824_v1, %s8182_s27  ;;  %594 = vrot.lane.b32.xlu0 %v5816_v0, %s8182_s27 }
  0x7f   : > { %636 = vrot.lane.b32.xlu1 %v5824_v1, %s8170_s29  ;;  %634 = vrot.lane.b32.xlu0 %v5816_v0, %s8170_s29  ;;  %s8244_s29 = smov 112  }
  0x83   : > { %616 = vrot.lane.b32.xlu1 %v5824_v1, %s8172_s18  ;;  %614 = vrot.lane.b32.xlu0 %v5816_v0, %s8172_s18  ;;  %s4606_s18 = sshll.u32 %s5804_s13, 6 }
  0x84   : > { %s8076_s22 = scalar_lea.vmem [#allocation7], %s4606_s18 }
  0x85   : > { %s4513_s24 = sshll.u32 %s8076_s22, 4  ;;  %s8090_s24 = int_to_ptr.vmem [resolvable:$true] %s4513_s24 }
  0x87   : > { %656 = vrot.lane.b32.xlu1 %v5824_v1, %s8178_s23  ;;  %654 = vrot.lane.b32.xlu0 %v5816_v0, %s8178_s23 }
  0x8b   : > { %710 = vperm.xlu0 %5403, %v508_v3   ;;  %715 = vperm.xlu1 %5404, %v509_v4  }
  0x8f   : > { %725 = vperm.xlu0 %5403, %v511_v6   ;;  %720 = vperm.xlu1 %5404, %v510_v7   ;;  %v5941_v6 = vrot.slane %v5878_v14, %v646_v45  ;;  %v626_v7 = vsub.s32 6, %v5867_v9 }
  0x91   : > { %v5954_v9 = vrot.slane %v5878_v14, %v626_v7 }
  0xdd   : > { %v578_v10 = vpop.permute.xlu1 %577  ;;  %v538_v11 = vpop.permute.xlu0 %537 }
  0xe1   : > { %v518_v16 = vpop.permute.xlu1 %517  ;;  %v535_v17 = vpop.permute.xlu0 %534 }
  0xe2   : > { %v540_v21 = vsel %vm539_vm0, %v538_v11, %v535_v17  ;;  %v543_v22 = vsel %vm539_vm0, %v535_v17, %v538_v11 }
  0xe3   : > { %v552_v26 = vmul.f32 %v5882_v18, %v543_v22  ;;  %v553_v27 = vmul.f32 %v5885_v19, %v540_v21  ;;  %v5951_v21 = vrot.slane %v5873_v13, %v626_v7  ;;  %v5963_v13 = vld [vmem:[%s8145_s1 + $0x18] ss:$0 sm:$0xff] }
  0xe5   : > { %v575_v28 = vpop.permute.xlu1 %574  ;;  %v515_v29 = vpop.permute.xlu0 %514  ;;  %v676_v46 = vrot.slane %v552_v26, 4  ;;  %v677_v47 = vrot.slane %v553_v27, 4 }
  0xe6   : > { %v580_v32 = vsel %vm579_vm1, %v578_v10, %v575_v28  ;;  %v583_v33 = vsel %vm579_vm1, %v575_v28, %v578_v10  ;;  %v520_v34 = vsel %vm519_vm2, %v518_v16, %v515_v29  ;;  %v523_v35 = vsel %vm519_vm2, %v515_v29, %v518_v16 }
  0xe7   : > { %v592_v36 = vmul.f32 %v5891_v23, %v583_v33  ;;  %v593_v37 = vmul.f32 %v5894_v24, %v580_v32  ;;  %v532_v41 = vmul.f32 %v5900_v30, %v523_v35  ;;  %v533_v42 = vmul.f32 %v5903_v31, %v520_v34 }
  0xe9   : > { %v558_v43 = vpop.permute.xlu1 %557  ;;  %v555_v44 = vpop.permute.xlu0 %554  ;;  %v682_v50 = vrot.slane %v592_v36, 4  ;;  %v683_v51 = vrot.slane %v593_v37, 4  ;;  %v701_v58 = vsel %vm699_vm4, %v533_v42, %v677_v47  ;;  %v700_v60 = vsel %vm699_vm4, %v532_v41, %v676_v46 }
  0xea   : > { %v560_v48 = vsel %vm559_vm3, %v558_v43, %v555_v44  ;;  %v563_v49 = vsel %vm559_vm3, %v555_v44, %v558_v43  ;;  %v5974_v43 = vld [vmem:[%s8145_s1 + $0x10] ss:$0 sm:$0xff] }
  0xeb   : > { %v572_v52 = vmul.f32 %v5912_v38, %v563_v49  ;;  %v573_v53 = vmul.f32 %v5915_v39, %v560_v48  ;;  %v505_v49 = vld [vmem:[%s8233_s2 + $0x8] sm:$0xff] }
  0xed   : > { %v597_v56 = vpop.permute.xlu1 %596  ;;  %v595_v57 = vpop.permute.xlu0 %594  ;;  %v703_v59 = vsel %vm699_vm4, %v573_v53, %v683_v51  ;;  %v702_v61 = vsel %vm699_vm4, %v572_v52, %v682_v50  ;;  %v506_v50 = vld [vmem:[%s8233_s2 + $0x10] sm:$0xff]  ;;  %v507_v51 = vld [vmem:[%s8233_s2 + $0x18] sm:$0xff] }
  0xee   : > { %v599_v62 = vsel %vm598_vm5, %v595_v57, %v597_v56  ;;  %v603_v63 = vsel %vm598_vm5, %v597_v56, %v595_v57  ;;  %v4838_v3 = vpack.c.bf16 %v703_v59, %v701_v58  ;;  %v4840_v4 = vpack.c.bf16 %v702_v61, %v700_v60 }
  0xef   : > { %v612_v8 = vmul.f32 %v5926_v54, %v599_v62  ;;  %v613_v10 = vmul.f32 %v5929_v55, %v603_v63 }
  0xf0   : > { %4839 = vmatprep.subr.bf16.mxu0 %v4838_v3 }
  0xf1   : > { %v637_v11 = vpop.permute.xlu1 %636  ;;  %v635_v12 = vpop.permute.xlu0 %634  ;;  %4841 = vmatpush1.bf16.msra.mxu0 %v4840_v4  ;;  %v689_v22 = vrot.slane %v612_v8, 4  ;;  %v690_v25 = vrot.slane %v613_v10, 4 }
  0xf2   : > { %v639_v15 = vsel %vm638_vm6, %v635_v12, %v637_v11  ;;  %v643_v16 = vsel %vm638_vm6, %v637_v11, %v635_v12 }
  0xf3   : > { %v652_v17 = vmul.f32 %v5938_v5, %v639_v15  ;;  %v653_v20 = vmul.f32 %v5941_v6, %v643_v16  ;;  %v705_v37 = vsel %vm699_vm4, %v5824_v1, %v690_v25  ;;  %v704_v41 = vsel %vm699_vm4, %v5816_v0, %v689_v22  ;;  %v504_v0 = vld [vmem:[%s8233_s2] sm:$0xff]  ;;  %s8250_s2 = smov 17  }
  0xf5   : > { %v617_v26 = vpop.permute.xlu1 %616  ;;  %v615_v27 = vpop.permute.xlu0 %614  ;;  %v695_v32 = vrot.slane %v652_v17, 4  ;;  %v696_v33 = vrot.slane %v653_v20, 4 }
  0xf6   : > { %v619_v28 = vsel %vm618_vm7, %v615_v27, %v617_v26  ;;  %v623_v29 = vsel %vm618_vm7, %v617_v26, %v615_v27 }
  0xf7   : > { %v632_v34 = vmul.f32 %v5951_v21, %v619_v28  ;;  %v633_v35 = vmul.f32 %v5954_v9, %v623_v29 }
  0xf9   : > { %v657_v14 = vpop.permute.xlu1 %656  ;;  %v655_v36 = vpop.permute.xlu0 %654  ;;  %v707_v40 = vsel %vm699_vm4, %v633_v35, %v696_v33  ;;  %v706_v42 = vsel %vm699_vm4, %v632_v34, %v695_v32 }
  0xfa   : > { %v659_v44 = vsel %vm658_vm8, %v655_v36, %v657_v14  ;;  %v663_v45 = vsel %vm658_vm8, %v657_v14, %v655_v36  ;;  %v4842_v46 = vpack.c.bf16 %v707_v40, %v705_v37  ;;  %v4844_v47 = vpack.c.bf16 %v706_v42, %v704_v41  ;;  %v861_v42 = vld [vmem:[%s8148_s4 + $0x8] sm:$0xff] }
  0xfb   : > { %v673_v1 = vmul.f32 %v5963_v13, %v663_v45  ;;  %v672_v48 = vmul.f32 %v5974_v43, %v659_v44  ;;  %1333 = vmatprep.mubr.f32.mxu1 %v861_v42 }
  0xfc   : > { %4843 = vmatprep.subr.bf16.mxu0 %v4842_v46 }
  0xfd   : > { %4845 = vmatpush1.bf16.msra.mxu0 %v4844_v47 }
  0xfe   : > { %4609 = vmatprep.subr.msk.mxu0 %vm699_vm4, %v673_v1 }
 0x101   : > { %4610 = vmatpush1.msk.msra.mxu0 %vm699_vm4, %v672_v48 }
 0x102   : > { %4611 = vmatmul.mubr.msk.f32.vlgmr.msra.gmra.mrb[0].mxu0 %vm728_vm9, %v504_v0  ;;  %v872_v0 = vld [vmem:[%s8149_s5] sm:$0xff] }
 0x103   : > { %817 = vmatprep.mubr.f32.mxu0 %v8186_v2 }
 0x106   : > { %4612 = vmatmul.mubr.msk.f32.gmra.mrb[2].mxu0 %vm728_vm9, %v505_v49 }
 0x107   : > { %823 = vmatprep.mubr.f32.mxu0 %v8186_v2 }
 0x10a   : > { %4613 = vmatmul.mubr.msk.f32.gmra.mrb[4].mxu0 %vm728_vm9, %v506_v50  ;;  %v711_v52 = vpop.permute.xlu0 %710  ;;  %v716_v60 = vpop.permute.xlu1 %715  ;;  %v873_v50 = vld [vmem:[%s8149_s5 + $0x8] sm:$0xff] }
 0x10b   : > { %829 = vmatprep.mubr.f32.mxu0 %v8186_v2 }
 0x10e   : > { %4614 = vmatmul.mubr.msk.f32.gmra.mrb[6].mxu0 %vm728_vm9, %v507_v51  ;;  %v721_v25 = vpop.permute.xlu1 %720  ;;  %v726_v26 = vpop.permute.xlu0 %725 }
 0x1d5   : > { %v813_v53 = vpop.f32.mrb[0].mxu0 }
 0x1d6   : > { %v814_v56 = vadd.f32 %v813_v53, %v711_v52  ;;  %v815_v57 = vpop.f32.mrb[1].mxu0 }
 0x1d7   : > { %v816_v58 = vadd.f32 %v815_v57, %v711_v52  ;;  %v874_v52 = vld [vmem:[%s8149_s5 + $0x10] sm:$0xff] }
 0x1d8   : > { %vm836_vm10 = vcmp.ge.f32.partialorder %v814_v56, 0.0  ;;  %v844_v59 = vmul.f32 0.1, %v814_v56 }
 0x1d9   : > { %vm837_vm11 = vcmp.ge.f32.partialorder %v816_v58, 0.0  ;;  %v845_v61 = vmul.f32 0.1, %v816_v58  ;;  %v819_v62 = vpop.f32.mrb[2].mxu0 }
 0x1da   : > { %v5997_v63 = vsel %vm836_vm10, %v814_v56, %v844_v59  ;;  %v820_v3 = vadd.f32 %v819_v62, %v716_v60  ;;  %v821_v4 = vpop.f32.mrb[3].mxu0  ;;  %v875_v56 = vld [vmem:[%s8149_s5 + $0x18] sm:$0xff]  ;;  %vm1256_vm10 = vcmask 261120  }
 0x1db   : > { %8234 = vst [vmem:[#allocation14_spill] sm:$0xff] %v5997_v63  ;;  %v5999_v7 = vsel %vm837_vm11, %v816_v58, %v845_v61  ;;  %896 = vrot.lane.b32.xlu1 %v5997_v63, %s8184_s19  ;;  %v822_v17 = vadd.f32 %v821_v4, %v716_v60  ;;  %vm5590_vm11 = vmmov 0  }
 0x1dc   : > { %8235 = vst [vmem:[#allocation15_spill] sm:$0xff] %v5999_v7  ;;  %vm838_vm12 = vcmp.ge.f32.partialorder %v820_v3, 0.0  ;;  %v846_v8 = vmul.f32 0.1, %v820_v3  ;;  %1062 = vrot.lane.b32.xlu0 %v5999_v7, %s8182_s27 }
 0x1dd   : > { %v825_v10 = vpop.f32.mrb[4].mxu0  ;;  %v847_v20 = vmul.f32 0.1, %v822_v17  ;;  %vm839_vm13 = vcmp.ge.f32.partialorder %v822_v17, 0.0 }
 0x1de   : > { %v6005_v11 = vsel %vm838_vm12, %v820_v3, %v846_v8  ;;  %v827_v12 = vpop.f32.mrb[5].mxu0  ;;  %v826_v27 = vadd.f32 %v825_v10, %v721_v25  ;;  %vm2214_vm12 = vcmask 15360  }
 0x1df   : > { %8236 = vst [vmem:[#allocation16_spill] sm:$0xff] %v6005_v11  ;;  %940 = vrot.lane.b32.xlu1 %v5997_v63, %s8180_s14  ;;  %v6023_v22 = vsel %vm839_vm13, %v822_v17, %v847_v20  ;;  %v828_v35 = vadd.f32 %v827_v12, %v721_v25  ;;  %vm2227_vm13 = vcmask 1041408  }
 0x1e0   : > { %898 = vrot.lane.b32.xlu0 %v6005_v11, %s8184_s19  ;;  %8238 = vst [vmem:[#allocation17_spill] sm:$0xff] %v6023_v22  ;;  %v848_v29 = vmul.f32 0.1, %v826_v27  ;;  %vm840_vm14 = vcmp.ge.f32.partialorder %v826_v27, 0.0 }
 0x1e1   : > { %v831_v15 = vpop.f32.mrb[6].mxu0  ;;  %v849_v36 = vmul.f32 0.1, %v828_v35  ;;  %vm841_vm4 = vcmp.ge.f32.partialorder %v828_v35, 0.0 }
 0x1e2   : > { %v833_v16 = vpop.f32.mrb[7].mxu0  ;;  %v832_v28 = vadd.f32 %v831_v15, %v726_v26  ;;  %v6041_v33 = vsel %vm840_vm14, %v826_v27, %v848_v29 }
 0x1e3   : > { %984 = vrot.lane.b32.xlu1 %v5997_v63, %s8176_s26  ;;  %8239 = vst [vmem:[#allocation18_spill] sm:$0xff] %v6041_v33  ;;  %v834_v14 = vadd.f32 %v833_v16, %v726_v26  ;;  %v6061_v40 = vsel %vm841_vm4, %v828_v35, %v849_v36 }
 0x1e4   : > { %942 = vrot.lane.b32.xlu0 %v6005_v11, %s8180_s14  ;;  %v850_v32 = vmul.f32 0.1, %v832_v28  ;;  %vm842_vm15 = vcmp.ge.f32.partialorder %v832_v28, 0.0  ;;  %8241 = vst [vmem:[#allocation20_spill] sm:$0xff] %v6061_v40 }
 0x1e5   : > { %v851_v37 = vmul.f32 0.1, %v834_v14  ;;  %vm843_vm9 = vcmp.ge.f32.partialorder %v834_v14, 0.0 }
 0x1e6   : > { %v6043_v34 = vsel %vm842_vm15, %v832_v28, %v850_v32 }
 0x1e7   : > { %1028 = vrot.lane.b32.xlu1 %v5997_v63, %s8237_s11  ;;  %8240 = vst [vmem:[#allocation19_spill] sm:$0xff] %v6043_v34  ;;  %v6063_v41 = vsel %vm843_vm9, %v834_v14, %v851_v37 }
 0x1e8   : > { %986 = vrot.lane.b32.xlu0 %v6005_v11, %s8176_s26  ;;  %8242 = vst [vmem:[#allocation21_spill] sm:$0xff] %v6063_v41 }
 0x1eb   : > { %1060 = vrot.lane.b32.xlu1 %v5997_v63, %s8182_s27 }
 0x1ec   : > { %1030 = vrot.lane.b32.xlu0 %v6005_v11, %s8237_s11 }
 0x1ef   : > { %880 = vrot.lane.b32.xlu1 %v5999_v7, %s8184_s19 }
 0x1f0   : > { %882 = vrot.lane.b32.xlu0 %v6023_v22, %s8184_s19 }
 0x1f3   : > { %928 = vrot.lane.b32.xlu1 %v5999_v7, %s8180_s14 }
 0x1f4   : > { %930 = vrot.lane.b32.xlu0 %v6023_v22, %s8180_s14 }
 0x1f7   : > { %972 = vrot.lane.b32.xlu1 %v5999_v7, %s8176_s26 }
 0x1f8   : > { %974 = vrot.lane.b32.xlu0 %v6023_v22, %s8176_s26 }
 0x1fb   : > { %1016 = vrot.lane.b32.xlu1 %v5999_v7, %s8237_s11 }
 0x1fc   : > { %1018 = vrot.lane.b32.xlu0 %v6023_v22, %s8237_s11 }
 0x1ff   : > { %900 = vrot.lane.b32.xlu1 %v6041_v33, %s8184_s19 }
 0x200   : > { %902 = vrot.lane.b32.xlu0 %v6043_v34, %s8184_s19 }
 0x203   : > { %944 = vrot.lane.b32.xlu1 %v6041_v33, %s8180_s14 }
 0x204   : > { %946 = vrot.lane.b32.xlu0 %v6043_v34, %s8180_s14 }
 0x207   : > { %988 = vrot.lane.b32.xlu1 %v6041_v33, %s8176_s26 }
 0x208   : > { %990 = vrot.lane.b32.xlu0 %v6043_v34, %s8176_s26 }
 0x20b   : > { %1032 = vrot.lane.b32.xlu1 %v6041_v33, %s8237_s11 }
 0x20c   : > { %1034 = vrot.lane.b32.xlu0 %v6043_v34, %s8237_s11 }
 0x20f   : > { %884 = vrot.lane.b32.xlu1 %v6061_v40, %s8184_s19 }
 0x210   : > { %886 = vrot.lane.b32.xlu0 %v6063_v41, %s8184_s19 }
 0x213   : > { %1064 = vrot.lane.b32.xlu1 %v6005_v11, %s8182_s27 }
 0x214   : > { %1066 = vrot.lane.b32.xlu0 %v6023_v22, %s8182_s27 }
 0x217   : > { %932 = vrot.lane.b32.xlu1 %v6061_v40, %s8180_s14 }
 0x218   : > { %934 = vrot.lane.b32.xlu0 %v6063_v41, %s8180_s14  ;;  %s8247_s14 = smov 111  }
 0x21b   : > { %976 = vrot.lane.b32.xlu1 %v6061_v40, %s8176_s26 }
 0x21c   : > { %1070 = vrot.lane.b32.xlu0 %v6061_v40, %s8182_s27 }
 0x21f   : > { %1020 = vrot.lane.b32.xlu1 %v6061_v40, %s8237_s11 }
 0x220   : > { %978 = vrot.lane.b32.xlu0 %v6063_v41, %s8176_s26 }
 0x223   : > { %1068 = vrot.lane.b32.xlu1 %v6041_v33, %s8182_s27 }
 0x224   : > { %1106 = vrot.lane.b32.xlu0 %v5999_v7, %s8243_s12 }
 0x227   : > { %1072 = vrot.lane.b32.xlu1 %v6043_v34, %s8182_s27 }
 0x228   : > { %1022 = vrot.lane.b32.xlu0 %v6063_v41, %s8237_s11 }
 0x22b   : > { %1104 = vrot.lane.b32.xlu1 %v5997_v63, %s8243_s12 }
 0x22c   : > { %1110 = vrot.lane.b32.xlu0 %v6023_v22, %s8243_s12 }
 0x22f   : > { %1108 = vrot.lane.b32.xlu1 %v6005_v11, %s8243_s12 }
 0x230   : > { %1114 = vrot.lane.b32.xlu0 %v6061_v40, %s8243_s12 }
 0x233   : > { %1112 = vrot.lane.b32.xlu1 %v6041_v33, %s8243_s12 }
 0x234   : > { %1150 = vrot.lane.b32.xlu0 %v5999_v7, %s8244_s29 }
 0x237   : > { %1116 = vrot.lane.b32.xlu1 %v6043_v34, %s8243_s12 }
 0x238   : > { %1074 = vrot.lane.b32.xlu0 %v6063_v41, %s8182_s27 }
 0x23b   : > { %1148 = vrot.lane.b32.xlu1 %v5997_v63, %s8244_s29 }
 0x23c   : > { %1154 = vrot.lane.b32.xlu0 %v6023_v22, %s8244_s29 }
 0x23f   : > { %1152 = vrot.lane.b32.xlu1 %v6005_v11, %s8244_s29 }
 0x240   : > { %1118 = vrot.lane.b32.xlu0 %v6063_v41, %s8243_s12 }
 0x243   : > { %1156 = vrot.lane.b32.xlu1 %v6041_v33, %s8244_s29 }
 0x244   : > { %1158 = vrot.lane.b32.xlu0 %v6061_v40, %s8244_s29 }
 0x247   : > { %1160 = vrot.lane.b32.xlu1 %v6043_v34, %s8244_s29 }
 0x248   : > { %1162 = vrot.lane.b32.xlu0 %v6063_v41, %s8244_s29 }
 0x24b   : > { %1192 = vrot.lane.b32.xlu1 %v5997_v63, %s8178_s23 }
 0x24c   : > { %1194 = vrot.lane.b32.xlu0 %v5999_v7, %s8178_s23 }
 0x24d   : > { %v897_v44 = vpop.permute.xlu1 %896 }
 0x24e   : > { %v6132_v45 = vpop.permute.xlu0 %1062 }
 0x24f   : > { %1196 = vrot.lane.b32.xlu1 %v6005_v11, %s8178_s23 }
 0x250   : > { %1198 = vrot.lane.b32.xlu0 %v6023_v22, %s8178_s23 }
 0x251   : > { %v941_v46 = vpop.permute.xlu1 %940 }
 0x252   : > { %v899_v47 = vpop.permute.xlu0 %898 }
 0x253   : > { %1200 = vrot.lane.b32.xlu1 %v6041_v33, %s8178_s23 }
 0x254   : > { %1202 = vrot.lane.b32.xlu0 %v6061_v40, %s8178_s23 }
 0x255   : > { %v6142_v1 = vpop.permute.xlu1 %984 }
 0x256   : > { %v943_v48 = vpop.permute.xlu0 %942 }
 0x257   : > { %1204 = vrot.lane.b32.xlu1 %v6043_v34, %s8178_s23 }
 0x258   : > { %1206 = vrot.lane.b32.xlu0 %v6063_v41, %s8178_s23 }
 0x259   : > { %v6151_v49 = vpop.permute.xlu1 %1028 }
 0x25a   : > { %v6156_v51 = vpop.permute.xlu0 %986 }
 0x25b   : > { %1238 = vperm.xlu1 %5404, %v872_v0  }
 0x25c   : > { %1243 = vperm.xlu0 %5403, %v873_v50  }
 0x25d   : > { %v6161_v53 = vpop.permute.xlu1 %1060 }
 0x25e   : > { %v6166_v57 = vpop.permute.xlu0 %1030 }
 0x25f   : > { %1248 = vperm.xlu1 %5404, %v874_v52  }
 0x260   : > { %1253 = vperm.xlu0 %5403, %v875_v56  }
 0x261   : > { %v881_v58 = vpop.permute.xlu1 %880 }
 0x262   : > { %v916_v59 = vsel %vm519_vm2, %v881_v58, %v897_v44  ;;  %v883_v60 = vpop.permute.xlu0 %882  ;;  %v904_v61 = vsel %vm519_vm2, %v897_v44, %v881_v58 }
 0x263   : > { %v917_v62 = vsel %vm519_vm2, %v883_v60, %v899_v47  ;;  %v905_v3 = vsel %vm519_vm2, %v899_v47, %v883_v60  ;;  %v921_v4 = vmul.f32 %v904_v61, %v5903_v31  ;;  %v920_v8 = vmul.f32 %v916_v59, %v5900_v30 }
 0x264   : > { %v923_v10 = vmul.f32 %v905_v3, %v5903_v31  ;;  %v922_v12 = vmul.f32 %v917_v62, %v5900_v30 }
 0x265   : > { %v929_v15 = vpop.permute.xlu1 %928 }
 0x266   : > { %v931_v16 = vpop.permute.xlu0 %930  ;;  %v4846_v17 = vpack.c.bf16 %v923_v10, %v921_v4  ;;  %v4848_v20 = vpack.c.bf16 %v922_v12, %v920_v8  ;;  %v948_v47 = vsel %vm539_vm0, %v941_v46, %v929_v15  ;;  %v960_v52 = vsel %vm539_vm0, %v929_v15, %v941_v46 }
 0x267   : > { %v949_v0 = vsel %vm539_vm0, %v943_v48, %v931_v16  ;;  %v961_v56 = vsel %vm539_vm0, %v931_v16, %v943_v48  ;;  %v965_v8 = vmul.f32 %v948_v47, %v5885_v19  ;;  %v964_v15 = vmul.f32 %v960_v52, %v5882_v18 }
 0x268   : > { %4847 = vmatprep.subr.bf16.mxu1 %v4846_v17  ;;  %v967_v10 = vmul.f32 %v949_v0, %v5885_v19  ;;  %v966_v16 = vmul.f32 %v961_v56, %v5882_v18 }
 0x269   : > { %4849 = vmatpush1.bf16.msra.mxu1 %v4848_v20  ;;  %v973_v25 = vpop.permute.xlu1 %972 }
 0x26a   : > { %v975_v26 = vpop.permute.xlu0 %974  ;;  %v992_v47 = vsel %vm559_vm3, %v6142_v1, %v973_v25  ;;  %v1004_v0 = vsel %vm559_vm3, %v973_v25, %v6142_v1 }
 0x26b   : > { %v1005_v52 = vsel %vm559_vm3, %v975_v26, %v6156_v51 }
 0x26d   : > { %v6176_v27 = vpop.permute.xlu1 %1016 }
 0x26e   : > { %v6178_v28 = vpop.permute.xlu0 %1018 }
 0x271   : > { %v901_v29 = vpop.permute.xlu1 %900 }
 0x272   : > { %v903_v32 = vpop.permute.xlu0 %902 }
 0x275   : > { %v945_v35 = vpop.permute.xlu1 %944 }
 0x276   : > { %v947_v14 = vpop.permute.xlu0 %946 }
 0x279   : > { %v989_v36 = vpop.permute.xlu1 %988 }
 0x27a   : > { %v6180_v37 = vpop.permute.xlu0 %990 }
 0x27d   : > { %v6182_v42 = vpop.permute.xlu1 %1032 }
 0x27e   : > { %v6184_v44 = vpop.permute.xlu0 %1034 }
 0x281   : > { %v885_v50 = vpop.permute.xlu1 %884 }
 0x282   : > { %v906_v58 = vsel %vm519_vm2, %v901_v29, %v885_v50  ;;  %v918_v59 = vsel %vm519_vm2, %v885_v50, %v901_v29  ;;  %v887_v60 = vpop.permute.xlu0 %886  ;;  %v993_v50 = vsel %vm559_vm3, %v6156_v51, %v975_v26 }
 0x283   : > { %v924_v61 = vmul.f32 %v918_v59, %v5900_v30  ;;  %v925_v62 = vmul.f32 %v906_v58, %v5903_v31  ;;  %v907_v3 = vsel %vm519_vm2, %v903_v32, %v887_v60  ;;  %v919_v4 = vsel %vm519_vm2, %v887_v60, %v903_v32 }
 0x284   : > { %v926_v46 = vmul.f32 %v919_v4, %v5900_v30  ;;  %v927_v48 = vmul.f32 %v907_v3, %v5903_v31  ;;  %v4854_v32 = vpack.c.bf16 %v967_v10, %v965_v8  ;;  %v1009_v4 = vmul.f32 %v992_v47, %v5915_v39 }
 0x285   : > { %v6200_v12 = vpop.permute.xlu1 %1064  ;;  %v1011_v8 = vmul.f32 %v993_v50, %v5915_v39  ;;  %v1008_v10 = vmul.f32 %v1004_v0, %v5912_v38  ;;  %v1048_v50 = vsel %vm579_vm1, %v6176_v27, %v6151_v49 }
 0x286   : > { %v6204_v17 = vpop.permute.xlu0 %1066  ;;  %v4850_v20 = vpack.c.bf16 %v927_v48, %v925_v62  ;;  %v4852_v29 = vpack.c.bf16 %v926_v46, %v924_v61  ;;  %v4856_v61 = vpack.c.bf16 %v966_v16, %v964_v15  ;;  %v1010_v46 = vmul.f32 %v1005_v52, %v5912_v38 }
 0x288   : > { %4851 = vmatprep.subr.bf16.mxu1 %v4850_v20  ;;  %v1037_v20 = vsel %vm579_vm1, %v6166_v57, %v6178_v28 }
 0x289   : > { %4853 = vmatpush1.bf16.msra.mxu1 %v4852_v29  ;;  %v933_v58 = vpop.permute.xlu1 %932  ;;  %v4862_v29 = vpack.c.bf16 %v1011_v8, %v1009_v4  ;;  %v1052_v4 = vmul.f32 %v1048_v50, %v5891_v23 }
 0x28a   : > { %v950_v56 = vsel %vm539_vm0, %v945_v35, %v933_v58  ;;  %v962_v59 = vsel %vm539_vm0, %v933_v58, %v945_v35  ;;  %v935_v60 = vpop.permute.xlu0 %934  ;;  %4855 = vmatprep.subr.bf16.mxu1 %v4854_v32 }
 0x28b   : > { %v968_v62 = vmul.f32 %v962_v59, %v5882_v18  ;;  %v969_v3 = vmul.f32 %v950_v56, %v5885_v19  ;;  %v951_v1 = vsel %vm539_vm0, %v947_v14, %v935_v60  ;;  %v963_v25 = vsel %vm539_vm0, %v935_v60, %v947_v14 }
 0x28c   : > { %v970_v51 = vmul.f32 %v963_v25, %v5882_v18  ;;  %v971_v26 = vmul.f32 %v951_v1, %v5885_v19  ;;  %v1036_v14 = vsel %vm579_vm1, %v6151_v49, %v6176_v27  ;;  %v4864_v56 = vpack.c.bf16 %v1010_v46, %v1008_v10 }
 0x28d   : > { %4857 = vmatpush1.bf16.msra.mxu1 %v4856_v61  ;;  %v977_v35 = vpop.permute.xlu1 %976  ;;  %v1053_v58 = vmul.f32 %v1036_v14, %v5894_v24  ;;  %v1049_v59 = vsel %vm579_vm1, %v6178_v28, %v6166_v57  ;;  %v1055_v60 = vmul.f32 %v1037_v20, %v5894_v24 }
 0x28e   : > { %v6226_v48 = vpop.permute.xlu0 %1070  ;;  %v4858_v15 = vpack.c.bf16 %v971_v26, %v969_v3  ;;  %v4860_v16 = vpack.c.bf16 %v970_v51, %v968_v62  ;;  %v994_v32 = vsel %vm559_vm3, %v989_v36, %v977_v35  ;;  %v1006_v47 = vsel %vm559_vm3, %v977_v35, %v989_v36 }
 0x28f   : > { %v1012_v62 = vmul.f32 %v1006_v47, %v5912_v38  ;;  %v1013_v49 = vmul.f32 %v994_v32, %v5915_v39  ;;  %v1054_v8 = vmul.f32 %v1049_v59, %v5891_v23  ;;  %v1092_v59 = vsel %vm598_vm5, %v6132_v45, %v6161_v53 }
 0x290   : > { %4859 = vmatprep.subr.bf16.mxu1 %v4858_v15 }
 0x291   : > { %4861 = vmatpush1.bf16.msra.mxu1 %v4860_v16  ;;  %v1021_v0 = vpop.permute.xlu1 %1020  ;;  %v4872_v16 = vpack.c.bf16 %v1054_v8, %v1052_v4 }
 0x292   : > { %v979_v52 = vpop.permute.xlu0 %978  ;;  %4863 = vmatprep.subr.bf16.mxu1 %v4862_v29  ;;  %v1038_v51 = vsel %vm579_vm1, %v6182_v42, %v1021_v0  ;;  %v1050_v26 = vsel %vm579_vm1, %v1021_v0, %v6182_v42 }
 0x293   : > { %v995_v36 = vsel %vm559_vm3, %v6180_v37, %v979_v52  ;;  %v1007_v61 = vsel %vm559_vm3, %v979_v52, %v6180_v37  ;;  %v4870_v37 = vpack.c.bf16 %v1055_v60, %v1053_v58  ;;  %v1056_v14 = vmul.f32 %v1050_v26, %v5891_v23 }
 0x294   : > { %v1014_v27 = vmul.f32 %v1007_v61, %v5912_v38  ;;  %v1015_v3 = vmul.f32 %v995_v36, %v5915_v39  ;;  %v1057_v20 = vmul.f32 %v1038_v51, %v5894_v24  ;;  %v4878_v58 = vpack.c.bf16 %v6023_v22, %v5999_v7 }
 0x295   : > { %4865 = vmatpush1.bf16.msra.mxu1 %v4864_v56  ;;  %v1069_v1 = vpop.permute.xlu1 %1068  ;;  %v1077_v60 = vsel %vm598_vm5, %v6200_v12, %v6204_v17  ;;  %v4880_v36 = vpack.c.bf16 %v6005_v11, %v5997_v63 }
 0x296   : > { %v6252_v25 = vpop.permute.xlu0 %1106  ;;  %v4866_v57 = vpack.c.bf16 %v1015_v3, %v1013_v49  ;;  %v4868_v28 = vpack.c.bf16 %v1014_v27, %v1012_v62  ;;  %v4882_v62 = vpack.c.bf16 %v6063_v41, %v6061_v40  ;;  %v1076_v49 = vsel %vm598_vm5, %v6161_v53, %v6132_v45 }
 0x297   : > { %v1097_v3 = vmul.f32 %v1092_v59, %v5929_v55  ;;  %v1096_v4 = vmul.f32 %v1076_v49, %v5926_v54  ;;  %v1094_v45 = vsel %vm598_vm5, %v6226_v48, %v1069_v1 }
 0x298   : > { %4867 = vmatprep.subr.bf16.mxu1 %v4866_v57  ;;  %v1098_v57 = vmul.f32 %v1077_v60, %v5926_v54 }
 0x299   : > { %4869 = vmatpush1.bf16.msra.mxu1 %v4868_v28  ;;  %v1073_v35 = vpop.permute.xlu1 %1072 }
 0x29a   : > { %v1023_v10 = vpop.permute.xlu0 %1022  ;;  %4871 = vmatprep.subr.bf16.mxu1 %v4870_v37 }
 0x29b   : > { %v1039_v46 = vsel %vm579_vm1, %v6184_v44, %v1023_v10  ;;  %v1051_v15 = vsel %vm579_vm1, %v1023_v10, %v6184_v44  ;;  %v1093_v44 = vsel %vm598_vm5, %v6204_v17, %v6200_v12  ;;  %v1078_v12 = vsel %vm598_vm5, %v1069_v1, %v6226_v48 }
 0x29c   : > { %v1058_v29 = vmul.f32 %v1051_v15, %v5891_v23  ;;  %v1059_v32 = vmul.f32 %v1039_v46, %v5894_v24  ;;  %v1099_v61 = vmul.f32 %v1093_v44, %v5929_v55  ;;  %v4884_v17 = vpack.c.bf16 %v6043_v34, %v6041_v33 }
 0x29d   : > { %4873 = vmatpush1.bf16.msra.mxu1 %v4872_v16  ;;  %v1105_v42 = vpop.permute.xlu1 %1104  ;;  %v1100_v51 = vmul.f32 %v1078_v12, %v5926_v54  ;;  %v4888_v10 = vpack.c.bf16 %v1098_v57, %v1096_v4  ;;  %v1101_v48 = vmul.f32 %v1094_v45, %v5929_v55 }
 0x29e   : > { %v1111_v47 = vpop.permute.xlu0 %1110  ;;  %v4874_v0 = vpack.c.bf16 %v1059_v32, %v1057_v20  ;;  %v4876_v50 = vpack.c.bf16 %v1058_v29, %v1056_v14  ;;  %v4886_v8 = vpack.c.bf16 %v1099_v61, %v1097_v3  ;;  %v1136_v46 = vsel %vm618_vm7, %v6252_v25, %v1105_v42 }
 0x29f   : > { %v1120_v32 = vsel %vm618_vm7, %v1105_v42, %v6252_v25 }
 0x2a0   : > { %4875 = vmatprep.subr.bf16.mxu1 %v4874_v0  ;;  %v1140_v59 = vmul.f32 %v1120_v32, %v5951_v21 }
 0x2a1   : > { %4877 = vmatpush1.bf16.msra.mxu1 %v4876_v50  ;;  %v1109_v52 = vpop.permute.xlu1 %1108  ;;  %v1141_v50 = vmul.f32 %v1136_v46, %v5954_v9 }
 0x2a2   : > { %v1115_v56 = vpop.permute.xlu0 %1114  ;;  %4879 = vmatprep.subr.bf16.mxu1 %v4878_v58  ;;  %v1137_v53 = vsel %vm618_vm7, %v1111_v47, %v1109_v52  ;;  %v1121_v15 = vsel %vm618_vm7, %v1109_v52, %v1111_v47 }
 0x2a3   : > { %v1143_v1 = vmul.f32 %v1137_v53, %v5954_v9  ;;  %v1142_v47 = vmul.f32 %v1121_v15, %v5951_v21 }
 0x2a5   : > { %v1113_v27 = vpop.permute.xlu1 %1112  ;;  %4881 = vmatpush1.bf16.msra.mxu1 %v4880_v36  ;;  %v4894_v36 = vpack.c.bf16 %v1143_v1, %v1141_v50  ;;  %v4896_v49 = vpack.c.bf16 %v1142_v47, %v1140_v59 }
 0x2a6   : > { %v1151_v28 = vpop.permute.xlu0 %1150  ;;  %4883 = vmatprep.subr.bf16.mxu1 %v4882_v62  ;;  %v1122_v52 = vsel %vm618_vm7, %v1113_v27, %v1115_v56  ;;  %v1138_v60 = vsel %vm618_vm7, %v1115_v56, %v1113_v27 }
 0x2a7   : > { %v1144_v25 = vmul.f32 %v1122_v52, %v5951_v21  ;;  %v1145_v3 = vmul.f32 %v1138_v60, %v5954_v9 }
 0x2a9   : > { %v1117_v37 = vpop.permute.xlu1 %1116  ;;  %4885 = vmatpush1.bf16.msra.mxu1 %v4884_v17 }
 0x2aa   : > { %v1075_v26 = vpop.permute.xlu0 %1074  ;;  %4887 = vmatprep.subr.bf16.mxu1 %v4886_v8 }
 0x2ab   : > { %v1079_v16 = vsel %vm598_vm5, %v1073_v35, %v1075_v26  ;;  %v1095_v14 = vsel %vm598_vm5, %v1075_v26, %v1073_v35 }
 0x2ac   : > { %v1102_v20 = vmul.f32 %v1079_v16, %v5926_v54  ;;  %v1103_v29 = vmul.f32 %v1095_v14, %v5929_v55 }
 0x2ad   : > { %v1149_v0 = vpop.permute.xlu1 %1148  ;;  %4889 = vmatpush1.bf16.msra.mxu1 %v4888_v10 }
 0x2ae   : > { %v1155_v58 = vpop.permute.xlu0 %1154  ;;  %v4890_v44 = vpack.c.bf16 %v1103_v29, %v1101_v48  ;;  %v4892_v35 = vpack.c.bf16 %v1102_v20, %v1100_v51  ;;  %v1180_v57 = vsel %vm638_vm6, %v1151_v28, %v1149_v0  ;;  %v1164_v53 = vsel %vm638_vm6, %v1149_v0, %v1151_v28 }
 0x2af   : > { %v1185_v51 = vmul.f32 %v1180_v57, %v5941_v6  ;;  %v1184_v16 = vmul.f32 %v1164_v53, %v5938_v5 }
 0x2b0   : > { %4891 = vmatprep.subr.bf16.mxu1 %v4890_v44 }
 0x2b1   : > { %v1153_v61 = vpop.permute.xlu1 %1152  ;;  %4893 = vmatpush1.bf16.msra.mxu1 %v4892_v35 }
 0x2b2   : > { %v1181_v42 = vsel %vm638_vm6, %v1155_v58, %v1153_v61  ;;  %v1119_v62 = vpop.permute.xlu0 %1118  ;;  %4895 = vmatprep.subr.bf16.mxu1 %v4894_v36  ;;  %v1165_v56 = vsel %vm638_vm6, %v1153_v61, %v1155_v58 }
 0x2b3   : > { %v1123_v12 = vsel %vm618_vm7, %v1117_v37, %v1119_v62  ;;  %v1139_v17 = vsel %vm618_vm7, %v1119_v62, %v1117_v37  ;;  %v1187_v27 = vmul.f32 %v1181_v42, %v5941_v6  ;;  %v1186_v15 = vmul.f32 %v1165_v56, %v5938_v5  ;;  %v864_v62 = vld [vmem:[%s8148_s4 + $0x20] sm:$0xff] }
 0x2b4   : > { %v1146_v4 = vmul.f32 %v1123_v12, %v5951_v21  ;;  %v1147_v8 = vmul.f32 %v1139_v17, %v5954_v9 }
 0x2b5   : > { %v1157_v45 = vpop.permute.xlu1 %1156  ;;  %4897 = vmatpush1.bf16.msra.mxu1 %v4896_v49  ;;  %v4902_v37 = vpack.c.bf16 %v1187_v27, %v1185_v51  ;;  %v4904_v32 = vpack.c.bf16 %v1186_v15, %v1184_v16  ;;  %v867_v51 = vld [vmem:[%s8148_s4 + $0x38] sm:$0xff]  ;;  %v866_v15 = vld [vmem:[%s8148_s4 + $0x30] sm:$0xff] }
 0x2b6   : > { %v1159_v26 = vpop.permute.xlu0 %1158  ;;  %v4898_v10 = vpack.c.bf16 %v1147_v8, %v1145_v3  ;;  %v4900_v46 = vpack.c.bf16 %v1146_v4, %v1144_v25  ;;  %v860_v25 = vld [vmem:[%s8148_s4] sm:$0xff]  ;;  %v863_v4 = vld [vmem:[%s8148_s4 + $0x18] sm:$0xff]  ;;  %v870_v16 = vld [vmem:[%s8148_s4 + $0x50] sm:$0xff] }
 0x2b7   : > { %v1166_v14 = vsel %vm638_vm6, %v1157_v45, %v1159_v26  ;;  %v1182_v48 = vsel %vm638_vm6, %v1159_v26, %v1157_v45 }
 0x2b8   : > { %4899 = vmatprep.subr.bf16.mxu1 %v4898_v10  ;;  %v1188_v0 = vmul.f32 %v1166_v14, %v5938_v5  ;;  %v1189_v50 = vmul.f32 %v1182_v48, %v5941_v6 }
 0x2b9   : > { %v1161_v1 = vpop.permute.xlu1 %1160  ;;  %4901 = vmatpush1.bf16.msra.mxu1 %v4900_v46 }
 0x2ba   : > { %v1163_v20 = vpop.permute.xlu0 %1162  ;;  %4903 = vmatprep.subr.bf16.mxu1 %v4902_v37 }
 0x2bb   : > { %v1167_v28 = vsel %vm638_vm6, %v1161_v1, %v1163_v20  ;;  %v1183_v29 = vsel %vm638_vm6, %v1163_v20, %v1161_v1 }
 0x2bc   : > { %v1190_v47 = vmul.f32 %v1167_v28, %v5938_v5  ;;  %v1191_v58 = vmul.f32 %v1183_v29, %v5941_v6 }
 0x2bd   : > { %v1193_v44 = vpop.permute.xlu1 %1192  ;;  %4905 = vmatpush1.bf16.msra.mxu1 %v4904_v32  ;;  %v869_v32 = vld [vmem:[%s8148_s4 + $0x48] sm:$0xff] }
 0x2be   : > { %v1195_v35 = vpop.permute.xlu0 %1194  ;;  %v4906_v52 = vpack.c.bf16 %v1191_v58, %v1189_v50  ;;  %v4908_v59 = vpack.c.bf16 %v1190_v47, %v1188_v0  ;;  %v862_v47 = vld [vmem:[%s8148_s4 + $0x10] sm:$0xff]  ;;  %v871_v58 = vld [vmem:[%s8148_s4 + $0x58] sm:$0xff] }
 0x2bf   : > { %v1208_v60 = vsel %vm658_vm8, %v1193_v44, %v1195_v35  ;;  %v1224_v36 = vsel %vm658_vm8, %v1195_v35, %v1193_v44 }
 0x2c0   : > { %4907 = vmatprep.subr.bf16.mxu1 %v4906_v52  ;;  %v1228_v57 = vmul.f32 %v5974_v43, %v1208_v60  ;;  %v1229_v12 = vmul.f32 %v5963_v13, %v1224_v36 }
 0x2c1   : > { %v1197_v61 = vpop.permute.xlu1 %1196  ;;  %4909 = vmatpush1.bf16.msra.mxu1 %v4908_v59 }
 0x2c2   : > { %v1199_v42 = vpop.permute.xlu0 %1198 }
 0x2c3   : > { %v1209_v49 = vsel %vm658_vm8, %v1197_v61, %v1199_v42  ;;  %v1225_v3 = vsel %vm658_vm8, %v1199_v42, %v1197_v61 }
 0x2c4   : > { %v1230_v17 = vmul.f32 %v5974_v43, %v1209_v49  ;;  %v1231_v56 = vmul.f32 %v5963_v13, %v1225_v3  ;;  %1334 = vmatmul.mubr.f32.vlgmr.msra.gmra.mrb[0].mxu1 %v860_v25 }
 0x2c5   : > { %v1201_v27 = vpop.permute.xlu1 %1200  ;;  %1339 = vmatprep.mubr.f32.mxu1 %v864_v62 }
 0x2c6   : > { %v4912_v8 = vpack.c.bf16 %v1230_v17, %v1228_v57  ;;  %v1203_v45 = vpop.permute.xlu0 %1202  ;;  %v4910_v53 = vpack.c.bf16 %v1231_v56, %v1229_v12 }
 0x2c7   : > { %v1210_v26 = vsel %vm658_vm8, %v1201_v27, %v1203_v45  ;;  %v1226_v10 = vsel %vm658_vm8, %v1203_v45, %v1201_v27 }
 0x2c8   : > { %1340 = vmatmul.mubr.f32.gmra.mrb[2].mxu1 %v863_v4  ;;  %4911 = vmatprep.subr.bf16.mxu1 %v4910_v53  ;;  %v1232_v1 = vmul.f32 %v5974_v43, %v1210_v26  ;;  %v1233_v20 = vmul.f32 %v5963_v13, %v1226_v10 }
 0x2c9   : > { %v1205_v46 = vpop.permute.xlu1 %1204  ;;  %4913 = vmatpush1.bf16.msra.mxu1 %v4912_v8  ;;  %1345 = vmatprep.mubr.f32.mxu1 %v867_v51 }
 0x2ca   : > { %v1207_v37 = vpop.permute.xlu0 %1206 }
 0x2cb   : > { %v1211_v14 = vsel %vm658_vm8, %v1205_v46, %v1207_v37  ;;  %v1227_v48 = vsel %vm658_vm8, %v1207_v37, %v1205_v46 }
 0x2cc   : > { %v1234_v28 = vmul.f32 %v5974_v43, %v1211_v14  ;;  %v1235_v29 = vmul.f32 %v5963_v13, %v1227_v48  ;;  %1346 = vmatmul.mubr.f32.gmra.mrb[4].mxu1 %v866_v15  ;;  %v865_v13 = vld [vmem:[%s8148_s4 + $0x28] sm:$0xff]  ;;  %v868_v43 = vld [vmem:[%s8148_s4 + $0x40] sm:$0xff]  ;;  %v1456_v14 = vld [vmem:[#allocation5 + $0x8] sm:$0xff] }
 0x2cd   : > { %1351 = vmatprep.mubr.f32.mxu1 %v870_v16  ;;  %1927 = vmatprep.mubr.f32.mxu0 %v1456_v14 }
 0x2ce   : > { %v4916_v0 = vpack.c.bf16 %v1234_v28, %v1232_v1  ;;  %v4914_v50 = vpack.c.bf16 %v1235_v29, %v1233_v20 }
 0x2d0   : > { %1352 = vmatmul.mubr.f32.gmra.mrb[6].mxu1 %v869_v32  ;;  %4915 = vmatprep.subr.bf16.mxu1 %v4914_v50 }
 0x2d1   : > { %4917 = vmatpush1.bf16.msra.mxu1 %v4916_v0  ;;  %1422 = vmatprep.mubr.f32.mxu1 %v8186_v2  ;;  %v1467_v0 = vld [vmem:[%s8151_s7] sm:$0xff] }
 0x2d4   : > { %4615 = vmatmul.mubr.msk.f32.vlgmr.msra.gmra.mrb[0].mxu1 %vm1256_vm10, %v862_v47  ;;  %v1468_v47 = vld [vmem:[%s8151_s7 + $0x8] sm:$0xff] }
 0x2d5   : > { %1428 = vmatprep.mubr.f32.mxu1 %v8186_v2 }
 0x2d8   : > { %4616 = vmatmul.mubr.msk.f32.gmra.mrb[2].mxu1 %vm1256_vm10, %v865_v13 }
 0x2d9   : > { %1434 = vmatprep.mubr.f32.mxu1 %v8186_v2 }
 0x2da   : > { %v1239_v44 = vpop.permute.xlu1 %1238 }
 0x2db   : > { %v1244_v61 = vpop.permute.xlu0 %1243 }
 0x2dc   : > { %4617 = vmatmul.mubr.msk.f32.gmra.mrb[4].mxu1 %vm1256_vm10, %v868_v43  ;;  %v1469_v43 = vld [vmem:[%s8151_s7 + $0x10] sm:$0xff] }
 0x2dd   : > { %1440 = vmatprep.mubr.f32.mxu1 %v8186_v2 }
 0x2de   : > { %v1249_v8 = vpop.permute.xlu1 %1248 }
 0x2df   : > { %v1254_v45 = vpop.permute.xlu0 %1253 }
 0x2e0   : > { %4618 = vmatmul.mubr.msk.f32.gmra.mrb[6].mxu1 %vm1256_vm10, %v871_v58 }
 0x3a7   : > { %v1424_v35 = vpop.f32.mrb[0].mxu1 }
 0x3a8   : > { %v5250_v52 = vadd.f32 %v1424_v35, %v1239_v44  ;;  %v1426_v59 = vpop.f32.mrb[1].mxu1 }
 0x3a9   : > { %v5251_v60 = vadd.f32 %v1426_v59, %v1239_v44  ;;  %v1470_v44 = vld [vmem:[%s8151_s7 + $0x18] sm:$0xff] }
 0x3aa   : > { %v6393_v36 = vmax.f32 %v5250_v52, 0.0 }
 0x3ab   : > { %v6395_v25 = vmax.f32 %v5251_v60, 0.0  ;;  %v1430_v42 = vpop.f32.mrb[2].mxu1 }
 0x3ac   : > { %v5252_v62 = vadd.f32 %v1430_v42, %v1244_v61  ;;  %v1432_v49 = vpop.f32.mrb[3].mxu1  ;;  %1491 = vrot.lane.b32.xlu1 %v6393_v36, %s8184_s19 }
 0x3ad   : > { %1657 = vrot.lane.b32.xlu0 %v6395_v25, %s8182_s27  ;;  %v5253_v27 = vadd.f32 %v1432_v49, %v1244_v61 }
 0x3ae   : > { %v6401_v3 = vmax.f32 %v5252_v62, 0.0 }
 0x3af   : > { %v1436_v57 = vpop.f32.mrb[4].mxu1  ;;  %v6419_v4 = vmax.f32 %v5253_v27, 0.0 }
 0x3b0   : > { %v1438_v12 = vpop.f32.mrb[5].mxu1  ;;  %1535 = vrot.lane.b32.xlu1 %v6393_v36, %s8245_s20  ;;  %v5254_v53 = vadd.f32 %v1436_v57, %v1249_v8 }
 0x3b1   : > { %1493 = vrot.lane.b32.xlu0 %v6401_v3, %s8184_s19  ;;  %v5255_v46 = vadd.f32 %v1438_v12, %v1249_v8 }
 0x3b2   : > { %v6437_v26 = vmax.f32 %v5254_v53, 0.0 }
 0x3b3   : > { %v1442_v17 = vpop.f32.mrb[6].mxu1  ;;  %v6457_v37 = vmax.f32 %v5255_v46, 0.0 }
 0x3b4   : > { %v1444_v56 = vpop.f32.mrb[7].mxu1  ;;  %1579 = vrot.lane.b32.xlu1 %v6393_v36, %s8246_s21  ;;  %v5256_v51 = vadd.f32 %v1442_v17, %v1254_v45 }
 0x3b5   : > { %1537 = vrot.lane.b32.xlu0 %v6401_v3, %s8245_s20  ;;  %v5257_v15 = vadd.f32 %v1444_v56, %v1254_v45 }
 0x3b6   : > { %v6439_v10 = vmax.f32 %v5256_v51, 0.0 }
 0x3b7   : > { %v6459_v16 = vmax.f32 %v5257_v15, 0.0 }
 0x3b8   : > { %1623 = vrot.lane.b32.xlu1 %v6393_v36, %s8237_s11 }
 0x3b9   : > { %1581 = vrot.lane.b32.xlu0 %v6401_v3, %s8246_s21 }
 0x3bc   : > { %1655 = vrot.lane.b32.xlu1 %v6393_v36, %s8182_s27 }
 0x3bd   : > { %1625 = vrot.lane.b32.xlu0 %v6401_v3, %s8237_s11 }
 0x3c0   : > { %1475 = vrot.lane.b32.xlu1 %v6395_v25, %s8184_s19 }
 0x3c1   : > { %1477 = vrot.lane.b32.xlu0 %v6419_v4, %s8184_s19 }
 0x3c4   : > { %1523 = vrot.lane.b32.xlu1 %v6395_v25, %s8245_s20 }
 0x3c5   : > { %1525 = vrot.lane.b32.xlu0 %v6419_v4, %s8245_s20 }
 0x3c8   : > { %1567 = vrot.lane.b32.xlu1 %v6395_v25, %s8246_s21 }
 0x3c9   : > { %1569 = vrot.lane.b32.xlu0 %v6419_v4, %s8246_s21 }
 0x3cc   : > { %1611 = vrot.lane.b32.xlu1 %v6395_v25, %s8237_s11 }
 0x3cd   : > { %1613 = vrot.lane.b32.xlu0 %v6419_v4, %s8237_s11 }
 0x3d0   : > { %1495 = vrot.lane.b32.xlu1 %v6437_v26, %s8184_s19 }
 0x3d1   : > { %1497 = vrot.lane.b32.xlu0 %v6439_v10, %s8184_s19 }
 0x3d4   : > { %1539 = vrot.lane.b32.xlu1 %v6437_v26, %s8245_s20 }
 0x3d5   : > { %1541 = vrot.lane.b32.xlu0 %v6439_v10, %s8245_s20 }
 0x3d8   : > { %1583 = vrot.lane.b32.xlu1 %v6437_v26, %s8246_s21 }
 0x3d9   : > { %1585 = vrot.lane.b32.xlu0 %v6439_v10, %s8246_s21 }
 0x3dc   : > { %1627 = vrot.lane.b32.xlu1 %v6437_v26, %s8237_s11 }
 0x3dd   : > { %1629 = vrot.lane.b32.xlu0 %v6439_v10, %s8237_s11 }
 0x3e0   : > { %1479 = vrot.lane.b32.xlu1 %v6457_v37, %s8184_s19 }
 0x3e1   : > { %1481 = vrot.lane.b32.xlu0 %v6459_v16, %s8184_s19 }
 0x3e4   : > { %1659 = vrot.lane.b32.xlu1 %v6401_v3, %s8182_s27 }
 0x3e5   : > { %1661 = vrot.lane.b32.xlu0 %v6419_v4, %s8182_s27 }
 0x3e8   : > { %1527 = vrot.lane.b32.xlu1 %v6457_v37, %s8245_s20 }
 0x3e9   : > { %1529 = vrot.lane.b32.xlu0 %v6459_v16, %s8245_s20 }
 0x3ec   : > { %1571 = vrot.lane.b32.xlu1 %v6457_v37, %s8246_s21 }
 0x3ed   : > { %1665 = vrot.lane.b32.xlu0 %v6457_v37, %s8182_s27 }
 0x3f0   : > { %1615 = vrot.lane.b32.xlu1 %v6457_v37, %s8237_s11 }
 0x3f1   : > { %1573 = vrot.lane.b32.xlu0 %v6459_v16, %s8246_s21 }
 0x3f4   : > { %1663 = vrot.lane.b32.xlu1 %v6437_v26, %s8182_s27 }
 0x3f5   : > { %1701 = vrot.lane.b32.xlu0 %v6395_v25, %s8243_s12 }
 0x3f8   : > { %1667 = vrot.lane.b32.xlu1 %v6439_v10, %s8182_s27 }
 0x3f9   : > { %1617 = vrot.lane.b32.xlu0 %v6459_v16, %s8237_s11 }
 0x3fc   : > { %1699 = vrot.lane.b32.xlu1 %v6393_v36, %s8243_s12 }
 0x3fd   : > { %1705 = vrot.lane.b32.xlu0 %v6419_v4, %s8243_s12 }
 0x400   : > { %1703 = vrot.lane.b32.xlu1 %v6401_v3, %s8243_s12 }
 0x401   : > { %1709 = vrot.lane.b32.xlu0 %v6457_v37, %s8243_s12 }
 0x404   : > { %1707 = vrot.lane.b32.xlu1 %v6437_v26, %s8243_s12 }
 0x405   : > { %1745 = vrot.lane.b32.xlu0 %v6395_v25, %s8244_s29 }
 0x408   : > { %1711 = vrot.lane.b32.xlu1 %v6439_v10, %s8243_s12 }
 0x409   : > { %1669 = vrot.lane.b32.xlu0 %v6459_v16, %s8182_s27  ;;  %s8249_s27 = sld [smem:[#allocation32_spill]] }
 0x40c   : > { %1743 = vrot.lane.b32.xlu1 %v6393_v36, %s8244_s29 }
 0x40d   : > { %1749 = vrot.lane.b32.xlu0 %v6419_v4, %s8244_s29 }
 0x410   : > { %1747 = vrot.lane.b32.xlu1 %v6401_v3, %s8244_s29 }
 0x411   : > { %1713 = vrot.lane.b32.xlu0 %v6459_v16, %s8243_s12 }
 0x414   : > { %1751 = vrot.lane.b32.xlu1 %v6437_v26, %s8244_s29 }
 0x415   : > { %1753 = vrot.lane.b32.xlu0 %v6457_v37, %s8244_s29 }
 0x418   : > { %1755 = vrot.lane.b32.xlu1 %v6439_v10, %s8244_s29 }
 0x419   : > { %1757 = vrot.lane.b32.xlu0 %v6459_v16, %s8244_s29 }
 0x41c   : > { %1787 = vrot.lane.b32.xlu1 %v6393_v36, %s8247_s14 }
 0x41d   : > { %1789 = vrot.lane.b32.xlu0 %v6395_v25, %s8247_s14 }
 0x41e   : > { %v1492_v48 = vpop.permute.xlu1 %1491 }
 0x41f   : > { %v6525_v1 = vpop.permute.xlu0 %1657 }
 0x420   : > { %1791 = vrot.lane.b32.xlu1 %v6401_v3, %s8247_s14 }
 0x421   : > { %1793 = vrot.lane.b32.xlu0 %v6419_v4, %s8247_s14 }
 0x422   : > { %v1536_v20 = vpop.permute.xlu1 %1535 }
 0x423   : > { %v1494_v28 = vpop.permute.xlu0 %1493 }
 0x424   : > { %1795 = vrot.lane.b32.xlu1 %v6437_v26, %s8247_s14 }
 0x425   : > { %1797 = vrot.lane.b32.xlu0 %v6457_v37, %s8247_s14 }
 0x426   : > { %v6535_v29 = vpop.permute.xlu1 %1579 }
 0x427   : > { %v1538_v32 = vpop.permute.xlu0 %1537 }
 0x428   : > { %1799 = vrot.lane.b32.xlu1 %v6439_v10, %s8247_s14 }
 0x429   : > { %1801 = vrot.lane.b32.xlu0 %v6459_v16, %s8247_s14 }
 0x42a   : > { %v6544_v50 = vpop.permute.xlu1 %1623 }
 0x42b   : > { %v6549_v13 = vpop.permute.xlu0 %1581 }
 0x42c   : > { %1833 = vperm.xlu1 %5404, %v1467_v0  }
 0x42d   : > { %1838 = vperm.xlu0 %5403, %v1468_v47  }
 0x42e   : > { %v6554_v58 = vpop.permute.xlu1 %1655 }
 0x42f   : > { %v6559_v35 = vpop.permute.xlu0 %1625 }
 0x430   : > { %1843 = vperm.xlu1 %5404, %v1469_v43  }
 0x431   : > { %1848 = vperm.xlu0 %5403, %v1470_v44  }
 0x432   : > { %v1476_v52 = vpop.permute.xlu1 %1475 }
 0x433   : > { %v1499_v59 = vsel %vm519_vm2, %v1492_v48, %v1476_v52  ;;  %v1511_v60 = vsel %vm519_vm2, %v1476_v52, %v1492_v48  ;;  %v1478_v61 = vpop.permute.xlu0 %1477 }
 0x434   : > { %v1515_v42 = vmul.f32 %v1511_v60, %v5900_v30  ;;  %v1516_v62 = vmul.f32 %v1499_v59, %v5903_v31  ;;  %v1500_v49 = vsel %vm519_vm2, %v1494_v28, %v1478_v61  ;;  %v1512_v57 = vsel %vm519_vm2, %v1478_v61, %v1494_v28 }
 0x435   : > { %v1517_v12 = vmul.f32 %v1512_v57, %v5900_v30  ;;  %v1518_v17 = vmul.f32 %v1500_v49, %v5903_v31 }
 0x436   : > { %v1524_v56 = vpop.permute.xlu1 %1523 }
 0x437   : > { %v4920_v27 = vpack.c.bf16 %v1517_v12, %v1515_v42  ;;  %v1526_v8 = vpop.permute.xlu0 %1525  ;;  %v4918_v45 = vpack.c.bf16 %v1518_v17, %v1516_v62  ;;  %v1543_v59 = vsel %vm539_vm0, %v1536_v20, %v1524_v56  ;;  %v1555_v42 = vsel %vm539_vm0, %v1524_v56, %v1536_v20 }
 0x438   : > { %v1544_v60 = vsel %vm539_vm0, %v1538_v32, %v1526_v8  ;;  %v1556_v62 = vsel %vm539_vm0, %v1526_v8, %v1538_v32  ;;  %v1560_v33 = vmul.f32 %v1543_v59, %v5885_v19  ;;  %v1559_v56 = vmul.f32 %v1555_v42, %v5882_v18 }
 0x439   : > { %4919 = vmatprep.subr.bf16.mxu0 %v4918_v45  ;;  %v1562_v40 = vmul.f32 %v1544_v60, %v5885_v19  ;;  %v1561_v8 = vmul.f32 %v1556_v62, %v5882_v18 }
 0x43a   : > { %4921 = vmatpush1.bf16.msra.mxu0 %v4920_v27  ;;  %v1568_v53 = vpop.permute.xlu1 %1567 }
 0x43b   : > { %v1570_v51 = vpop.permute.xlu0 %1569  ;;  %v1587_v59 = vsel %vm559_vm3, %v6535_v29, %v1568_v53  ;;  %v1599_v42 = vsel %vm559_vm3, %v1568_v53, %v6535_v29 }
 0x43c   : > { %v1600_v62 = vsel %vm559_vm3, %v1570_v51, %v6549_v13 }
 0x43e   : > { %v6569_v46 = vpop.permute.xlu1 %1611 }
 0x43f   : > { %v6571_v15 = vpop.permute.xlu0 %1613 }
 0x442   : > { %v1496_v14 = vpop.permute.xlu1 %1495 }
 0x443   : > { %v1498_v48 = vpop.permute.xlu0 %1497 }
 0x446   : > { %v1540_v0 = vpop.permute.xlu1 %1539 }
 0x447   : > { %v1542_v28 = vpop.permute.xlu0 %1541 }
 0x44a   : > { %v1584_v47 = vpop.permute.xlu1 %1583 }
 0x44b   : > { %v6573_v43 = vpop.permute.xlu0 %1585 }
 0x44e   : > { %v6575_v44 = vpop.permute.xlu1 %1627 }
 0x44f   : > { %v6577_v52 = vpop.permute.xlu0 %1629 }
 0x452   : > { %v1480_v61 = vpop.permute.xlu1 %1479 }
 0x453   : > { %v1501_v49 = vsel %vm519_vm2, %v1496_v14, %v1480_v61  ;;  %v1513_v57 = vsel %vm519_vm2, %v1480_v61, %v1496_v14  ;;  %v1482_v12 = vpop.permute.xlu0 %1481 }
 0x454   : > { %v1519_v17 = vmul.f32 %v1513_v57, %v5900_v30  ;;  %v1520_v27 = vmul.f32 %v1501_v49, %v5903_v31  ;;  %v1502_v45 = vsel %vm519_vm2, %v1498_v48, %v1482_v12  ;;  %v1514_v2 = vsel %vm519_vm2, %v1482_v12, %v1498_v48 }
 0x455   : > { %v1521_v20 = vmul.f32 %v1514_v2, %v5900_v30  ;;  %v1522_v32 = vmul.f32 %v1502_v45, %v5903_v31  ;;  %v4926_v48 = vpack.c.bf16 %v1562_v40, %v1560_v33  ;;  %v4928_v12 = vpack.c.bf16 %v1561_v8, %v1559_v56 }
 0x456   : > { %v6595_v14 = vpop.permute.xlu1 %1659  ;;  %v1588_v2 = vsel %vm559_vm3, %v6549_v13, %v1570_v51  ;;  %v1604_v56 = vmul.f32 %v1587_v59, %v5915_v39  ;;  %v1605_v8 = vmul.f32 %v1600_v62, %v5912_v38  ;;  %v1632_v59 = vsel %vm579_vm1, %v6559_v35, %v6571_v15 }
 0x457   : > { %v4924_v61 = vpack.c.bf16 %v1521_v20, %v1519_v17  ;;  %v6597_v49 = vpop.permute.xlu0 %1661  ;;  %v4922_v57 = vpack.c.bf16 %v1522_v32, %v1520_v27  ;;  %v1606_v29 = vmul.f32 %v1588_v2, %v5915_v39 }
 0x459   : > { %4923 = vmatprep.subr.bf16.mxu0 %v4922_v57  ;;  %v4934_v2 = vpack.c.bf16 %v1606_v29, %v1604_v56 }
 0x45a   : > { %4925 = vmatpush1.bf16.msra.mxu0 %v4924_v61  ;;  %v1528_v60 = vpop.permute.xlu1 %1527 }
 0x45b   : > { %v1545_v17 = vsel %vm539_vm0, %v1540_v0, %v1528_v60  ;;  %v1557_v27 = vsel %vm539_vm0, %v1528_v60, %v1540_v0  ;;  %v1530_v33 = vpop.permute.xlu0 %1529  ;;  %4927 = vmatprep.subr.bf16.mxu0 %v4926_v48  ;;  %v1603_v0 = vmul.f32 %v1599_v42, %v5912_v38 }
 0x45c   : > { %v1563_v40 = vmul.f32 %v1557_v27, %v5882_v18  ;;  %v1564_v45 = vmul.f32 %v1545_v17, %v5885_v19  ;;  %v1546_v20 = vsel %vm539_vm0, %v1542_v28, %v1530_v33  ;;  %v1558_v32 = vsel %vm539_vm0, %v1530_v33, %v1542_v28 }
 0x45d   : > { %v1565_v13 = vmul.f32 %v1558_v32, %v5882_v18  ;;  %v1566_v53 = vmul.f32 %v1546_v20, %v5885_v19  ;;  %v1631_v28 = vsel %vm579_vm1, %v6544_v50, %v6569_v46  ;;  %v4936_v62 = vpack.c.bf16 %v1605_v8, %v1603_v0 }
 0x45e   : > { %4929 = vmatpush1.bf16.msra.mxu0 %v4928_v12  ;;  %v1572_v51 = vpop.permute.xlu1 %1571  ;;  %v1643_v17 = vsel %vm579_vm1, %v6569_v46, %v6544_v50  ;;  %v1648_v27 = vmul.f32 %v1631_v28, %v5894_v24 }
 0x45f   : > { %v4932_v61 = vpack.c.bf16 %v1565_v13, %v1563_v40  ;;  %v6619_v57 = vpop.permute.xlu0 %1665  ;;  %v4930_v48 = vpack.c.bf16 %v1566_v53, %v1564_v45  ;;  %v1589_v12 = vsel %vm559_vm3, %v1584_v47, %v1572_v51  ;;  %v1601_v60 = vsel %vm559_vm3, %v1572_v51, %v1584_v47 }
 0x460   : > { %v1644_v40 = vsel %vm579_vm1, %v6571_v15, %v6559_v35  ;;  %v1650_v45 = vmul.f32 %v1632_v59, %v5894_v24  ;;  %v1607_v32 = vmul.f32 %v1601_v60, %v5912_v38  ;;  %v1608_v50 = vmul.f32 %v1589_v12, %v5915_v39 }
 0x461   : > { %4931 = vmatprep.subr.bf16.mxu0 %v4930_v48  ;;  %v1647_v53 = vmul.f32 %v1643_v17, %v5891_v23  ;;  %v1649_v51 = vmul.f32 %v1644_v40, %v5891_v23  ;;  %v4950_v40 = vpack.c.bf16 %v6419_v4, %v6395_v25  ;;  %v4954_v4 = vpack.c.bf16 %v6459_v16, %v6457_v37 }
 0x462   : > { %4933 = vmatpush1.bf16.msra.mxu0 %v4932_v61  ;;  %v1616_v42 = vpop.permute.xlu1 %1615 }
 0x463   : > { %v1574_v33 = vpop.permute.xlu0 %1573  ;;  %4935 = vmatprep.subr.bf16.mxu0 %v4934_v2  ;;  %v1633_v0 = vsel %vm579_vm1, %v6575_v44, %v1616_v42  ;;  %v1645_v8 = vsel %vm579_vm1, %v1616_v42, %v6575_v44  ;;  %v4944_v28 = vpack.c.bf16 %v1649_v51, %v1647_v53 }
 0x464   : > { %v1590_v47 = vsel %vm559_vm3, %v6573_v43, %v1574_v33  ;;  %v1602_v20 = vsel %vm559_vm3, %v1574_v33, %v6573_v43  ;;  %v4942_v43 = vpack.c.bf16 %v1650_v45, %v1648_v27  ;;  %v1651_v12 = vmul.f32 %v1645_v8, %v5891_v23 }
 0x465   : > { %v1609_v46 = vmul.f32 %v1602_v20, %v5912_v38  ;;  %v1610_v56 = vmul.f32 %v1590_v47, %v5915_v39  ;;  %v1652_v60 = vmul.f32 %v1633_v0, %v5894_v24  ;;  %v1687_v20 = vsel %vm598_vm5, %v6525_v1, %v6554_v58 }
 0x466   : > { %4937 = vmatpush1.bf16.msra.mxu0 %v4936_v62  ;;  %v1664_v29 = vpop.permute.xlu1 %1663 }
 0x467   : > { %v4940_v13 = vpack.c.bf16 %v1609_v46, %v1607_v32  ;;  %v6645_v35 = vpop.permute.xlu0 %1701  ;;  %v4938_v15 = vpack.c.bf16 %v1610_v56, %v1608_v50  ;;  %v1672_v32 = vsel %vm598_vm5, %v6595_v14, %v6597_v49  ;;  %v4952_v50 = vpack.c.bf16 %v6401_v3, %v6393_v36 }
 0x468   : > { %v1671_v46 = vsel %vm598_vm5, %v6554_v58, %v6525_v1  ;;  %v1673_v36 = vsel %vm598_vm5, %v1664_v29, %v6619_v57  ;;  %v4956_v3 = vpack.c.bf16 %v6439_v10, %v6437_v26  ;;  %v1689_v1 = vsel %vm598_vm5, %v6619_v57, %v1664_v29 }
 0x469   : > { %4939 = vmatprep.subr.bf16.mxu0 %v4938_v15  ;;  %v1693_v15 = vmul.f32 %v1672_v32, %v5926_v54  ;;  %v1691_v37 = vmul.f32 %v1671_v46, %v5926_v54  ;;  %v1695_v51 = vmul.f32 %v1673_v36, %v5926_v54  ;;  %v1696_v57 = vmul.f32 %v1689_v1, %v5929_v55 }
 0x46a   : > { %4941 = vmatpush1.bf16.msra.mxu0 %v4940_v13  ;;  %v1668_v61 = vpop.permute.xlu1 %1667  ;;  %v1692_v13 = vmul.f32 %v1687_v20, %v5929_v55 }
 0x46b   : > { %v1618_v48 = vpop.permute.xlu0 %1617  ;;  %4943 = vmatprep.subr.bf16.mxu0 %v4942_v43 }
 0x46c   : > { %v1634_v59 = vsel %vm579_vm1, %v6577_v52, %v1618_v48  ;;  %v1646_v2 = vsel %vm579_vm1, %v1618_v48, %v6577_v52  ;;  %v1688_v52 = vsel %vm598_vm5, %v6597_v49, %v6595_v14  ;;  %v4960_v49 = vpack.c.bf16 %v1693_v15, %v1691_v37 }
 0x46d   : > { %v1653_v62 = vmul.f32 %v1646_v2, %v5891_v23  ;;  %v1654_v17 = vmul.f32 %v1634_v59, %v5894_v24  ;;  %v1694_v25 = vmul.f32 %v1688_v52, %v5929_v55 }
 0x46e   : > { %4945 = vmatpush1.bf16.msra.mxu0 %v4944_v28  ;;  %v1700_v44 = vpop.permute.xlu1 %1699 }
 0x46f   : > { %v4948_v42 = vpack.c.bf16 %v1653_v62, %v1651_v12  ;;  %v1706_v27 = vpop.permute.xlu0 %1705  ;;  %v4946_v33 = vpack.c.bf16 %v1654_v17, %v1652_v60  ;;  %v4958_v16 = vpack.c.bf16 %v1694_v25, %v1692_v13  ;;  %v1731_v0 = vsel %vm618_vm7, %v6645_v35, %v1700_v44 }
 0x470   : > { %v1715_v59 = vsel %vm618_vm7, %v1700_v44, %v6645_v35  ;;  %v1736_v12 = vmul.f32 %v1731_v0, %v5954_v9 }
 0x471   : > { %4947 = vmatprep.subr.bf16.mxu0 %v4946_v33 }
 0x472   : > { %4949 = vmatpush1.bf16.msra.mxu0 %v4948_v42  ;;  %v1704_v45 = vpop.permute.xlu1 %1703 }
 0x473   : > { %v1710_v47 = vpop.permute.xlu0 %1709  ;;  %4951 = vmatprep.subr.bf16.mxu0 %v4950_v40  ;;  %v1732_v58 = vsel %vm618_vm7, %v1706_v27, %v1704_v45  ;;  %v1716_v26 = vsel %vm618_vm7, %v1704_v45, %v1706_v27  ;;  %v1735_v27 = vmul.f32 %v1715_v59, %v5951_v21 }
 0x474   : > { %v1738_v29 = vmul.f32 %v1732_v58, %v5954_v9  ;;  %v1737_v60 = vmul.f32 %v1716_v26, %v5951_v21 }
 0x476   : > { %v1708_v56 = vpop.permute.xlu1 %1707  ;;  %4953 = vmatpush1.bf16.msra.mxu0 %v4952_v50  ;;  %v4966_v40 = vpack.c.bf16 %v1738_v29, %v1736_v12  ;;  %v4968_v35 = vpack.c.bf16 %v1737_v60, %v1735_v27 }
 0x477   : > { %v1746_v53 = vpop.permute.xlu0 %1745  ;;  %4955 = vmatprep.subr.bf16.mxu0 %v4954_v4  ;;  %v1717_v42 = vsel %vm618_vm7, %v1708_v56, %v1710_v47  ;;  %v1733_v33 = vsel %vm618_vm7, %v1710_v47, %v1708_v56 }
 0x478   : > { %v1739_v44 = vmul.f32 %v1717_v42, %v5951_v21  ;;  %v1740_v32 = vmul.f32 %v1733_v33, %v5954_v9  ;;  %v1455_v42 = vld [vmem:[#allocation5] sm:$0xff] }
 0x479   : > { %v1459_v33 = vld [vmem:[#allocation5 + $0x20] sm:$0xff] }
 0x47a   : > { %v1712_v14 = vpop.permute.xlu1 %1711  ;;  %4957 = vmatpush1.bf16.msra.mxu0 %v4956_v3 }
 0x47b   : > { %v1670_v43 = vpop.permute.xlu0 %1669  ;;  %4959 = vmatprep.subr.bf16.mxu0 %v4958_v16 }
 0x47c   : > { %v1674_v10 = vsel %vm598_vm5, %v1668_v61, %v1670_v43  ;;  %v1690_v8 = vsel %vm598_vm5, %v1670_v43, %v1668_v61 }
 0x47d   : > { %v1697_v48 = vmul.f32 %v1674_v10, %v5926_v54  ;;  %v1698_v28 = vmul.f32 %v1690_v8, %v5929_v55 }
 0x47e   : > { %v1744_v2 = vpop.permute.xlu1 %1743  ;;  %4961 = vmatpush1.bf16.msra.mxu0 %v4960_v49 }
 0x47f   : > { %v4964_v62 = vpack.c.bf16 %v1697_v48, %v1695_v51  ;;  %v1750_v17 = vpop.permute.xlu0 %1749  ;;  %v4962_v61 = vpack.c.bf16 %v1698_v28, %v1696_v57  ;;  %v1775_v50 = vsel %vm638_vm6, %v1746_v53, %v1744_v2  ;;  %v1759_v36 = vsel %vm638_vm6, %v1744_v2, %v1746_v53 }
 0x480   : > { %v1780_v3 = vmul.f32 %v1775_v50, %v5941_v6  ;;  %v1779_v49 = vmul.f32 %v1759_v36, %v5938_v5 }
 0x481   : > { %4963 = vmatprep.subr.bf16.mxu0 %v4962_v61 }
 0x482   : > { %v1748_v52 = vpop.permute.xlu1 %1747  ;;  %4965 = vmatpush1.bf16.msra.mxu0 %v4964_v62 }
 0x483   : > { %v1776_v45 = vsel %vm638_vm6, %v1750_v17, %v1748_v52  ;;  %v1714_v20 = vpop.permute.xlu0 %1713  ;;  %4967 = vmatprep.subr.bf16.mxu0 %v4966_v40  ;;  %v1760_v47 = vsel %vm638_vm6, %v1748_v52, %v1750_v17 }
 0x484   : > { %v1718_v25 = vsel %vm618_vm7, %v1712_v14, %v1714_v20  ;;  %v1734_v4 = vsel %vm618_vm7, %v1714_v20, %v1712_v14  ;;  %v1782_v46 = vmul.f32 %v1776_v45, %v5941_v6  ;;  %v1781_v58 = vmul.f32 %v1760_v47, %v5938_v5  ;;  %v5439_v45 = vld [vmem:[%s8145_s1 + $0x18] ss:$0 sm:$0xff] }
 0x485   : > { %v1741_v56 = vmul.f32 %v1718_v25, %v5951_v21  ;;  %v1742_v13 = vmul.f32 %v1734_v4, %v5954_v9  ;;  %v1458_v4 = vld [vmem:[#allocation5 + $0x18] sm:$0xff] }
 0x486   : > { %v1752_v15 = vpop.permute.xlu1 %1751  ;;  %4969 = vmatpush1.bf16.msra.mxu0 %v4968_v35  ;;  %v4974_v14 = vpack.c.bf16 %v1782_v46, %v1780_v3  ;;  %v4976_v53 = vpack.c.bf16 %v1781_v58, %v1779_v49  ;;  %v5438_v35 = vld [vmem:[%s8145_s1 + $0x10] ss:$0 sm:$0xff] }
 0x487   : > { %v4972_v37 = vpack.c.bf16 %v1741_v56, %v1739_v44  ;;  %v1754_v16 = vpop.permute.xlu0 %1753  ;;  %v4970_v1 = vpack.c.bf16 %v1742_v13, %v1740_v32  ;;  %v1462_v13 = vld [vmem:[#allocation5 + $0x38] sm:$0xff] }
 0x488   : > { %v1761_v51 = vsel %vm638_vm6, %v1752_v15, %v1754_v16  ;;  %v1777_v43 = vsel %vm638_vm6, %v1754_v16, %v1752_v15 }
 0x489   : > { %4971 = vmatprep.subr.bf16.mxu0 %v4970_v1  ;;  %v1783_v57 = vmul.f32 %v1761_v51, %v5938_v5  ;;  %v1784_v29 = vmul.f32 %v1777_v43, %v5941_v6  ;;  %v1465_v1 = vld [vmem:[#allocation5 + $0x50] sm:$0xff] }
 0x48a   : > { %v1756_v0 = vpop.permute.xlu1 %1755  ;;  %4973 = vmatpush1.bf16.msra.mxu0 %v4972_v37  ;;  %v1461_v37 = vld [vmem:[#allocation5 + $0x30] sm:$0xff] }
 0x48b   : > { %v1758_v26 = vpop.permute.xlu0 %1757  ;;  %4975 = vmatprep.subr.bf16.mxu0 %v4974_v14 }
 0x48c   : > { %v1762_v10 = vsel %vm638_vm6, %v1756_v0, %v1758_v26  ;;  %v1778_v8 = vsel %vm638_vm6, %v1758_v26, %v1756_v0  ;;  %v1464_v26 = vld [vmem:[#allocation5 + $0x48] sm:$0xff] }
 0x48d   : > { %v1785_v48 = vmul.f32 %v1762_v10, %v5938_v5  ;;  %v1786_v28 = vmul.f32 %v1778_v8, %v5941_v6  ;;  %v8248_v8 = vmov 0.0  }
 0x48e   : > { %v1788_v59 = vpop.permute.xlu1 %1787  ;;  %4977 = vmatpush1.bf16.msra.mxu0 %v4976_v53 }
 0x48f   : > { %v4980_v2 = vpack.c.bf16 %v1785_v48, %v1783_v57  ;;  %v1790_v12 = vpop.permute.xlu0 %1789  ;;  %v4978_v60 = vpack.c.bf16 %v1786_v28, %v1784_v29  ;;  %v1457_v57 = vld [vmem:[#allocation5 + $0x10] sm:$0xff]  ;;  %v8194_v29 = vmov 1.0|1.0   ;;  %v1460_v48 = vld [vmem:[#allocation5 + $0x28] sm:$0xff]  ;;  %v1463_v28 = vld [vmem:[#allocation5 + $0x40] sm:$0xff] }
 0x490   : > { %v1803_v62 = vsel %vm658_vm8, %v1788_v59, %v1790_v12  ;;  %v1819_v17 = vsel %vm658_vm8, %v1790_v12, %v1788_v59  ;;  %v1466_v59 = vld [vmem:[#allocation5 + $0x58] sm:$0xff] }
 0x491   : > { %4979 = vmatprep.subr.bf16.mxu0 %v4978_v60  ;;  %v1823_v44 = vmul.f32 %v5438_v35, %v1803_v62  ;;  %v1824_v20 = vmul.f32 %v5439_v45, %v1819_v17 }
 0x492   : > { %v1792_v61 = vpop.permute.xlu1 %1791  ;;  %4981 = vmatpush1.bf16.msra.mxu0 %v4980_v2 }
 0x493   : > { %v1794_v27 = vpop.permute.xlu0 %1793 }
 0x494   : > { %v1804_v40 = vsel %vm658_vm8, %v1792_v61, %v1794_v27  ;;  %v1820_v52 = vsel %vm658_vm8, %v1794_v27, %v1792_v61 }
 0x495   : > { %v1825_v32 = vmul.f32 %v5438_v35, %v1804_v40  ;;  %v1826_v50 = vmul.f32 %v5439_v45, %v1820_v52  ;;  %1928 = vmatmul.mubr.f32.vlgmr.msra.gmra.mrb[8].mxu0 %v1455_v42 }
 0x496   : > { %v1796_v25 = vpop.permute.xlu1 %1795  ;;  %1933 = vmatprep.mubr.f32.mxu0 %v1459_v33 }
 0x497   : > { %v4984_v47 = vpack.c.bf16 %v1825_v32, %v1823_v44  ;;  %v1798_v46 = vpop.permute.xlu0 %1797  ;;  %v4982_v56 = vpack.c.bf16 %v1826_v50, %v1824_v20 }
 0x498   : > { %v1805_v15 = vsel %vm658_vm8, %v1796_v25, %v1798_v46  ;;  %v1821_v36 = vsel %vm658_vm8, %v1798_v46, %v1796_v25  ;;  %v8192_v46 = vmov 0.0|0.0  }
 0x499   : > { %1934 = vmatmul.mubr.f32.gmra.mrb[10].mxu0 %v1458_v4  ;;  %4983 = vmatprep.subr.bf16.mxu0 %v4982_v56  ;;  %v1827_v49 = vmul.f32 %v5438_v35, %v1805_v15  ;;  %v1828_v51 = vmul.f32 %v5439_v45, %v1821_v36 }
 0x49a   : > { %v1800_v3 = vpop.permute.xlu1 %1799  ;;  %4985 = vmatpush1.bf16.msra.mxu0 %v4984_v47  ;;  %1939 = vmatprep.mubr.f32.mxu0 %v1462_v13 }
 0x49b   : > { %v1802_v16 = vpop.permute.xlu0 %1801 }
 0x49c   : > { %v1806_v58 = vsel %vm658_vm8, %v1800_v3, %v1802_v16  ;;  %v1822_v14 = vsel %vm658_vm8, %v1802_v16, %v1800_v3 }
 0x49d   : > { %v1829_v43 = vmul.f32 %v5438_v35, %v1806_v58  ;;  %v1830_v0 = vmul.f32 %v5439_v45, %v1822_v14  ;;  %1940 = vmatmul.mubr.f32.gmra.mrb[12].mxu0 %v1461_v37 }
 0x49e   : > { %1945 = vmatprep.mubr.f32.mxu0 %v1465_v1 }
 0x49f   : > { %v4988_v53 = vpack.c.bf16 %v1829_v43, %v1827_v49  ;;  %v4986_v10 = vpack.c.bf16 %v1830_v0, %v1828_v51 }
 0x4a1   : > { %1946 = vmatmul.mubr.f32.gmra.mrb[14].mxu0 %v1464_v26  ;;  %4987 = vmatprep.subr.bf16.mxu0 %v4986_v10 }
 0x4a2   : > { %4989 = vmatpush1.bf16.msra.mxu0 %v4988_v53  ;;  %2016 = vmatprep.mubr.f32.mxu0 %v8248_v8 }
 0x4a3   : > { %4990 = vmatprep.subr.bf16.mxu0 %v8194_v29 }
 0x4a5   : > { %4619 = vmatmul.mubr.msk.f32.vlgmr.msra.gmra.mrb[8].mxu0 %vm1256_vm10, %v1457_v57 }
 0x4a6   : > { %2022 = vmatprep.mubr.f32.mxu0 %v8248_v8  ;;  %4991 = vmatpush3.bf16.msra.mxu0 %v8194_v29 }
 0x4a7   : > { %4992 = vmatprep.subr.bf16.mxu0 %v8194_v29 }
 0x4a9   : > { %4620 = vmatmul.mubr.msk.f32.gmra.mrb[10].mxu0 %vm1256_vm10, %v1460_v48  ;;  %v2130_v48 = vld [vmem:[%s8152_s8] sm:$0x3] }
 0x4aa   : > { %2028 = vmatprep.mubr.f32.mxu0 %v8248_v8  ;;  %4993 = vmatpush3.bf16.msra.mxu0 %v8194_v29 }
 0x4ab   : > { %4994 = vmatprep.subr.bf16.mxu0 %v8194_v29  ;;  %v1834_v12 = vpop.permute.xlu1 %1833 }
 0x4ac   : > { %v1839_v42 = vpop.permute.xlu0 %1838 }
 0x4ad   : > { %4621 = vmatmul.mubr.msk.f32.gmra.mrb[12].mxu0 %vm1256_vm10, %v1463_v28  ;;  %v2206_v28 = vld [vmem:[%s8154_s10] sm:$0xff] }
 0x4ae   : > { %2034 = vmatprep.mubr.f32.mxu0 %v8248_v8  ;;  %4995 = vmatpush3.bf16.msra.mxu0 %v8194_v29 }
 0x4af   : > { %4996 = vmatprep.subr.bf16.mxu0 %v8194_v29  ;;  %v1844_v35 = vpop.permute.xlu1 %1843 }
 0x4b0   : > { %v1849_v50 = vpop.permute.xlu0 %1848 }
 0x4b1   : > { %4622 = vmatmul.mubr.msk.f32.gmra.mrb[14].mxu0 %vm1256_vm10, %v1466_v59  ;;  %v2131_v59 = vld [vmem:[%s8153_s9] sm:$0x3] }
 0x4b2   : > { %4997 = vmatpush3.bf16.msra.mxu0 %v8194_v29 }
 0x4b3   : > { %4998 = vmatprep.subr.bf16.mxu0 %v8194_v29 }
 0x4b6   : > { %4999 = vmatpush3.bf16.msra.mxu0 %v8194_v29 }
 0x4b7   : > { %5000 = vmatprep.subr.bf16.mxu0 %v8194_v29 }
 0x4ba   : > { %5001 = vmatpush3.bf16.msra.mxu0 %v8194_v29 }
 0x4bb   : > { %5002 = vmatprep.subr.bf16.mxu0 %v8194_v29 }
 0x4be   : > { %5003 = vmatpush3.bf16.msra.mxu0 %v8194_v29 }
 0x4bf   : > { %5004 = vmatprep.subr.bf16.mxu0 %v8194_v29 }
 0x4c2   : > { %5005 = vmatpush3.bf16.msra.mxu0 %v8194_v29 }
 0x4c3   : > { %5006 = vmatprep.subr.bf16.mxu0 %v8192_v46 }
 0x578   : > { %v2018_v2 = vpop.f32.mrb[8].mxu0 }
 0x579   : > { %v2020_v60 = vpop.f32.mrb[9].mxu0  ;;  %v6769_v17 = vadd.f32 %v2018_v2, %v1834_v12 }
 0x57a   : > { %v6767_v62 = vadd.f32 %v2020_v60, %v1834_v12 }
 0x57c   : > { %v2024_v61 = vpop.f32.mrb[10].mxu0  ;;  %2105 = vmatprep.mubr.f32.mxu0 %v6767_v62 }
 0x57d   : > { %v2026_v27 = vpop.f32.mrb[11].mxu0  ;;  %2106 = vmatmul.mubr.f32.vlgmr.msra.gmra.mrb[16].mxu0 %v6769_v17  ;;  %v6775_v40 = vadd.f32 %v2024_v61, %v1839_v42 }
 0x57e   : > { %v6773_v33 = vadd.f32 %v2026_v27, %v1839_v42  ;;  %v2207_v42 = vld [vmem:[%s8154_s10 + $0x8] sm:$0xff]  ;;  %v2208_v27 = vld [vmem:[%s8154_s10 + $0x10] sm:$0xff] }
 0x580   : > { %v2030_v52 = vpop.f32.mrb[12].mxu0  ;;  %2110 = vmatprep.mubr.f32.mxu0 %v6773_v33 }
 0x581   : > { %v2032_v44 = vpop.f32.mrb[13].mxu0  ;;  %2111 = vmatmul.mubr.f32.gmra.mrb[18].mxu0 %v6775_v40  ;;  %v6781_v20 = vadd.f32 %v2030_v52, %v1844_v35  ;;  %v2209_v52 = vld [vmem:[%s8154_s10 + $0x18] sm:$0xff] }
 0x582   : > { %v6779_v45 = vadd.f32 %v2032_v44, %v1844_v35  ;;  %v2211_v35 = vld [vmem:[%s8249_s27 + $0x8] sm:$0xff]  ;;  %v2210_v44 = vld [vmem:[%s8249_s27] sm:$0xff] }
 0x584   : > { %v2036_v32 = vpop.f32.mrb[14].mxu0  ;;  %2115 = vmatprep.mubr.f32.mxu0 %v6779_v45 }
 0x585   : > { %v2038_v25 = vpop.f32.mrb[15].mxu0  ;;  %2116 = vmatmul.mubr.f32.gmra.mrb[20].mxu0 %v6781_v20  ;;  %v6787_v47 = vadd.f32 %v2036_v32, %v1849_v50 }
 0x586   : > { %v6785_v4 = vadd.f32 %v2038_v25, %v1849_v50 }
 0x588   : > { %2120 = vmatprep.mubr.f32.mxu0 %v6785_v4 }
 0x589   : > { %2121 = vmatmul.mubr.f32.gmra.mrb[22].mxu0 %v6787_v47 }
 0x58a   : > { %4808 = vmatprep.mubr.msk.f32.mxu0 %vm5590_vm11, %v8248_v8 }
 0x650   : > { %v4724_v56 = vpop.f32.mrb[16].mxu0 }
 0x651   : > { %v4725_v13 = vpop.f32.mrb[17].mxu0 }
 0x652   : > { %v4726_v15 = vadd.f32 %v4725_v13, %v4724_v56  ;;  %v2213_v13 = vld [vmem:[%s8249_s27 + $0x18] sm:$0xff] }
 0x654   : > { %v4727_v36 = vpop.f32.mrb[18].mxu0  ;;  %v2126_v16 = vmul.f32 0.00390625, %v4726_v15 }
 0x655   : > { %v4728_v3 = vpop.f32.mrb[19].mxu0 }
 0x656   : > { %v4729_v37 = vadd.f32 %v4728_v3, %v4727_v36  ;;  %v2212_v36 = vld [vmem:[%s8249_s27 + $0x10] sm:$0xff] }
 0x658   : > { %v2127_v1 = vmul.f32 0.00390625, %v4729_v37  ;;  %v4730_v58 = vpop.f32.mrb[20].mxu0 }
 0x659   : > { %v4731_v14 = vpop.f32.mrb[21].mxu0 }
 0x65a   : > { %v5007_v49 = vpack.c.bf16 %v2127_v1, %v2126_v16  ;;  %v4732_v51 = vadd.f32 %v4731_v14, %v4730_v58 }
 0x65c   : > { %v4733_v43 = vpop.f32.mrb[22].mxu0  ;;  %5008 = vmatpush3.bf16.msra.mxu0 %v5007_v49  ;;  %v2128_v53 = vmul.f32 0.00390625, %v4732_v51 }
 0x65d   : > { %v4734_v0 = vpop.f32.mrb[23].mxu0  ;;  %5009 = vmatprep.subr.bf16.mxu0 %v8192_v46 }
 0x65e   : > { %v4735_v26 = vadd.f32 %v4734_v0, %v4733_v43 }
 0x660   : > { %v2129_v10 = vmul.f32 0.00390625, %v4735_v26 }
 0x662   : > { %v5010_v57 = vpack.c.bf16 %v2129_v10, %v2128_v53 }
 0x664   : > { %5011 = vmatpush3.bf16.msra.mxu0 %v5010_v57 }
 0x667   : > { %4809 = vmatmul.mubr.msk.f32.vlgmr.msra.gmra.mrb[24].mxu0 %vm1256_vm10, %v2130_v48 }
 0x668   : > { %4813 = vmatprep.mubr.msk.f32.mxu0 %vm2214_vm12, %v2206_v28 }
 0x73a   : > { %v2201_v2 = vpop.f32.mrb[24].mxu0 }
 0x73b   : > { %v2202_v12 = vadd.f32 %v2201_v2, %v2131_v59  ;;  %v4810_v60 = vpop.f32.mrb[25].mxu0 }
 0x73d   : > { %v2205_v61 = vmax.f32 %v2202_v12, 0.0 }
 0x73f   : > { %4811 = vmatprep.subr.msk.mxu0 %vm2227_vm13, %v2205_v61 }
 0x740   : > { %4812 = vmatpush3.msk.msra.mxu0 %vm2227_vm13, %v2205_v61 }
 0x741   : > { %4814 = vmatmul.mubr.msk.f32.vlgmr.msra.gmra.mrb[26].mxu0 %vm2214_vm12, %v2207_v42 }
 0x742   : > { %4816 = vmatprep.mubr.msk.f32.mxu0 %vm2214_vm12, %v2208_v27 }
 0x745   : > { %4817 = vmatmul.mubr.msk.f32.gmra.mrb[28].mxu0 %vm2214_vm12, %v2209_v52 }
 0x814   : > { %v4815_v32 = vpop.f32.mrb[26].mxu0 }
 0x815   : > { %v2303_v50 = vadd.f32 %v4815_v32, %v2211_v35  ;;  %v2297_v25 = vpop.f32.mrb[27].mxu0 }
 0x816   : > { %v2298_v56 = vadd.f32 %v2297_v25, %v2210_v44 }
 0x817   : > { %v4630_v15 = vmul.f32 -1.442695, %v2303_v50 }
 0x818   : > { %v4629_v3 = vmul.f32 -1.442695, %v2298_v56  ;;  %v4818_v37 = vpop.f32.mrb[28].mxu0 }
 0x819   : > { %5406 = vpow2.f32 %v4630_v15  ;;  %v2313_v16 = vadd.f32 %v4818_v37, %v2213_v13  ;;  %v2307_v1 = vpop.f32.mrb[29].mxu0 }
 0x81a   : > { %5408 = vpow2.f32 %v4629_v3  ;;  %v2308_v58 = vadd.f32 %v2307_v1, %v2212_v36  ;;  %v8258_v3 = vld [vmem:[#allocation18_spill] sm:$0xff] }
 0x81b   : > { %v4632_v14 = vmul.f32 -1.442695, %v2313_v16 }
 0x81c   : > { %v4631_v49 = vmul.f32 -1.442695, %v2308_v58 }
 0x81d   : > { %5410 = vpow2.f32 %v4632_v14 }
 0x81e   : > { %5412 = vpow2.f32 %v4631_v49 }
 0x823   : > { %v5407_v51 = vpop.eup %5406 }
 0x824   : > { %v5409_v43 = vpop.eup %5408  ;;  %v2329_v0 = vadd.f32 1.0, %v5407_v51 }
 0x825   : > { %v2328_v26 = vadd.f32 1.0, %v5409_v43 }
 0x826   : > { %5414 = vrcp.f32 %v2329_v0 }
 0x827   : > { %v5411_v53 = vpop.eup %5410  ;;  %5416 = vrcp.f32 %v2328_v26 }
 0x828   : > { %v5413_v10 = vpop.eup %5412  ;;  %v2331_v57 = vadd.f32 1.0, %v5411_v53 }
 0x829   : > { %v2330_v48 = vadd.f32 1.0, %v5413_v10 }
 0x82a   : > { %5418 = vrcp.f32 %v2331_v57 }
 0x82b   : > { %5420 = vrcp.f32 %v2330_v48 }
 0x830   : > { %v5415_v28 = vpop.eup %5414 }
 0x831   : > { %v5417_v59 = vpop.eup %5416  ;;  %2347 = vperm.xlu0 %5403, %v5415_v28   ;;  %v4646_v28 = vld [vmem:[%s8149_s5 + $0x28] sm:$0xff] }
 0x832   : > { %2342 = vperm.xlu1 %5404, %v5417_v59   ;;  %v4645_v59 = vld [vmem:[%s8149_s5 + $0x20] sm:$0xff] }
 0x834   : > { %v5419_v2 = vpop.eup %5418 }
 0x835   : > { %v5421_v12 = vpop.eup %5420  ;;  %2357 = vperm.xlu0 %5403, %v5419_v2  }
 0x836   : > { %2352 = vperm.xlu1 %5404, %v5421_v12  }
 0x8b0   : > { %v2348_v60 = vpop.permute.xlu0 %2347 }
 0x8b1   : > { %v2362_v61 = vmul.f32 %v6775_v40, %v2348_v60  ;;  %v2363_v42 = vmul.f32 %v6773_v33, %v2348_v60  ;;  %v2343_v27 = vpop.permute.xlu1 %2342 }
 0x8b2   : > { %v2361_v44 = vmul.f32 %v6767_v62, %v2343_v27  ;;  %v2360_v32 = vmul.f32 %v6769_v17, %v2343_v27  ;;  %v4647_v27 = vld [vmem:[%s8149_s5 + $0x30] sm:$0xff] }
 0x8b3   : > { %v6835_v52 = vadd.f32 %v2362_v61, %v6005_v11  ;;  %v6838_v35 = vadd.f32 %v2363_v42, %v6023_v22  ;;  %v4648_v42 = vld [vmem:[%s8149_s5 + $0x38] sm:$0xff] }
 0x8b4   : > { %v6847_v40 = vadd.f32 %v2361_v44, %v5999_v7  ;;  %v6854_v33 = vadd.f32 %v2360_v32, %v5997_v63  ;;  %v2358_v62 = vpop.permute.xlu0 %2357 }
 0x8b5   : > { %2400 = vrot.lane.b32.xlu0 %v6838_v35, %s8250_s2  ;;  %2582 = vrot.lane.b32.xlu1 %v6835_v52, %s8251_s0  ;;  %v2366_v17 = vmul.f32 %v6787_v47, %v2358_v62  ;;  %v2367_v50 = vmul.f32 %v6785_v4, %v2358_v62  ;;  %v2353_v25 = vpop.permute.xlu1 %2352  ;;  %v8256_v47 = vld [vmem:[#allocation20_spill] sm:$0xff] }
 0x8b6   : > { %8252 = vst [vmem:[#allocation22_spill] sm:$0xff] %v6847_v40  ;;  %8253 = vst [vmem:[#allocation23_spill] sm:$0xff] %v6854_v33  ;;  %v2365_v15 = vmul.f32 %v6779_v45, %v2353_v25  ;;  %v2364_v4 = vmul.f32 %v6781_v20, %v2353_v25  ;;  %v4634_v45 = vld [vmem:[%s8148_s4 + $0x68] sm:$0xff] }
 0x8b7   : > { %v6895_v56 = vadd.f32 %v2366_v17, %v6043_v34  ;;  %v6898_v13 = vadd.f32 %v2367_v50, %v6063_v41  ;;  %2850 = vmatprep.mubr.f32.mxu0 %v4634_v45 }
 0x8b8   : > { %v6907_v36 = vadd.f32 %v2365_v15, %v8256_v47  ;;  %v6914_v37 = vadd.f32 %v2364_v4, %v8258_v3 }
 0x8b9   : > { %2416 = vrot.lane.b32.xlu0 %v6835_v52, %s8250_s2  ;;  %2398 = vrot.lane.b32.xlu1 %v6847_v40, %s8250_s2  ;;  %8254 = vst [vmem:[#allocation24_spill] sm:$0xff] %v6895_v56  ;;  %8255 = vst [vmem:[#allocation25_spill] sm:$0xff] %v6898_v13 }
 0x8ba   : > { %8257 = vst [vmem:[#allocation26_spill] sm:$0xff] %v6907_v36  ;;  %8259 = vst [vmem:[#allocation27_spill] sm:$0xff] %v6914_v37 }
 0x8bd   : > { %2448 = vrot.lane.b32.xlu0 %v6838_v35, %s8245_s20  ;;  %2414 = vrot.lane.b32.xlu1 %v6854_v33, %s8250_s2 }
 0x8c1   : > { %2460 = vrot.lane.b32.xlu0 %v6835_v52, %s8245_s20  ;;  %2446 = vrot.lane.b32.xlu1 %v6847_v40, %s8245_s20 }
 0x8c5   : > { %2492 = vrot.lane.b32.xlu0 %v6838_v35, %s8246_s21  ;;  %2458 = vrot.lane.b32.xlu1 %v6854_v33, %s8245_s20 }
 0x8c9   : > { %2504 = vrot.lane.b32.xlu0 %v6835_v52, %s8246_s21  ;;  %2490 = vrot.lane.b32.xlu1 %v6847_v40, %s8246_s21 }
 0x8cd   : > { %2536 = vrot.lane.b32.xlu0 %v6838_v35, %s8237_s11  ;;  %2502 = vrot.lane.b32.xlu1 %v6854_v33, %s8246_s21 }
 0x8d1   : > { %2548 = vrot.lane.b32.xlu0 %v6835_v52, %s8237_s11  ;;  %2534 = vrot.lane.b32.xlu1 %v6847_v40, %s8237_s11 }
 0x8d5   : > { %2584 = vrot.lane.b32.xlu0 %v6838_v35, %s8251_s0  ;;  %2546 = vrot.lane.b32.xlu1 %v6854_v33, %s8237_s11 }
 0x8d9   : > { %2580 = vrot.lane.b32.xlu0 %v6847_v40, %s8251_s0  ;;  %2578 = vrot.lane.b32.xlu1 %v6854_v33, %s8251_s0 }
 0x8dd   : > { %2624 = vrot.lane.b32.xlu0 %v6847_v40, %s8243_s12  ;;  %2622 = vrot.lane.b32.xlu1 %v6854_v33, %s8243_s12 }
 0x8e1   : > { %2404 = vrot.lane.b32.xlu0 %v6898_v13, %s8250_s2  ;;  %2590 = vrot.lane.b32.xlu1 %v6895_v56, %s8251_s0 }
 0x8e5   : > { %2420 = vrot.lane.b32.xlu0 %v6895_v56, %s8250_s2  ;;  %2402 = vrot.lane.b32.xlu1 %v6907_v36, %s8250_s2 }
 0x8e9   : > { %2452 = vrot.lane.b32.xlu0 %v6898_v13, %s8245_s20  ;;  %2418 = vrot.lane.b32.xlu1 %v6914_v37, %s8250_s2 }
 0x8ed   : > { %2464 = vrot.lane.b32.xlu0 %v6895_v56, %s8245_s20  ;;  %2450 = vrot.lane.b32.xlu1 %v6907_v36, %s8245_s20 }
 0x8f1   : > { %2496 = vrot.lane.b32.xlu0 %v6898_v13, %s8246_s21  ;;  %2462 = vrot.lane.b32.xlu1 %v6914_v37, %s8245_s20 }
 0x8f5   : > { %2508 = vrot.lane.b32.xlu0 %v6895_v56, %s8246_s21  ;;  %2494 = vrot.lane.b32.xlu1 %v6907_v36, %s8246_s21 }
 0x8f9   : > { %2540 = vrot.lane.b32.xlu0 %v6898_v13, %s8237_s11  ;;  %2506 = vrot.lane.b32.xlu1 %v6914_v37, %s8246_s21 }
 0x8fd   : > { %2552 = vrot.lane.b32.xlu0 %v6895_v56, %s8237_s11  ;;  %2538 = vrot.lane.b32.xlu1 %v6907_v36, %s8237_s11 }
 0x901   : > { %2592 = vrot.lane.b32.xlu0 %v6898_v13, %s8251_s0  ;;  %2550 = vrot.lane.b32.xlu1 %v6914_v37, %s8237_s11 }
 0x905   : > { %2628 = vrot.lane.b32.xlu0 %v6838_v35, %s8243_s12  ;;  %2626 = vrot.lane.b32.xlu1 %v6835_v52, %s8243_s12 }
 0x909   : > { %2636 = vrot.lane.b32.xlu0 %v6898_v13, %s8243_s12  ;;  %2634 = vrot.lane.b32.xlu1 %v6895_v56, %s8243_s12 }
 0x90d   : > { %2668 = vrot.lane.b32.xlu0 %v6847_v40, %s8244_s29  ;;  %2666 = vrot.lane.b32.xlu1 %v6854_v33, %s8244_s29 }
 0x911   : > { %2588 = vrot.lane.b32.xlu0 %v6907_v36, %s8251_s0  ;;  %2586 = vrot.lane.b32.xlu1 %v6914_v37, %s8251_s0 }
 0x915   : > { %2672 = vrot.lane.b32.xlu0 %v6838_v35, %s8244_s29  ;;  %2670 = vrot.lane.b32.xlu1 %v6835_v52, %s8244_s29 }
 0x919   : > { %2632 = vrot.lane.b32.xlu0 %v6907_v36, %s8243_s12  ;;  %2630 = vrot.lane.b32.xlu1 %v6914_v37, %s8243_s12 }
 0x91d   : > { %2680 = vrot.lane.b32.xlu0 %v6898_v13, %s8244_s29  ;;  %2678 = vrot.lane.b32.xlu1 %v6895_v56, %s8244_s29 }
 0x921   : > { %2676 = vrot.lane.b32.xlu0 %v6907_v36, %s8244_s29  ;;  %2674 = vrot.lane.b32.xlu1 %v6914_v37, %s8244_s29 }
 0x925   : > { %2712 = vrot.lane.b32.xlu0 %v6847_v40, %s8247_s14  ;;  %2710 = vrot.lane.b32.xlu1 %v6854_v33, %s8247_s14 }
 0x927   : > { %v2401_v20 = vpop.permute.xlu0 %2400  ;;  %v6983_v16 = vpop.permute.xlu1 %2582 }
 0x929   : > { %2716 = vrot.lane.b32.xlu0 %v6838_v35, %s8247_s14  ;;  %2714 = vrot.lane.b32.xlu1 %v6835_v52, %s8247_s14 }
 0x92b   : > { %v2417_v1 = vpop.permute.xlu0 %2416  ;;  %v2399_v58 = vpop.permute.xlu1 %2398 }
 0x92c   : > { %v2435_v14 = vsel %vm519_vm2, %v2401_v20, %v2417_v1  ;;  %v2423_v49 = vsel %vm519_vm2, %v2417_v1, %v2401_v20 }
 0x92d   : > { %2720 = vrot.lane.b32.xlu0 %v6907_v36, %s8247_s14  ;;  %2718 = vrot.lane.b32.xlu1 %v6914_v37, %s8247_s14  ;;  %v2440_v0 = vmul.f32 %v2435_v14, %v5900_v30  ;;  %v2441_v10 = vmul.f32 %v2423_v49, %v5903_v31 }
 0x92f   : > { %v2449_v51 = vpop.permute.xlu0 %2448  ;;  %v2415_v43 = vpop.permute.xlu1 %2414 }
 0x930   : > { %v2422_v26 = vsel %vm519_vm2, %v2415_v43, %v2399_v58  ;;  %v2434_v53 = vsel %vm519_vm2, %v2399_v58, %v2415_v43 }
 0x931   : > { %v2438_v57 = vmul.f32 %v2434_v53, %v5900_v30  ;;  %v2439_v48 = vmul.f32 %v2422_v26, %v5903_v31  ;;  %2724 = vrot.lane.b32.xlu0 %v6898_v13, %s8247_s14  ;;  %2722 = vrot.lane.b32.xlu1 %v6895_v56, %s8247_s14 }
 0x933   : > { %v5014_v2 = vpack.c.bf16 %v2440_v0, %v2438_v57  ;;  %v2461_v12 = vpop.permute.xlu0 %2460  ;;  %v2447_v60 = vpop.permute.xlu1 %2446  ;;  %v5012_v61 = vpack.c.bf16 %v2441_v10, %v2439_v48 }
 0x935   : > { %2761 = vperm.xlu0 %5403, %v4646_v28   ;;  %2756 = vperm.xlu1 %5404, %v4645_v59   ;;  %v2467_v28 = vsel %vm539_vm0, %v2461_v12, %v2449_v51 }
 0x936   : > { %5013 = vmatprep.subr.bf16.mxu0 %v5012_v61  ;;  %v2485_v47 = vmul.f32 %v2467_v28, %v5885_v19 }
 0x937   : > { %5015 = vmatpush1.bf16.msra.mxu0 %v5014_v2  ;;  %v2493_v44 = vpop.permute.xlu0 %2492  ;;  %v2459_v32 = vpop.permute.xlu1 %2458 }
 0x938   : > { %v2466_v10 = vsel %vm539_vm0, %v2459_v32, %v2447_v60  ;;  %v2478_v61 = vsel %vm539_vm0, %v2447_v60, %v2459_v32 }
 0x939   : > { %2771 = vperm.xlu0 %5403, %v4648_v42   ;;  %2766 = vperm.xlu1 %5404, %v4647_v27   ;;  %v2483_v42 = vmul.f32 %v2466_v10, %v5885_v19  ;;  %v2482_v60 = vmul.f32 %v2478_v61, %v5882_v18 }
 0x93b   : > { %v2505_v62 = vpop.permute.xlu0 %2504  ;;  %v2491_v17 = vpop.permute.xlu1 %2490 }
 0x93f   : > { %v7017_v50 = vpop.permute.xlu0 %2536  ;;  %v2503_v25 = vpop.permute.xlu1 %2502 }
 0x943   : > { %v7019_v15 = vpop.permute.xlu0 %2548  ;;  %v7021_v4 = vpop.permute.xlu1 %2534 }
 0x947   : > { %v7023_v45 = vpop.permute.xlu0 %2584  ;;  %v7025_v20 = vpop.permute.xlu1 %2546 }
 0x94b   : > { %v7027_v1 = vpop.permute.xlu0 %2580  ;;  %v7029_v58 = vpop.permute.xlu1 %2578 }
 0x94f   : > { %v7031_v14 = vpop.permute.xlu0 %2624  ;;  %v7033_v49 = vpop.permute.xlu1 %2622 }
 0x953   : > { %v2405_v43 = vpop.permute.xlu0 %2404  ;;  %v7035_v0 = vpop.permute.xlu1 %2590 }
 0x957   : > { %v2421_v26 = vpop.permute.xlu0 %2420  ;;  %v2403_v53 = vpop.permute.xlu1 %2402 }
 0x958   : > { %v2425_v57 = vsel %vm519_vm2, %v2421_v26, %v2405_v43  ;;  %v2437_v48 = vsel %vm519_vm2, %v2405_v43, %v2421_v26  ;;  %v2479_v26 = vsel %vm539_vm0, %v2449_v51, %v2461_v12  ;;  %v2511_v12 = vsel %vm559_vm3, %v2505_v62, %v2493_v44 }
 0x959   : > { %v2444_v29 = vmul.f32 %v2437_v48, %v5900_v30  ;;  %v2445_v41 = vmul.f32 %v2425_v57, %v5903_v31  ;;  %v2510_v48 = vsel %vm559_vm3, %v2503_v25, %v2491_v17  ;;  %v5020_v57 = vpack.c.bf16 %v2485_v47, %v2483_v42 }
 0x95b   : > { %v2453_v59 = vpop.permute.xlu0 %2452  ;;  %v2419_v2 = vpop.permute.xlu1 %2418 }
 0x95c   : > { %v2424_v27 = vsel %vm519_vm2, %v2419_v2, %v2403_v53  ;;  %v2436_v46 = vsel %vm519_vm2, %v2403_v53, %v2419_v2  ;;  %v2484_v53 = vmul.f32 %v2479_v26, %v5882_v18  ;;  %v2529_v26 = vmul.f32 %v2511_v12, %v5915_v39 }
 0x95d   : > { %v2442_v34 = vmul.f32 %v2436_v46, %v5900_v30  ;;  %v2443_v43 = vmul.f32 %v2424_v27, %v5903_v31  ;;  %v2566_v12 = vsel %vm579_vm1, %v7021_v4, %v7025_v20 }
 0x95e   : > { %v5022_v51 = vpack.c.bf16 %v2484_v53, %v2482_v60  ;;  %v2554_v53 = vsel %vm579_vm1, %v7025_v20, %v7021_v4 }
 0x95f   : > { %v5018_v32 = vpack.c.bf16 %v2444_v29, %v2442_v34  ;;  %v2465_v10 = vpop.permute.xlu0 %2464  ;;  %v2451_v3 = vpop.permute.xlu1 %2450  ;;  %v5016_v22 = vpack.c.bf16 %v2445_v41, %v2443_v43  ;;  %v2522_v29 = vsel %vm559_vm3, %v2491_v17, %v2503_v25  ;;  %v2527_v41 = vmul.f32 %v2510_v48, %v5915_v39 }
 0x960   : > { %v2469_v46 = vsel %vm539_vm0, %v2465_v10, %v2453_v59  ;;  %v2481_v2 = vsel %vm539_vm0, %v2453_v59, %v2465_v10  ;;  %v2523_v43 = vsel %vm559_vm3, %v2493_v44, %v2505_v62  ;;  %v2526_v17 = vmul.f32 %v2522_v29, %v5912_v38 }
 0x961   : > { %5017 = vmatprep.subr.bf16.mxu0 %v5016_v22  ;;  %v2488_v47 = vmul.f32 %v2481_v2, %v5882_v18  ;;  %v2489_v42 = vmul.f32 %v2469_v46, %v5885_v19  ;;  %v5028_v48 = vpack.c.bf16 %v2529_v26, %v2527_v41  ;;  %v2555_v46 = vsel %vm579_vm1, %v7019_v15, %v7017_v50 }
 0x962   : > { %5019 = vmatpush1.bf16.msra.mxu0 %v5018_v32  ;;  %v2573_v4 = vmul.f32 %v2555_v46, %v5894_v24  ;;  %v2570_v26 = vmul.f32 %v2566_v12, %v5891_v23 }
 0x963   : > { %v2497_v28 = vpop.permute.xlu0 %2496  ;;  %5021 = vmatprep.subr.bf16.mxu0 %v5020_v57  ;;  %v2463_v34 = vpop.permute.xlu1 %2462 }
 0x964   : > { %v2468_v61 = vsel %vm539_vm0, %v2463_v34, %v2451_v3  ;;  %v2480_v22 = vsel %vm539_vm0, %v2451_v3, %v2463_v34  ;;  %v2528_v3 = vmul.f32 %v2523_v43, %v5912_v38  ;;  %v2571_v34 = vmul.f32 %v2554_v53, %v5894_v24 }
 0x965   : > { %v2486_v59 = vmul.f32 %v2480_v22, %v5882_v18  ;;  %v2487_v27 = vmul.f32 %v2468_v61, %v5885_v19 }
 0x966   : > { %5023 = vmatpush1.bf16.msra.mxu0 %v5022_v51  ;;  %v5030_v62 = vpack.c.bf16 %v2528_v3, %v2526_v17  ;;  %v5036_v17 = vpack.c.bf16 %v2573_v4, %v2571_v34  ;;  %v5044_v34 = vpack.c.bf16 %v6838_v35, %v6847_v40  ;;  %v5048_v4 = vpack.c.bf16 %v6898_v13, %v6907_v36 }
 0x967   : > { %v5026_v25 = vpack.c.bf16 %v2488_v47, %v2486_v59  ;;  %v2509_v60 = vpop.permute.xlu0 %2508  ;;  %v2495_v32 = vpop.permute.xlu1 %2494  ;;  %v5024_v10 = vpack.c.bf16 %v2489_v42, %v2487_v27  ;;  %v2567_v42 = vsel %vm579_vm1, %v7017_v50, %v7019_v15 }
 0x968   : > { %v2513_v57 = vsel %vm559_vm3, %v2509_v60, %v2497_v28  ;;  %v2525_v44 = vsel %vm559_vm3, %v2497_v28, %v2509_v60 }
 0x969   : > { %5025 = vmatprep.subr.bf16.mxu0 %v5024_v10  ;;  %v2532_v28 = vmul.f32 %v2525_v44, %v5912_v38  ;;  %v2533_v61 = vmul.f32 %v2513_v57, %v5915_v39 }
 0x96a   : > { %5027 = vmatpush1.bf16.msra.mxu0 %v5026_v25  ;;  %v2572_v25 = vmul.f32 %v2567_v42, %v5891_v23 }
 0x96b   : > { %v2541_v2 = vpop.permute.xlu0 %2540  ;;  %5029 = vmatprep.subr.bf16.mxu0 %v5028_v48  ;;  %v2507_v51 = vpop.permute.xlu1 %2506 }
 0x96c   : > { %v2512_v29 = vsel %vm559_vm3, %v2507_v51, %v2495_v32  ;;  %v2524_v41 = vsel %vm559_vm3, %v2495_v32, %v2507_v51  ;;  %v5038_v15 = vpack.c.bf16 %v2572_v25, %v2570_v26 }
 0x96d   : > { %v2530_v22 = vmul.f32 %v2524_v41, %v5912_v38  ;;  %v2531_v47 = vmul.f32 %v2512_v29, %v5915_v39  ;;  %v2610_v29 = vsel %vm598_vm5, %v7027_v1, %v7029_v58 }
 0x96e   : > { %5031 = vmatpush1.bf16.msra.mxu0 %v5030_v62  ;;  %v2615_v42 = vmul.f32 %v2610_v29, %v5929_v55 }
 0x96f   : > { %v5034_v20 = vpack.c.bf16 %v2532_v28, %v2530_v22  ;;  %v2553_v59 = vpop.permute.xlu0 %2552  ;;  %v2539_v27 = vpop.permute.xlu1 %2538  ;;  %v5032_v43 = vpack.c.bf16 %v2533_v61, %v2531_v47  ;;  %v2611_v61 = vsel %vm598_vm5, %v7023_v45, %v6983_v16  ;;  %v2594_v22 = vsel %vm598_vm5, %v7029_v58, %v7027_v1 }
 0x970   : > { %v2557_v60 = vsel %vm579_vm1, %v2553_v59, %v2541_v2  ;;  %v2569_v32 = vsel %vm579_vm1, %v2541_v2, %v2553_v59  ;;  %v5046_v47 = vpack.c.bf16 %v6835_v52, %v6854_v33  ;;  %v2617_v59 = vmul.f32 %v2611_v61, %v5929_v55 }
 0x971   : > { %5033 = vmatprep.subr.bf16.mxu0 %v5032_v43  ;;  %v2576_v48 = vmul.f32 %v2569_v32, %v5891_v23  ;;  %v2577_v57 = vmul.f32 %v2557_v60, %v5894_v24  ;;  %v5050_v58 = vpack.c.bf16 %v6895_v56, %v6914_v37  ;;  %v2654_v32 = vsel %vm618_vm7, %v7031_v14, %v7033_v49 }
 0x972   : > { %5035 = vmatpush1.bf16.msra.mxu0 %v5034_v20  ;;  %v2595_v20 = vsel %vm598_vm5, %v6983_v16, %v7023_v45  ;;  %v5052_v25 = vpack.c.bf16 %v2617_v59, %v2615_v42 }
 0x973   : > { %v2593_v10 = vpop.permute.xlu0 %2592  ;;  %5037 = vmatprep.subr.bf16.mxu0 %v5036_v17  ;;  %v2551_v50 = vpop.permute.xlu1 %2550  ;;  %v2616_v26 = vmul.f32 %v2595_v20, %v5926_v54 }
 0x974   : > { %v2556_v3 = vsel %vm579_vm1, %v2551_v50, %v2539_v27  ;;  %v2568_v53 = vsel %vm579_vm1, %v2539_v27, %v2551_v50  ;;  %v2614_v27 = vmul.f32 %v2594_v22, %v5926_v54  ;;  %v2597_v17 = vsel %vm598_vm5, %v7035_v0, %v2593_v10 }
 0x975   : > { %v2574_v44 = vmul.f32 %v2568_v53, %v5891_v23  ;;  %v2575_v62 = vmul.f32 %v2556_v3, %v5894_v24  ;;  %v2613_v16 = vsel %vm598_vm5, %v2593_v10, %v7035_v0  ;;  %v2620_v3 = vmul.f32 %v2597_v17, %v5926_v54 }
 0x976   : > { %5039 = vmatpush1.bf16.msra.mxu0 %v5038_v15  ;;  %v5054_v60 = vpack.c.bf16 %v2616_v26, %v2614_v27  ;;  %v2621_v0 = vmul.f32 %v2613_v16, %v5929_v55 }
 0x977   : > { %v5042_v46 = vpack.c.bf16 %v2576_v48, %v2574_v44  ;;  %v2629_v2 = vpop.permute.xlu0 %2628  ;;  %v2627_v51 = vpop.permute.xlu1 %2626  ;;  %v5040_v12 = vpack.c.bf16 %v2577_v57, %v2575_v62 }
 0x978   : > { %v2655_v45 = vsel %vm618_vm7, %v2629_v2, %v2627_v51  ;;  %v2639_v53 = vsel %vm618_vm7, %v2627_v51, %v2629_v2 }
 0x979   : > { %5041 = vmatprep.subr.bf16.mxu0 %v5040_v12  ;;  %v2661_v10 = vmul.f32 %v2655_v45, %v5954_v9  ;;  %v2659_v12 = vmul.f32 %v2654_v32, %v5954_v9  ;;  %v2660_v2 = vmul.f32 %v2639_v53, %v5951_v21 }
 0x97a   : > { %5043 = vmatpush1.bf16.msra.mxu0 %v5042_v46  ;;  %v2638_v46 = vsel %vm618_vm7, %v7033_v49, %v7031_v14 }
 0x97b   : > { %v2637_v41 = vpop.permute.xlu0 %2636  ;;  %5045 = vmatprep.subr.bf16.mxu0 %v5044_v34  ;;  %v2635_v28 = vpop.permute.xlu1 %2634 }
 0x97c   : > { %v2641_v22 = vsel %vm618_vm7, %v2635_v28, %v2637_v41  ;;  %v2657_v42 = vsel %vm618_vm7, %v2637_v41, %v2635_v28 }
 0x97d   : > { %v2664_v49 = vmul.f32 %v2641_v22, %v5951_v21 }
 0x97e   : > { %5047 = vmatpush1.bf16.msra.mxu0 %v5046_v47  ;;  %v2658_v47 = vmul.f32 %v2638_v46, %v5951_v21 }
 0x97f   : > { %v2669_v43 = vpop.permute.xlu0 %2668  ;;  %5049 = vmatprep.subr.bf16.mxu0 %v5048_v4  ;;  %v2667_v1 = vpop.permute.xlu1 %2666  ;;  %v5060_v4 = vpack.c.bf16 %v2661_v10, %v2659_v12 }
 0x980   : > { %v5062_v14 = vpack.c.bf16 %v2660_v2, %v2658_v47  ;;  %v2698_v26 = vsel %vm638_vm6, %v2669_v43, %v2667_v1 }
 0x981   : > { %v2703_v32 = vmul.f32 %v2698_v26, %v5941_v6 }
 0x982   : > { %5051 = vmatpush1.bf16.msra.mxu0 %v5050_v58  ;;  %v2665_v58 = vmul.f32 %v2657_v42, %v5954_v9 }
 0x983   : > { %v2589_v50 = vpop.permute.xlu0 %2588  ;;  %5053 = vmatprep.subr.bf16.mxu0 %v5052_v25  ;;  %v2587_v15 = vpop.permute.xlu1 %2586 }
 0x984   : > { %v2596_v48 = vsel %vm598_vm5, %v2587_v15, %v2589_v50  ;;  %v2612_v57 = vsel %vm598_vm5, %v2589_v50, %v2587_v15 }
 0x985   : > { %v2618_v44 = vmul.f32 %v2596_v48, %v5926_v54  ;;  %v2619_v62 = vmul.f32 %v2612_v57, %v5929_v55 }
 0x986   : > { %5055 = vmatpush1.bf16.msra.mxu0 %v5054_v60  ;;  %v2682_v60 = vsel %vm638_vm6, %v2667_v1, %v2669_v43 }
 0x987   : > { %v5058_v51 = vpack.c.bf16 %v2620_v3, %v2618_v44  ;;  %v2673_v34 = vpop.permute.xlu0 %2672  ;;  %v2671_v29 = vpop.permute.xlu1 %2670  ;;  %v5056_v61 = vpack.c.bf16 %v2621_v0, %v2619_v62  ;;  %v2702_v0 = vmul.f32 %v2682_v60, %v5938_v5  ;;  %v4636_v60 = vld [vmem:[%s8148_s4 + $0x78] sm:$0xff] }
 0x988   : > { %v2699_v20 = vsel %vm638_vm6, %v2673_v34, %v2671_v29  ;;  %v2683_v41 = vsel %vm638_vm6, %v2671_v29, %v2673_v34 }
 0x989   : > { %5057 = vmatprep.subr.bf16.mxu0 %v5056_v61  ;;  %v2705_v28 = vmul.f32 %v2699_v20, %v5941_v6  ;;  %v2704_v48 = vmul.f32 %v2683_v41, %v5938_v5  ;;  %v7190_v41 = vld [vmem:[%s8145_s1 + $0x18] ss:$0 sm:$0xff] }
 0x98a   : > { %5059 = vmatpush1.bf16.msra.mxu0 %v5058_v51 }
 0x98b   : > { %v2633_v59 = vpop.permute.xlu0 %2632  ;;  %5061 = vmatprep.subr.bf16.mxu0 %v5060_v4  ;;  %v2631_v27 = vpop.permute.xlu1 %2630  ;;  %v5068_v57 = vpack.c.bf16 %v2705_v28, %v2703_v32  ;;  %v5070_v1 = vpack.c.bf16 %v2704_v48, %v2702_v0  ;;  %v4639_v0 = vld [vmem:[%s8148_s4 + $0x90] sm:$0xff] }
 0x98c   : > { %v2640_v17 = vsel %vm618_vm7, %v2631_v27, %v2633_v59  ;;  %v2656_v25 = vsel %vm618_vm7, %v2633_v59, %v2631_v27  ;;  %v4637_v27 = vld [vmem:[%s8148_s4 + $0x80] sm:$0xff] }
 0x98d   : > { %v2662_v16 = vmul.f32 %v2640_v17, %v5951_v21  ;;  %v2663_v45 = vmul.f32 %v2656_v25, %v5954_v9  ;;  %v7184_v17 = vld [vmem:[%s8145_s1 + $0x10] ss:$0 sm:$0xff] }
 0x98e   : > { %5063 = vmatpush1.bf16.msra.mxu0 %v5062_v14  ;;  %v4633_v14 = vld [vmem:[%s8148_s4 + $0x60] sm:$0xff] }
 0x98f   : > { %v5066_v50 = vpack.c.bf16 %v2664_v49, %v2662_v16  ;;  %v2681_v15 = vpop.permute.xlu0 %2680  ;;  %v2679_v3 = vpop.permute.xlu1 %2678  ;;  %v5064_v53 = vpack.c.bf16 %v2665_v58, %v2663_v45 }
 0x990   : > { %v2685_v10 = vsel %vm638_vm6, %v2679_v3, %v2681_v15  ;;  %v2701_v44 = vsel %vm638_vm6, %v2681_v15, %v2679_v3 }
 0x991   : > { %5065 = vmatprep.subr.bf16.mxu0 %v5064_v53  ;;  %v2708_v2 = vmul.f32 %v2685_v10, %v5938_v5  ;;  %v2709_v51 = vmul.f32 %v2701_v44, %v5941_v6  ;;  %v4640_v53 = vld [vmem:[%s8148_s4 + $0x98] sm:$0xff] }
 0x992   : > { %5067 = vmatpush1.bf16.msra.mxu0 %v5066_v50 }
 0x993   : > { %v2677_v62 = vpop.permute.xlu0 %2676  ;;  %5069 = vmatprep.subr.bf16.mxu0 %v5068_v57  ;;  %v2675_v43 = vpop.permute.xlu1 %2674 }
 0x994   : > { %v2684_v46 = vsel %vm638_vm6, %v2675_v43, %v2677_v62  ;;  %v2700_v12 = vsel %vm638_vm6, %v2677_v62, %v2675_v43  ;;  %v4643_v62 = vld [vmem:[%s8148_s4 + $0xb0] sm:$0xff] }
 0x995   : > { %v2706_v34 = vmul.f32 %v2684_v46, %v5938_v5  ;;  %v2707_v29 = vmul.f32 %v2700_v12, %v5941_v6 }
 0x996   : > { %5071 = vmatpush1.bf16.msra.mxu0 %v5070_v1 }
 0x997   : > { %v5074_v61 = vpack.c.bf16 %v2708_v2, %v2706_v34  ;;  %v2713_v22 = vpop.permute.xlu0 %2712  ;;  %v2711_v47 = vpop.permute.xlu1 %2710  ;;  %v5072_v42 = vpack.c.bf16 %v2709_v51, %v2707_v29  ;;  %v4642_v34 = vld [vmem:[%s8148_s4 + $0xa8] sm:$0xff] }
 0x998   : > { %v2726_v4 = vsel %vm658_vm8, %v2711_v47, %v2713_v22  ;;  %v2742_v20 = vsel %vm658_vm8, %v2713_v22, %v2711_v47  ;;  %v4635_v22 = vld [vmem:[%s8148_s4 + $0x70] sm:$0xff]  ;;  %v8260_v47 = vmov 1.0|1.0  }
 0x999   : > { %5073 = vmatprep.subr.bf16.mxu0 %v5072_v42  ;;  %v2746_v25 = vmul.f32 %v7184_v17, %v2726_v4  ;;  %v2747_v28 = vmul.f32 %v7190_v41, %v2742_v20  ;;  %v4638_v42 = vld [vmem:[%s8148_s4 + $0x88] sm:$0xff]  ;;  %v4641_v4 = vld [vmem:[%s8148_s4 + $0xa0] sm:$0xff]  ;;  %v4644_v20 = vld [vmem:[%s8148_s4 + $0xb8] sm:$0xff] }
 0x99a   : > { %5075 = vmatpush1.bf16.msra.mxu0 %v5074_v61 }
 0x99b   : > { %v2717_v49 = vpop.permute.xlu0 %2716  ;;  %v2715_v59 = vpop.permute.xlu1 %2714 }
 0x99c   : > { %v2727_v58 = vsel %vm658_vm8, %v2715_v59, %v2717_v49  ;;  %v2743_v26 = vsel %vm658_vm8, %v2717_v49, %v2715_v59 }
 0x99d   : > { %v2748_v16 = vmul.f32 %v7184_v17, %v2727_v58  ;;  %v2749_v45 = vmul.f32 %v7190_v41, %v2743_v26  ;;  %2851 = vmatmul.mubr.f32.vlgmr.msra.gmra.mrb[30].mxu0 %v4633_v14  ;;  %v8261_v14 = vmov 0.0|0.0  }
 0x99e   : > { %2856 = vmatprep.mubr.f32.mxu0 %v4637_v27 }
 0x99f   : > { %v5078_v32 = vpack.c.bf16 %v2748_v16, %v2746_v25  ;;  %v2721_v50 = vpop.permute.xlu0 %2720  ;;  %v2719_v15 = vpop.permute.xlu1 %2718  ;;  %v5076_v3 = vpack.c.bf16 %v2749_v45, %v2747_v28 }
 0x9a0   : > { %v2728_v48 = vsel %vm658_vm8, %v2719_v15, %v2721_v50  ;;  %v2744_v57 = vsel %vm658_vm8, %v2721_v50, %v2719_v15 }
 0x9a1   : > { %2857 = vmatmul.mubr.f32.gmra.mrb[32].mxu0 %v4636_v60  ;;  %5077 = vmatprep.subr.bf16.mxu0 %v5076_v3  ;;  %v2750_v46 = vmul.f32 %v7184_v17, %v2728_v48  ;;  %v2751_v12 = vmul.f32 %v7190_v41, %v2744_v57 }
 0x9a2   : > { %5079 = vmatpush1.bf16.msra.mxu0 %v5078_v32  ;;  %2862 = vmatprep.mubr.f32.mxu0 %v4640_v53 }
 0x9a3   : > { %v2725_v10 = vpop.permute.xlu0 %2724  ;;  %v2723_v44 = vpop.permute.xlu1 %2722 }
 0x9a4   : > { %v2729_v43 = vsel %vm658_vm8, %v2723_v44, %v2725_v10  ;;  %v2745_v1 = vsel %vm658_vm8, %v2725_v10, %v2723_v44 }
 0x9a5   : > { %v2752_v2 = vmul.f32 %v7184_v17, %v2729_v43  ;;  %v2753_v51 = vmul.f32 %v7190_v41, %v2745_v1  ;;  %2863 = vmatmul.mubr.f32.gmra.mrb[34].mxu0 %v4639_v0 }
 0x9a6   : > { %2868 = vmatprep.mubr.f32.mxu0 %v4643_v62 }
 0x9a7   : > { %v5082_v29 = vpack.c.bf16 %v2752_v2, %v2750_v46  ;;  %v5080_v61 = vpack.c.bf16 %v2753_v51, %v2751_v12 }
 0x9a9   : > { %2869 = vmatmul.mubr.f32.gmra.mrb[36].mxu0 %v4642_v34  ;;  %5081 = vmatprep.subr.bf16.mxu0 %v5080_v61 }
 0x9aa   : > { %5083 = vmatpush1.bf16.msra.mxu0 %v5082_v29  ;;  %2939 = vmatprep.mubr.f32.mxu0 %v8248_v8  ;;  %v2974_v29 = vld [vmem:[#allocation5 + $0x68] sm:$0xff] }
 0x9ab   : > { %5156 = vmatprep.subr.bf16.mxu0 %v8260_v47  ;;  %3446 = vmatprep.mubr.f32.mxu1 %v2974_v29 }
 0x9ad   : > { %4649 = vmatmul.mubr.msk.f32.vlgmr.msra.gmra.mrb[30].mxu0 %vm1256_vm10, %v4635_v22 }
 0x9ae   : > { %2945 = vmatprep.mubr.f32.mxu0 %v8248_v8  ;;  %5157 = vmatpush3.bf16.msra.mxu0 %v8260_v47 }
 0x9af   : > { %5158 = vmatprep.subr.bf16.mxu0 %v8260_v47 }
 0x9b1   : > { %4650 = vmatmul.mubr.msk.f32.gmra.mrb[32].mxu0 %vm1256_vm10, %v4638_v42 }
 0x9b2   : > { %2951 = vmatprep.mubr.f32.mxu0 %v8248_v8  ;;  %5159 = vmatpush3.bf16.msra.mxu0 %v8260_v47 }
 0x9b3   : > { %5160 = vmatprep.subr.bf16.mxu0 %v8260_v47 }
 0x9b4   : > { %v2757_v49 = vpop.permute.xlu1 %2756  ;;  %v2762_v28 = vpop.permute.xlu0 %2761 }
 0x9b5   : > { %4651 = vmatmul.mubr.msk.f32.gmra.mrb[34].mxu0 %vm1256_vm10, %v4641_v4 }
 0x9b6   : > { %2957 = vmatprep.mubr.f32.mxu0 %v8248_v8  ;;  %5161 = vmatpush3.bf16.msra.mxu0 %v8260_v47 }
 0x9b7   : > { %5162 = vmatprep.subr.bf16.mxu0 %v8260_v47 }
 0x9b8   : > { %v2767_v10 = vpop.permute.xlu1 %2766  ;;  %v2772_v44 = vpop.permute.xlu0 %2771 }
 0x9b9   : > { %4652 = vmatmul.mubr.msk.f32.gmra.mrb[36].mxu0 %vm1256_vm10, %v4644_v20 }
 0x9ba   : > { %5163 = vmatpush3.bf16.msra.mxu0 %v8260_v47 }
 0x9bb   : > { %5164 = vmatprep.subr.bf16.mxu0 %v8260_v47 }
 0x9be   : > { %5165 = vmatpush3.bf16.msra.mxu0 %v8260_v47 }
 0x9bf   : > { %5166 = vmatprep.subr.bf16.mxu0 %v8260_v47 }
 0x9c2   : > { %5167 = vmatpush3.bf16.msra.mxu0 %v8260_v47 }
 0x9c3   : > { %5168 = vmatprep.subr.bf16.mxu0 %v8260_v47 }
 0x9c6   : > { %5169 = vmatpush3.bf16.msra.mxu0 %v8260_v47 }
 0x9c7   : > { %5170 = vmatprep.subr.bf16.mxu0 %v8260_v47 }
 0x9ca   : > { %5171 = vmatpush3.bf16.msra.mxu0 %v8260_v47 }
 0x9cb   : > { %5172 = vmatprep.subr.bf16.mxu0 %v8261_v14 }
 0xa80   : > { %v2941_v59 = vpop.f32.mrb[30].mxu0 }
 0xa81   : > { %v5266_v27 = vadd.f32 %v2941_v59, %v2757_v49  ;;  %v2943_v58 = vpop.f32.mrb[31].mxu0 }
 0xa82   : > { %v5267_v26 = vadd.f32 %v2943_v58, %v2757_v49  ;;  %v4653_v49 = vld [vmem:[%s8151_s7 + $0x20] sm:$0xff] }
 0xa83   : > { %v7255_v25 = vmax.f32 %v5266_v27, 0.0  ;;  %v4654_v27 = vld [vmem:[%s8151_s7 + $0x28] sm:$0xff] }
 0xa84   : > { %v7257_v16 = vmax.f32 %v5267_v26, 0.0  ;;  %v2947_v45 = vpop.f32.mrb[32].mxu0  ;;  %v4655_v26 = vld [vmem:[%s8151_s7 + $0x30] sm:$0xff] }
 0xa85   : > { %v5268_v60 = vadd.f32 %v2947_v45, %v2762_v28  ;;  %v2949_v32 = vpop.f32.mrb[33].mxu0  ;;  %3010 = vrot.lane.b32.xlu1 %v7255_v25, %s8250_s2  ;;  %v4656_v45 = vld [vmem:[%s8151_s7 + $0x38] sm:$0xff] }
 0xa86   : > { %3176 = vrot.lane.b32.xlu0 %v7257_v16, %s8251_s0  ;;  %v5269_v57 = vadd.f32 %v2949_v32, %v2762_v28 }
 0xa87   : > { %v7263_v50 = vmax.f32 %v5268_v60, 0.0 }
 0xa88   : > { %v2953_v15 = vpop.f32.mrb[34].mxu0  ;;  %v7281_v0 = vmax.f32 %v5269_v57, 0.0 }
 0xa89   : > { %v2955_v3 = vpop.f32.mrb[35].mxu0  ;;  %3054 = vrot.lane.b32.xlu1 %v7255_v25, %s8245_s20  ;;  %v5270_v62 = vadd.f32 %v2953_v15, %v2767_v10 }
 0xa8a   : > { %3012 = vrot.lane.b32.xlu0 %v7263_v50, %s8250_s2  ;;  %v5271_v12 = vadd.f32 %v2955_v3, %v2767_v10 }
 0xa8b   : > { %v7299_v1 = vmax.f32 %v5270_v62, 0.0 }
 0xa8c   : > { %v2959_v53 = vpop.f32.mrb[36].mxu0  ;;  %v7319_v51 = vmax.f32 %v5271_v12, 0.0 }
 0xa8d   : > { %v2961_v48 = vpop.f32.mrb[37].mxu0  ;;  %3098 = vrot.lane.b32.xlu1 %v7255_v25, %s8246_s21  ;;  %v5272_v43 = vadd.f32 %v2959_v53, %v2772_v44 }
 0xa8e   : > { %3056 = vrot.lane.b32.xlu0 %v7263_v50, %s8245_s20  ;;  %v5273_v2 = vadd.f32 %v2961_v48, %v2772_v44 }
 0xa8f   : > { %v7301_v46 = vmax.f32 %v5272_v43, 0.0 }
 0xa90   : > { %v7321_v34 = vmax.f32 %v5273_v2, 0.0 }
 0xa91   : > { %3142 = vrot.lane.b32.xlu1 %v7255_v25, %s8237_s11 }
 0xa92   : > { %3100 = vrot.lane.b32.xlu0 %v7263_v50, %s8246_s21 }
 0xa95   : > { %3174 = vrot.lane.b32.xlu1 %v7255_v25, %s8251_s0 }
 0xa96   : > { %3144 = vrot.lane.b32.xlu0 %v7263_v50, %s8237_s11 }
 0xa99   : > { %2994 = vrot.lane.b32.xlu1 %v7257_v16, %s8250_s2 }
 0xa9a   : > { %2996 = vrot.lane.b32.xlu0 %v7281_v0, %s8250_s2 }
 0xa9d   : > { %3042 = vrot.lane.b32.xlu1 %v7257_v16, %s8245_s20 }
 0xa9e   : > { %3044 = vrot.lane.b32.xlu0 %v7281_v0, %s8245_s20 }
 0xaa1   : > { %3086 = vrot.lane.b32.xlu1 %v7257_v16, %s8246_s21 }
 0xaa2   : > { %3088 = vrot.lane.b32.xlu0 %v7281_v0, %s8246_s21 }
 0xaa5   : > { %3130 = vrot.lane.b32.xlu1 %v7257_v16, %s8237_s11 }
 0xaa6   : > { %3132 = vrot.lane.b32.xlu0 %v7281_v0, %s8237_s11 }
 0xaa9   : > { %3014 = vrot.lane.b32.xlu1 %v7299_v1, %s8250_s2 }
 0xaaa   : > { %3016 = vrot.lane.b32.xlu0 %v7301_v46, %s8250_s2 }
 0xaad   : > { %3058 = vrot.lane.b32.xlu1 %v7299_v1, %s8245_s20 }
 0xaae   : > { %3060 = vrot.lane.b32.xlu0 %v7301_v46, %s8245_s20 }
 0xab1   : > { %3102 = vrot.lane.b32.xlu1 %v7299_v1, %s8246_s21 }
 0xab2   : > { %3104 = vrot.lane.b32.xlu0 %v7301_v46, %s8246_s21 }
 0xab5   : > { %3146 = vrot.lane.b32.xlu1 %v7299_v1, %s8237_s11 }
 0xab6   : > { %3148 = vrot.lane.b32.xlu0 %v7301_v46, %s8237_s11 }
 0xab9   : > { %2998 = vrot.lane.b32.xlu1 %v7319_v51, %s8250_s2 }
 0xaba   : > { %3000 = vrot.lane.b32.xlu0 %v7321_v34, %s8250_s2 }
 0xabd   : > { %3178 = vrot.lane.b32.xlu1 %v7263_v50, %s8251_s0 }
 0xabe   : > { %3180 = vrot.lane.b32.xlu0 %v7281_v0, %s8251_s0 }
 0xac1   : > { %3046 = vrot.lane.b32.xlu1 %v7319_v51, %s8245_s20 }
 0xac2   : > { %3048 = vrot.lane.b32.xlu0 %v7321_v34, %s8245_s20 }
 0xac5   : > { %3090 = vrot.lane.b32.xlu1 %v7319_v51, %s8246_s21 }
 0xac6   : > { %3184 = vrot.lane.b32.xlu0 %v7319_v51, %s8251_s0 }
 0xac9   : > { %3134 = vrot.lane.b32.xlu1 %v7319_v51, %s8237_s11 }
 0xaca   : > { %3092 = vrot.lane.b32.xlu0 %v7321_v34, %s8246_s21 }
 0xacd   : > { %3182 = vrot.lane.b32.xlu1 %v7299_v1, %s8251_s0 }
 0xace   : > { %3220 = vrot.lane.b32.xlu0 %v7257_v16, %s8243_s12 }
 0xad1   : > { %3186 = vrot.lane.b32.xlu1 %v7301_v46, %s8251_s0 }
 0xad2   : > { %3136 = vrot.lane.b32.xlu0 %v7321_v34, %s8237_s11 }
 0xad5   : > { %3218 = vrot.lane.b32.xlu1 %v7255_v25, %s8243_s12 }
 0xad6   : > { %3224 = vrot.lane.b32.xlu0 %v7281_v0, %s8243_s12 }
 0xad9   : > { %3222 = vrot.lane.b32.xlu1 %v7263_v50, %s8243_s12 }
 0xada   : > { %3228 = vrot.lane.b32.xlu0 %v7319_v51, %s8243_s12 }
 0xadd   : > { %3226 = vrot.lane.b32.xlu1 %v7299_v1, %s8243_s12 }
 0xade   : > { %3264 = vrot.lane.b32.xlu0 %v7257_v16, %s8244_s29 }
 0xae1   : > { %3230 = vrot.lane.b32.xlu1 %v7301_v46, %s8243_s12 }
 0xae2   : > { %3188 = vrot.lane.b32.xlu0 %v7321_v34, %s8251_s0 }
 0xae5   : > { %3262 = vrot.lane.b32.xlu1 %v7255_v25, %s8244_s29 }
 0xae6   : > { %3268 = vrot.lane.b32.xlu0 %v7281_v0, %s8244_s29 }
 0xae9   : > { %3266 = vrot.lane.b32.xlu1 %v7263_v50, %s8244_s29 }
 0xaea   : > { %3232 = vrot.lane.b32.xlu0 %v7321_v34, %s8243_s12 }
 0xaed   : > { %3270 = vrot.lane.b32.xlu1 %v7299_v1, %s8244_s29 }
 0xaee   : > { %3272 = vrot.lane.b32.xlu0 %v7319_v51, %s8244_s29 }
 0xaf1   : > { %3274 = vrot.lane.b32.xlu1 %v7301_v46, %s8244_s29 }
 0xaf2   : > { %3276 = vrot.lane.b32.xlu0 %v7321_v34, %s8244_s29 }
 0xaf5   : > { %3306 = vrot.lane.b32.xlu1 %v7255_v25, %s8247_s14 }
 0xaf6   : > { %3308 = vrot.lane.b32.xlu0 %v7257_v16, %s8247_s14 }
 0xaf7   : > { %v3011_v61 = vpop.permute.xlu1 %3010 }
 0xaf8   : > { %v7387_v22 = vpop.permute.xlu0 %3176 }
 0xaf9   : > { %3310 = vrot.lane.b32.xlu1 %v7263_v50, %s8247_s14 }
 0xafa   : > { %3312 = vrot.lane.b32.xlu0 %v7281_v0, %s8247_s14 }
 0xafb   : > { %v3055_v47 = vpop.permute.xlu1 %3054 }
 0xafc   : > { %v3013_v42 = vpop.permute.xlu0 %3012 }
 0xafd   : > { %3314 = vrot.lane.b32.xlu1 %v7299_v1, %s8247_s14 }
 0xafe   : > { %3316 = vrot.lane.b32.xlu0 %v7319_v51, %s8247_s14 }
 0xaff   : > { %v7397_v4 = vpop.permute.xlu1 %3098 }
 0xb00   : > { %v3057_v20 = vpop.permute.xlu0 %3056 }
 0xb01   : > { %3318 = vrot.lane.b32.xlu1 %v7301_v46, %s8247_s14 }
 0xb02   : > { %3320 = vrot.lane.b32.xlu0 %v7321_v34, %s8247_s14 }
 0xb03   : > { %v7406_v59 = vpop.permute.xlu1 %3142 }
 0xb04   : > { %v7411_v58 = vpop.permute.xlu0 %3100 }
 0xb05   : > { %3352 = vperm.xlu1 %5404, %v4653_v49  }
 0xb06   : > { %3357 = vperm.xlu0 %5403, %v4654_v27  }
 0xb07   : > { %v7416_v28 = vpop.permute.xlu1 %3174 }
 0xb08   : > { %v7421_v60 = vpop.permute.xlu0 %3144 }
 0xb09   : > { %3362 = vperm.xlu1 %5404, %v4655_v26  }
 0xb0a   : > { %3367 = vperm.xlu0 %5403, %v4656_v45  }
 0xb0b   : > { %v2995_v32 = vpop.permute.xlu1 %2994 }
 0xb0c   : > { %v3018_v15 = vsel %vm519_vm2, %v3011_v61, %v2995_v32  ;;  %v3030_v3 = vsel %vm519_vm2, %v2995_v32, %v3011_v61  ;;  %v2997_v53 = vpop.permute.xlu0 %2996 }
 0xb0d   : > { %v3034_v48 = vmul.f32 %v3030_v3, %v5900_v30  ;;  %v3035_v57 = vmul.f32 %v3018_v15, %v5903_v31  ;;  %v3019_v10 = vsel %vm519_vm2, %v3013_v42, %v2997_v53  ;;  %v3031_v44 = vsel %vm519_vm2, %v2997_v53, %v3013_v42 }
 0xb0e   : > { %v3036_v62 = vmul.f32 %v3031_v44, %v5900_v30  ;;  %v3037_v43 = vmul.f32 %v3019_v10, %v5903_v31 }
 0xb0f   : > { %v3043_v12 = vpop.permute.xlu1 %3042 }
 0xb10   : > { %v5086_v2 = vpack.c.bf16 %v3036_v62, %v3034_v48  ;;  %v3045_v29 = vpop.permute.xlu0 %3044  ;;  %v5084_v49 = vpack.c.bf16 %v3037_v43, %v3035_v57  ;;  %v3062_v57 = vsel %vm539_vm0, %v3055_v47, %v3043_v12 }
 0xb11   : > { %v3063_v62 = vsel %vm539_vm0, %v3057_v20, %v3045_v29  ;;  %v3079_v33 = vmul.f32 %v3062_v57, %v5885_v19 }
 0xb12   : > { %5085 = vmatprep.subr.bf16.mxu1 %v5084_v49  ;;  %v3075_v49 = vsel %vm539_vm0, %v3045_v29, %v3057_v20  ;;  %v3081_v40 = vmul.f32 %v3063_v62, %v5885_v19 }
 0xb13   : > { %5087 = vmatpush1.bf16.msra.mxu1 %v5086_v2  ;;  %v3087_v61 = vpop.permute.xlu1 %3086  ;;  %v3074_v2 = vsel %vm539_vm0, %v3043_v12, %v3055_v47  ;;  %v3080_v29 = vmul.f32 %v3075_v49, %v5882_v18 }
 0xb14   : > { %v3089_v27 = vpop.permute.xlu0 %3088  ;;  %v3078_v12 = vmul.f32 %v3074_v2, %v5882_v18  ;;  %v3106_v57 = vsel %vm559_vm3, %v7397_v4, %v3087_v61  ;;  %v3118_v62 = vsel %vm559_vm3, %v3087_v61, %v7397_v4 }
 0xb17   : > { %v7431_v26 = vpop.permute.xlu1 %3130 }
 0xb18   : > { %v7433_v45 = vpop.permute.xlu0 %3132 }
 0xb1b   : > { %v3015_v32 = vpop.permute.xlu1 %3014 }
 0xb1c   : > { %v3017_v15 = vpop.permute.xlu0 %3016 }
 0xb1f   : > { %v3059_v3 = vpop.permute.xlu1 %3058 }
 0xb20   : > { %v3061_v42 = vpop.permute.xlu0 %3060 }
 0xb23   : > { %v3103_v53 = vpop.permute.xlu1 %3102 }
 0xb24   : > { %v7435_v44 = vpop.permute.xlu0 %3104 }
 0xb27   : > { %v7437_v10 = vpop.permute.xlu1 %3146 }
 0xb28   : > { %v7439_v48 = vpop.permute.xlu0 %3148 }
 0xb2b   : > { %v2999_v43 = vpop.permute.xlu1 %2998 }
 0xb2c   : > { %v3020_v11 = vsel %vm519_vm2, %v3015_v32, %v2999_v43  ;;  %v3032_v7 = vsel %vm519_vm2, %v2999_v43, %v3015_v32  ;;  %v3001_v63 = vpop.permute.xlu0 %3000 }
 0xb2d   : > { %v3038_v37 = vmul.f32 %v3032_v7, %v5900_v30  ;;  %v3039_v36 = vmul.f32 %v3020_v11, %v5903_v31  ;;  %v3021_v13 = vsel %vm519_vm2, %v3017_v15, %v3001_v63  ;;  %v3033_v56 = vsel %vm519_vm2, %v3001_v63, %v3017_v15 }
 0xb2e   : > { %v3040_v47 = vmul.f32 %v3033_v56, %v5900_v30  ;;  %v3041_v20 = vmul.f32 %v3021_v13, %v5903_v31  ;;  %v5092_v63 = vpack.c.bf16 %v3081_v40, %v3079_v33  ;;  %v5094_v15 = vpack.c.bf16 %v3080_v29, %v3078_v12 }
 0xb2f   : > { %v7457_v32 = vpop.permute.xlu1 %3178  ;;  %v3107_v56 = vsel %vm559_vm3, %v7411_v58, %v3089_v27  ;;  %v3123_v12 = vmul.f32 %v3106_v57, %v5915_v39  ;;  %v3151_v57 = vsel %vm579_vm1, %v7421_v60, %v7433_v45 }
 0xb30   : > { %v5090_v7 = vpack.c.bf16 %v3040_v47, %v3038_v37  ;;  %v7459_v11 = vpop.permute.xlu0 %3180  ;;  %v5088_v43 = vpack.c.bf16 %v3041_v20, %v3039_v36  ;;  %v3119_v37 = vsel %vm559_vm3, %v3089_v27, %v7411_v58  ;;  %v3125_v4 = vmul.f32 %v3107_v56, %v5915_v39 }
 0xb31   : > { %v3124_v29 = vmul.f32 %v3119_v37, %v5912_v38 }
 0xb32   : > { %5089 = vmatprep.subr.bf16.mxu1 %v5088_v43  ;;  %v5100_v56 = vpack.c.bf16 %v3125_v4, %v3123_v12 }
 0xb33   : > { %5091 = vmatpush1.bf16.msra.mxu1 %v5090_v7  ;;  %v3047_v13 = vpop.permute.xlu1 %3046 }
 0xb34   : > { %v3064_v2 = vsel %vm539_vm0, %v3059_v3, %v3047_v13  ;;  %v3076_v36 = vsel %vm539_vm0, %v3047_v13, %v3059_v3  ;;  %v3049_v40 = vpop.permute.xlu0 %3048  ;;  %5093 = vmatprep.subr.bf16.mxu1 %v5092_v63  ;;  %v3122_v3 = vmul.f32 %v3118_v62, %v5912_v38 }
 0xb35   : > { %v3082_v33 = vmul.f32 %v3076_v36, %v5882_v18  ;;  %v3083_v49 = vmul.f32 %v3064_v2, %v5885_v19  ;;  %v3065_v47 = vsel %vm539_vm0, %v3061_v42, %v3049_v40  ;;  %v3077_v20 = vsel %vm539_vm0, %v3049_v40, %v3061_v42 }
 0xb36   : > { %v3084_v58 = vmul.f32 %v3077_v20, %v5882_v18  ;;  %v3085_v61 = vmul.f32 %v3065_v47, %v5885_v19  ;;  %v3150_v42 = vsel %vm579_vm1, %v7406_v59, %v7431_v26  ;;  %v5102_v37 = vpack.c.bf16 %v3124_v29, %v3122_v3 }
 0xb37   : > { %5095 = vmatpush1.bf16.msra.mxu1 %v5094_v15  ;;  %v3091_v27 = vpop.permute.xlu1 %3090  ;;  %v3162_v2 = vsel %vm579_vm1, %v7431_v26, %v7406_v59  ;;  %v3167_v36 = vmul.f32 %v3150_v42, %v5894_v24 }
 0xb38   : > { %v5098_v7 = vpack.c.bf16 %v3084_v58, %v3082_v33  ;;  %v7481_v43 = vpop.permute.xlu0 %3184  ;;  %v5096_v63 = vpack.c.bf16 %v3085_v61, %v3083_v49  ;;  %v3108_v15 = vsel %vm559_vm3, %v3103_v53, %v3091_v27  ;;  %v3120_v13 = vsel %vm559_vm3, %v3091_v27, %v3103_v53 }
 0xb39   : > { %v3163_v33 = vsel %vm579_vm1, %v7433_v45, %v7421_v60  ;;  %v3169_v49 = vmul.f32 %v3151_v57, %v5894_v24  ;;  %v3126_v20 = vmul.f32 %v3120_v13, %v5912_v38  ;;  %v3127_v59 = vmul.f32 %v3108_v15, %v5915_v39 }
 0xb3a   : > { %5097 = vmatprep.subr.bf16.mxu1 %v5096_v63  ;;  %v3166_v61 = vmul.f32 %v3162_v2, %v5891_v23  ;;  %v3168_v27 = vmul.f32 %v3163_v33, %v5891_v23  ;;  %v5116_v33 = vpack.c.bf16 %v7281_v0, %v7257_v16  ;;  %v5120_v0 = vpack.c.bf16 %v7321_v34, %v7319_v51 }
 0xb3b   : > { %5099 = vmatpush1.bf16.msra.mxu1 %v5098_v7  ;;  %v3135_v62 = vpop.permute.xlu1 %3134 }
 0xb3c   : > { %v3093_v40 = vpop.permute.xlu0 %3092  ;;  %5101 = vmatprep.subr.bf16.mxu1 %v5100_v56  ;;  %v3152_v3 = vsel %vm579_vm1, %v7437_v10, %v3135_v62  ;;  %v3164_v29 = vsel %vm579_vm1, %v3135_v62, %v7437_v10  ;;  %v5110_v42 = vpack.c.bf16 %v3168_v27, %v3166_v61 }
 0xb3d   : > { %v3109_v53 = vsel %vm559_vm3, %v7435_v44, %v3093_v40  ;;  %v3121_v47 = vsel %vm559_vm3, %v3093_v40, %v7435_v44  ;;  %v5108_v44 = vpack.c.bf16 %v3169_v49, %v3167_v36  ;;  %v3170_v15 = vmul.f32 %v3164_v29, %v5891_v23 }
 0xb3e   : > { %v3128_v26 = vmul.f32 %v3121_v47, %v5912_v38  ;;  %v3129_v12 = vmul.f32 %v3109_v53, %v5915_v39  ;;  %v3171_v13 = vmul.f32 %v3152_v3, %v5894_v24  ;;  %v3206_v47 = vsel %vm598_vm5, %v7387_v22, %v7416_v28 }
 0xb3f   : > { %5103 = vmatpush1.bf16.msra.mxu1 %v5102_v37  ;;  %v3183_v4 = vpop.permute.xlu1 %3182 }
 0xb40   : > { %v5106_v58 = vpack.c.bf16 %v3128_v26, %v3126_v20  ;;  %v7507_v60 = vpop.permute.xlu0 %3220  ;;  %v5104_v45 = vpack.c.bf16 %v3129_v12, %v3127_v59  ;;  %v3191_v20 = vsel %vm598_vm5, %v7457_v32, %v7459_v11  ;;  %v5118_v59 = vpack.c.bf16 %v7263_v50, %v7255_v25 }
 0xb41   : > { %v3190_v26 = vsel %vm598_vm5, %v7416_v28, %v7387_v22  ;;  %v3192_v25 = vsel %vm598_vm5, %v3183_v4, %v7481_v43  ;;  %v5122_v50 = vpack.c.bf16 %v7301_v46, %v7299_v1  ;;  %v3208_v22 = vsel %vm598_vm5, %v7481_v43, %v3183_v4 }
 0xb42   : > { %5105 = vmatprep.subr.bf16.mxu1 %v5104_v45  ;;  %v3212_v45 = vmul.f32 %v3191_v20, %v5926_v54  ;;  %v3210_v51 = vmul.f32 %v3190_v26, %v5926_v54  ;;  %v3214_v27 = vmul.f32 %v3192_v25, %v5926_v54  ;;  %v3215_v43 = vmul.f32 %v3208_v22, %v5929_v55 }
 0xb43   : > { %5107 = vmatpush1.bf16.msra.mxu1 %v5106_v58  ;;  %v3187_v7 = vpop.permute.xlu1 %3186  ;;  %v3211_v58 = vmul.f32 %v3206_v47, %v5929_v55 }
 0xb44   : > { %v3137_v63 = vpop.permute.xlu0 %3136  ;;  %5109 = vmatprep.subr.bf16.mxu1 %v5108_v44 }
 0xb45   : > { %v3153_v57 = vsel %vm579_vm1, %v7439_v48, %v3137_v63  ;;  %v3165_v56 = vsel %vm579_vm1, %v3137_v63, %v7439_v48  ;;  %v3207_v48 = vsel %vm598_vm5, %v7459_v11, %v7457_v32  ;;  %v5126_v11 = vpack.c.bf16 %v3212_v45, %v3210_v51 }
 0xb46   : > { %v3172_v37 = vmul.f32 %v3165_v56, %v5891_v23  ;;  %v3173_v2 = vmul.f32 %v3153_v57, %v5894_v24  ;;  %v3213_v16 = vmul.f32 %v3207_v48, %v5929_v55 }
 0xb47   : > { %5111 = vmatpush1.bf16.msra.mxu1 %v5110_v42  ;;  %v3219_v10 = vpop.permute.xlu1 %3218 }
 0xb48   : > { %v5114_v62 = vpack.c.bf16 %v3172_v37, %v3170_v15  ;;  %v3225_v36 = vpop.permute.xlu0 %3224  ;;  %v5112_v40 = vpack.c.bf16 %v3173_v2, %v3171_v13  ;;  %v5124_v34 = vpack.c.bf16 %v3213_v16, %v3211_v58  ;;  %v3250_v3 = vsel %vm618_vm7, %v7507_v60, %v3219_v10 }
 0xb49   : > { %v3234_v57 = vsel %vm618_vm7, %v3219_v10, %v7507_v60  ;;  %v3255_v15 = vmul.f32 %v3250_v3, %v5954_v9 }
 0xb4a   : > { %5113 = vmatprep.subr.bf16.mxu1 %v5112_v40 }
 0xb4b   : > { %5115 = vmatpush1.bf16.msra.mxu1 %v5114_v62  ;;  %v3223_v49 = vpop.permute.xlu1 %3222 }
 0xb4c   : > { %v3229_v53 = vpop.permute.xlu0 %3228  ;;  %5117 = vmatprep.subr.bf16.mxu1 %v5116_v33  ;;  %v3251_v28 = vsel %vm618_vm7, %v3225_v36, %v3223_v49  ;;  %v3235_v1 = vsel %vm618_vm7, %v3223_v49, %v3225_v36  ;;  %v3254_v36 = vmul.f32 %v3234_v57, %v5951_v21 }
 0xb4d   : > { %v3257_v4 = vmul.f32 %v3251_v28, %v5954_v9  ;;  %v3256_v13 = vmul.f32 %v3235_v1, %v5951_v21 }
 0xb4f   : > { %5119 = vmatpush1.bf16.msra.mxu1 %v5118_v59  ;;  %v3227_v12 = vpop.permute.xlu1 %3226  ;;  %v5132_v33 = vpack.c.bf16 %v3257_v4, %v3255_v15  ;;  %v5134_v60 = vpack.c.bf16 %v3256_v13, %v3254_v36 }
 0xb50   : > { %v3265_v61 = vpop.permute.xlu0 %3264  ;;  %5121 = vmatprep.subr.bf16.mxu1 %v5120_v0  ;;  %v3236_v62 = vsel %vm618_vm7, %v3227_v12, %v3229_v53  ;;  %v3252_v40 = vsel %vm618_vm7, %v3229_v53, %v3227_v12 }
 0xb51   : > { %v3258_v10 = vmul.f32 %v3236_v62, %v5951_v21  ;;  %v3259_v20 = vmul.f32 %v3252_v40, %v5954_v9  ;;  %v2973_v62 = vld [vmem:[#allocation5 + $0x60] sm:$0xff] }
 0xb52   : > { %v2977_v40 = vld [vmem:[#allocation5 + $0x80] sm:$0xff] }
 0xb53   : > { %5123 = vmatpush1.bf16.msra.mxu1 %v5122_v50  ;;  %v3231_v32 = vpop.permute.xlu1 %3230 }
 0xb54   : > { %v3189_v44 = vpop.permute.xlu0 %3188  ;;  %5125 = vmatprep.subr.bf16.mxu1 %v5124_v34 }
 0xb55   : > { %v3193_v46 = vsel %vm598_vm5, %v3187_v7, %v3189_v44  ;;  %v3209_v29 = vsel %vm598_vm5, %v3189_v44, %v3187_v7 }
 0xb56   : > { %v3216_v63 = vmul.f32 %v3193_v46, %v5926_v54  ;;  %v3217_v42 = vmul.f32 %v3209_v29, %v5929_v55 }
 0xb57   : > { %5127 = vmatpush1.bf16.msra.mxu1 %v5126_v11  ;;  %v3263_v56 = vpop.permute.xlu1 %3262 }
 0xb58   : > { %v5130_v37 = vpack.c.bf16 %v3216_v63, %v3214_v27  ;;  %v3269_v2 = vpop.permute.xlu0 %3268  ;;  %v5128_v7 = vpack.c.bf16 %v3217_v42, %v3215_v43  ;;  %v3294_v59 = vsel %vm638_vm6, %v3265_v61, %v3263_v56  ;;  %v3278_v25 = vsel %vm638_vm6, %v3263_v56, %v3265_v61 }
 0xb59   : > { %v3299_v50 = vmul.f32 %v3294_v59, %v5941_v6  ;;  %v3298_v11 = vmul.f32 %v3278_v25, %v5938_v5  ;;  %v2976_v59 = vld [vmem:[#allocation5 + $0x78] sm:$0xff]  ;;  %v2979_v25 = vld [vmem:[#allocation5 + $0x90] sm:$0xff] }
 0xb5a   : > { %5129 = vmatprep.subr.bf16.mxu1 %v5128_v7 }
 0xb5b   : > { %5131 = vmatpush1.bf16.msra.mxu1 %v5130_v37  ;;  %v3267_v48 = vpop.permute.xlu1 %3266 }
 0xb5c   : > { %v3295_v49 = vsel %vm638_vm6, %v3269_v2, %v3267_v48  ;;  %v3233_v47 = vpop.permute.xlu0 %3232  ;;  %5133 = vmatprep.subr.bf16.mxu1 %v5132_v33  ;;  %v3279_v53 = vsel %vm638_vm6, %v3267_v48, %v3269_v2 }
 0xb5d   : > { %v3237_v16 = vsel %vm618_vm7, %v3231_v32, %v3233_v47  ;;  %v3253_v0 = vsel %vm618_vm7, %v3233_v47, %v3231_v32  ;;  %v3301_v26 = vmul.f32 %v3295_v49, %v5941_v6  ;;  %v3300_v28 = vmul.f32 %v3279_v53, %v5938_v5 }
 0xb5e   : > { %v3260_v12 = vmul.f32 %v3237_v16, %v5951_v21  ;;  %v3261_v58 = vmul.f32 %v3253_v0, %v5954_v9 }
 0xb5f   : > { %5135 = vmatpush1.bf16.msra.mxu1 %v5134_v60  ;;  %v3271_v45 = vpop.permute.xlu1 %3270  ;;  %v5140_v32 = vpack.c.bf16 %v3301_v26, %v3299_v50  ;;  %v5142_v61 = vpack.c.bf16 %v3300_v28, %v3298_v11  ;;  %v2980_v26 = vld [vmem:[#allocation5 + $0x98] sm:$0xff] }
 0xb60   : > { %v5138_v51 = vpack.c.bf16 %v3260_v12, %v3258_v10  ;;  %v3273_v34 = vpop.permute.xlu0 %3272  ;;  %v5136_v22 = vpack.c.bf16 %v3261_v58, %v3259_v20 }
 0xb61   : > { %v3280_v27 = vsel %vm638_vm6, %v3271_v45, %v3273_v34  ;;  %v3296_v44 = vsel %vm638_vm6, %v3273_v34, %v3271_v45 }
 0xb62   : > { %5137 = vmatprep.subr.bf16.mxu1 %v5136_v22  ;;  %v3302_v43 = vmul.f32 %v3280_v27, %v5938_v5  ;;  %v3303_v4 = vmul.f32 %v3296_v44, %v5941_v6  ;;  %v2982_v44 = vld [vmem:[#allocation5 + $0xa8] sm:$0xff] }
 0xb63   : > { %5139 = vmatpush1.bf16.msra.mxu1 %v5138_v51  ;;  %v3275_v3 = vpop.permute.xlu1 %3274  ;;  %v2983_v51 = vld [vmem:[#allocation5 + $0xb0] sm:$0xff] }
 0xb64   : > { %v3277_v1 = vpop.permute.xlu0 %3276  ;;  %5141 = vmatprep.subr.bf16.mxu1 %v5140_v32 }
 0xb65   : > { %v3281_v46 = vsel %vm638_vm6, %v3275_v3, %v3277_v1  ;;  %v3297_v29 = vsel %vm638_vm6, %v3277_v1, %v3275_v3 }
 0xb66   : > { %v3304_v63 = vmul.f32 %v3281_v46, %v5938_v5  ;;  %v3305_v42 = vmul.f32 %v3297_v29, %v5941_v6  ;;  %v2978_v46 = vld [vmem:[#allocation5 + $0x88] sm:$0xff] }
 0xb67   : > { %5143 = vmatpush1.bf16.msra.mxu1 %v5142_v61  ;;  %v3307_v57 = vpop.permute.xlu1 %3306  ;;  %v2975_v61 = vld [vmem:[#allocation5 + $0x70] sm:$0xff] }
 0xb68   : > { %v5146_v56 = vpack.c.bf16 %v3304_v63, %v3302_v43  ;;  %v3309_v15 = vpop.permute.xlu0 %3308  ;;  %v5144_v13 = vpack.c.bf16 %v3305_v42, %v3303_v4 }
 0xb69   : > { %v3322_v37 = vsel %vm658_vm8, %v3307_v57, %v3309_v15  ;;  %v3338_v2 = vsel %vm658_vm8, %v3309_v15, %v3307_v57 }
 0xb6a   : > { %5145 = vmatprep.subr.bf16.mxu1 %v5144_v13  ;;  %v3342_v60 = vmul.f32 %v7184_v17, %v3322_v37  ;;  %v3343_v10 = vmul.f32 %v7190_v41, %v3338_v2 }
 0xb6b   : > { %5147 = vmatpush1.bf16.msra.mxu1 %v5146_v56  ;;  %v3311_v7 = vpop.permute.xlu1 %3310 }
 0xb6c   : > { %v3313_v36 = vpop.permute.xlu0 %3312 }
 0xb6d   : > { %v3323_v33 = vsel %vm658_vm8, %v3311_v7, %v3313_v36  ;;  %v3339_v48 = vsel %vm658_vm8, %v3313_v36, %v3311_v7 }
 0xb6e   : > { %v3344_v49 = vmul.f32 %v7184_v17, %v3323_v33  ;;  %v3345_v47 = vmul.f32 %v7190_v41, %v3339_v48  ;;  %3447 = vmatmul.mubr.f32.vlgmr.msra.gmra.mrb[8].mxu1 %v2973_v62 }
 0xb6f   : > { %v3315_v20 = vpop.permute.xlu1 %3314  ;;  %3452 = vmatprep.mubr.f32.mxu1 %v2977_v40 }
 0xb70   : > { %v5150_v16 = vpack.c.bf16 %v3344_v49, %v3342_v60  ;;  %v3317_v0 = vpop.permute.xlu0 %3316  ;;  %v5148_v53 = vpack.c.bf16 %v3345_v47, %v3343_v10 }
 0xb71   : > { %v3324_v12 = vsel %vm658_vm8, %v3315_v20, %v3317_v0  ;;  %v3340_v58 = vsel %vm658_vm8, %v3317_v0, %v3315_v20 }
 0xb72   : > { %3453 = vmatmul.mubr.f32.gmra.mrb[10].mxu1 %v2976_v59  ;;  %5149 = vmatprep.subr.bf16.mxu1 %v5148_v53  ;;  %v3346_v28 = vmul.f32 %v7184_v17, %v3324_v12  ;;  %v3347_v32 = vmul.f32 %v7190_v41, %v3340_v58 }
 0xb73   : > { %5151 = vmatpush1.bf16.msra.mxu1 %v5150_v16  ;;  %v3319_v45 = vpop.permute.xlu1 %3318  ;;  %3458 = vmatprep.mubr.f32.mxu1 %v2980_v26 }
 0xb74   : > { %v3321_v50 = vpop.permute.xlu0 %3320 }
 0xb75   : > { %v3325_v34 = vsel %vm658_vm8, %v3319_v45, %v3321_v50  ;;  %v3341_v22 = vsel %vm658_vm8, %v3321_v50, %v3319_v45 }
 0xb76   : > { %v3348_v11 = vmul.f32 %v7184_v17, %v3325_v34  ;;  %v3349_v27 = vmul.f32 %v7190_v41, %v3341_v22  ;;  %3459 = vmatmul.mubr.f32.gmra.mrb[12].mxu1 %v2979_v25  ;;  %v2981_v17 = vld [vmem:[#allocation5 + $0xa0] sm:$0xff]  ;;  %v2984_v41 = vld [vmem:[#allocation5 + $0xb8] sm:$0xff] }
 0xb77   : > { %3464 = vmatprep.mubr.f32.mxu1 %v2983_v51 }
 0xb78   : > { %v5154_v3 = vpack.c.bf16 %v3348_v11, %v3346_v28  ;;  %v5152_v1 = vpack.c.bf16 %v3349_v27, %v3347_v32  ;;  %v4661_v27 = vld [vmem:[%s8152_s8 + $0x2] sm:$0x3] }
 0xb7a   : > { %3465 = vmatmul.mubr.f32.gmra.mrb[14].mxu1 %v2982_v44  ;;  %5153 = vmatprep.subr.bf16.mxu1 %v5152_v1  ;;  %v4664_v44 = vld [vmem:[%s8154_s10 + $0x20] sm:$0xff] }
 0xb7b   : > { %5155 = vmatpush1.bf16.msra.mxu1 %v5154_v3  ;;  %3535 = vmatprep.mubr.f32.mxu1 %v8248_v8 }
 0xb7e   : > { %4657 = vmatmul.mubr.msk.f32.vlgmr.msra.gmra.mrb[8].mxu1 %vm1256_vm10, %v2975_v61 }
 0xb7f   : > { %3541 = vmatprep.mubr.f32.mxu1 %v8248_v8 }
 0xb82   : > { %4658 = vmatmul.mubr.msk.f32.gmra.mrb[10].mxu1 %vm1256_vm10, %v2978_v46 }
 0xb83   : > { %3547 = vmatprep.mubr.f32.mxu1 %v8248_v8 }
 0xb84   : > { %v3353_v43 = vpop.permute.xlu1 %3352 }
 0xb85   : > { %v3358_v56 = vpop.permute.xlu0 %3357 }
 0xb86   : > { %4659 = vmatmul.mubr.msk.f32.gmra.mrb[12].mxu1 %vm1256_vm10, %v2981_v17  ;;  %v4665_v17 = vld [vmem:[%s8154_s10 + $0x28] sm:$0xff] }
 0xb87   : > { %3553 = vmatprep.mubr.f32.mxu1 %v8248_v8 }
 0xb88   : > { %v3363_v7 = vpop.permute.xlu1 %3362 }
 0xb89   : > { %v3368_v48 = vpop.permute.xlu0 %3367 }
 0xb8a   : > { %4660 = vmatmul.mubr.msk.f32.gmra.mrb[14].mxu1 %vm1256_vm10, %v2984_v41  ;;  %v4666_v41 = vld [vmem:[%s8154_s10 + $0x30] sm:$0xff] }
 0xb8b   : > { %4832 = vmatprep.mubr.msk.f32.mxu1 %vm2214_vm12, %v4664_v44 }
 0xc51   : > { %v3537_v29 = vpop.f32.mrb[8].mxu1 }
 0xc52   : > { %v3539_v4 = vpop.f32.mrb[9].mxu1  ;;  %v7617_v42 = vadd.f32 %v3537_v29, %v3353_v43  ;;  %v4667_v29 = vld [vmem:[%s8154_s10 + $0x38] sm:$0xff] }
 0xc53   : > { %v7615_v63 = vadd.f32 %v3539_v4, %v3353_v43  ;;  %v4669_v43 = vld [vmem:[%s8249_s27 + $0x28] sm:$0xff]  ;;  %v4668_v4 = vld [vmem:[%s8249_s27 + $0x20] sm:$0xff] }
 0xc55   : > { %v3543_v57 = vpop.f32.mrb[10].mxu1  ;;  %3624 = vmatprep.mubr.f32.mxu0 %v7615_v63 }
 0xc56   : > { %v3545_v15 = vpop.f32.mrb[11].mxu1  ;;  %3625 = vmatmul.mubr.f32.vlgmr.msra.gmra.mrb[38].mxu0 %v7617_v42  ;;  %v7623_v37 = vadd.f32 %v3543_v57, %v3358_v56 }
 0xc57   : > { %v7621_v13 = vadd.f32 %v3545_v15, %v3358_v56 }
 0xc59   : > { %v3549_v2 = vpop.f32.mrb[12].mxu1  ;;  %3629 = vmatprep.mubr.f32.mxu0 %v7621_v13 }
 0xc5a   : > { %v3551_v62 = vpop.f32.mrb[13].mxu1  ;;  %3630 = vmatmul.mubr.f32.gmra.mrb[40].mxu0 %v7623_v37  ;;  %v7629_v40 = vadd.f32 %v3549_v2, %v3363_v7 }
 0xc5b   : > { %v7627_v36 = vadd.f32 %v3551_v62, %v3363_v7  ;;  %v4671_v7 = vld [vmem:[%s8249_s27 + $0x38] sm:$0xff] }
 0xc5d   : > { %v3555_v33 = vpop.f32.mrb[14].mxu1  ;;  %3634 = vmatprep.mubr.f32.mxu0 %v7627_v36 }
 0xc5e   : > { %v3557_v60 = vpop.f32.mrb[15].mxu1  ;;  %3635 = vmatmul.mubr.f32.gmra.mrb[42].mxu0 %v7629_v40  ;;  %v7635_v49 = vadd.f32 %v3555_v33, %v3368_v48  ;;  %v4670_v33 = vld [vmem:[%s8249_s27 + $0x30] sm:$0xff] }
 0xc5f   : > { %v7633_v10 = vadd.f32 %v3557_v60, %v3368_v48 }
 0xc61   : > { %3639 = vmatprep.mubr.f32.mxu0 %v7633_v10 }
 0xc62   : > { %3640 = vmatmul.mubr.f32.gmra.mrb[44].mxu0 %v7635_v49 }
 0xc63   : > { %4827 = vmatprep.mubr.msk.f32.mxu0 %vm5590_vm11, %v8248_v8 }
 0xd29   : > { %v4778_v47 = vpop.f32.mrb[38].mxu0 }
 0xd2a   : > { %v4779_v20 = vpop.f32.mrb[39].mxu0 }
 0xd2b   : > { %v4780_v59 = vadd.f32 %v4779_v20, %v4778_v47 }
 0xd2d   : > { %v4781_v16 = vpop.f32.mrb[40].mxu0  ;;  %v3645_v26 = vmul.f32 0.00390625, %v4780_v59 }
 0xd2e   : > { %v4782_v0 = vpop.f32.mrb[41].mxu0 }
 0xd2f   : > { %v4783_v53 = vadd.f32 %v4782_v0, %v4781_v16 }
 0xd31   : > { %v3646_v12 = vmul.f32 0.00390625, %v4783_v53  ;;  %v4784_v58 = vpop.f32.mrb[42].mxu0 }
 0xd32   : > { %v4785_v45 = vpop.f32.mrb[43].mxu0 }
 0xd33   : > { %v5173_v25 = vpack.c.bf16 %v3646_v12, %v3645_v26  ;;  %v4786_v50 = vadd.f32 %v4785_v45, %v4784_v58 }
 0xd35   : > { %v4787_v51 = vpop.f32.mrb[44].mxu0  ;;  %5174 = vmatpush3.bf16.msra.mxu0 %v5173_v25  ;;  %v3647_v28 = vmul.f32 0.00390625, %v4786_v50 }
 0xd36   : > { %v4788_v34 = vpop.f32.mrb[45].mxu0  ;;  %5175 = vmatprep.subr.bf16.mxu0 %v8261_v14  ;;  %v4662_v14 = vld [vmem:[%s8153_s9 + $0x2] sm:$0x3] }
 0xd37   : > { %v4789_v22 = vadd.f32 %v4788_v34, %v4787_v51 }
 0xd39   : > { %v3648_v32 = vmul.f32 0.00390625, %v4789_v22 }
 0xd3b   : > { %v5176_v11 = vpack.c.bf16 %v3648_v32, %v3647_v28 }
 0xd3d   : > { %5177 = vmatpush3.bf16.msra.mxu0 %v5176_v11 }
 0xd40   : > { %4828 = vmatmul.mubr.msk.f32.vlgmr.msra.gmra.mrb[46].mxu0 %vm1256_vm10, %v4661_v27 }
 0xe13   : > { %v3722_v3 = vpop.f32.mrb[46].mxu0 }
 0xe14   : > { %v3723_v1 = vadd.f32 %v4662_v14, %v3722_v3  ;;  %v4829_v61 = vpop.f32.mrb[47].mxu0 }
 0xe16   : > { %v3726_v46 = vmax.f32 %v3723_v1, 0.0 }
 0xe18   : > { %4830 = vmatprep.subr.msk.mxu1 %vm2227_vm13, %v3726_v46 }
 0xe19   : > { %4831 = vmatpush3.msk.msra.mxu1 %vm2227_vm13, %v3726_v46 }
 0xe1a   : > { %4833 = vmatmul.mubr.msk.f32.vlgmr.msra.gmra.mrb[16].mxu1 %vm2214_vm12, %v4665_v17 }
 0xe1b   : > { %4835 = vmatprep.mubr.msk.f32.mxu1 %vm2214_vm12, %v4666_v41 }
 0xe1e   : > { %4836 = vmatmul.mubr.msk.f32.gmra.mrb[18].mxu1 %vm2214_vm12, %v4667_v29  ;;  %v8264_v29 = vld [vmem:[#allocation24_spill] sm:$0xff] }
 0xeed   : > { %v4834_v57 = vpop.f32.mrb[16].mxu1 }
 0xeee   : > { %v3824_v56 = vadd.f32 %v4834_v57, %v4669_v43  ;;  %v3818_v15 = vpop.f32.mrb[17].mxu1 }
 0xeef   : > { %v3819_v2 = vadd.f32 %v4668_v4, %v3818_v15  ;;  %v8265_v4 = vld [vmem:[#allocation25_spill] sm:$0xff] }
 0xef0   : > { %v4678_v62 = vmul.f32 -1.442695, %v3824_v56 }
 0xef1   : > { %v4677_v48 = vmul.f32 -1.442695, %v3819_v2  ;;  %v4837_v60 = vpop.f32.mrb[18].mxu1  ;;  %v8267_v2 = vld [vmem:[#allocation27_spill] sm:$0xff] }
 0xef2   : > { %5422 = vpow2.f32 %v4678_v62  ;;  %v3834_v47 = vadd.f32 %v4837_v60, %v4671_v7  ;;  %v3828_v20 = vpop.f32.mrb[19].mxu1 }
 0xef3   : > { %5424 = vpow2.f32 %v4677_v48  ;;  %v3829_v59 = vadd.f32 %v4670_v33, %v3828_v20 }
 0xef4   : > { %v4680_v16 = vmul.f32 -1.442695, %v3834_v47 }
 0xef5   : > { %v4679_v0 = vmul.f32 -1.442695, %v3829_v59 }
 0xef6   : > { %5426 = vpow2.f32 %v4680_v16 }
 0xef7   : > { %5428 = vpow2.f32 %v4679_v0 }
 0xefc   : > { %v5423_v53 = vpop.eup %5422 }
 0xefd   : > { %v5425_v26 = vpop.eup %5424  ;;  %v3850_v12 = vadd.f32 1.0, %v5423_v53 }
 0xefe   : > { %v3849_v58 = vadd.f32 1.0, %v5425_v26 }
 0xeff   : > { %5430 = vrcp.f32 %v3850_v12 }
 0xf00   : > { %v5427_v45 = vpop.eup %5426  ;;  %5432 = vrcp.f32 %v3849_v58 }
 0xf01   : > { %v5429_v25 = vpop.eup %5428  ;;  %v3852_v50 = vadd.f32 1.0, %v5427_v45 }
 0xf02   : > { %v3851_v51 = vadd.f32 1.0, %v5429_v25 }
 0xf03   : > { %5434 = vrcp.f32 %v3852_v50 }
 0xf04   : > { %5436 = vrcp.f32 %v3851_v51 }
 0xf09   : > { %v5431_v34 = vpop.eup %5430 }
 0xf0a   : > { %v5433_v22 = vpop.eup %5432  ;;  %3868 = vperm.xlu0 %5403, %v5431_v34  }
 0xf0b   : > { %3863 = vperm.xlu1 %5404, %v5433_v22  }
 0xf0d   : > { %v5435_v28 = vpop.eup %5434 }
 0xf0e   : > { %v5437_v32 = vpop.eup %5436  ;;  %3878 = vperm.xlu0 %5403, %v5435_v28  }
 0xf0f   : > { %3873 = vperm.xlu1 %5404, %v5437_v32  }
 0xf89   : > { %v3869_v11 = vpop.permute.xlu0 %3868 }
 0xf8a   : > { %v3883_v27 = vmul.f32 %v7623_v37, %v3869_v11  ;;  %v3884_v44 = vmul.f32 %v7621_v13, %v3869_v11  ;;  %v3864_v14 = vpop.permute.xlu1 %3863  ;;  %v8262_v37 = vld [vmem:[#allocation22_spill] sm:$0xff] }
 0xf8b   : > { %v3882_v61 = vmul.f32 %v7615_v63, %v3864_v14  ;;  %v3881_v46 = vmul.f32 %v7617_v42, %v3864_v14 }
 0xf8c   : > { %v7682_v3 = vadd.f32 %v3883_v27, %v6835_v52  ;;  %v7685_v1 = vadd.f32 %v3884_v44, %v6838_v35  ;;  %v8263_v52 = vld [vmem:[#allocation23_spill] sm:$0xff] }
 0xf8d   : > { %v7694_v17 = vadd.f32 %v3882_v61, %v8262_v37  ;;  %v7701_v35 = vadd.f32 %v3881_v46, %v8263_v52  ;;  %v3879_v63 = vpop.permute.xlu0 %3878 }
 0xf8e   : > { %3919 = vrot.lane.b32.xlu0 %v7685_v1, %s8250_s2  ;;  %4101 = vrot.lane.b32.xlu1 %v7682_v3, %s8251_s0  ;;  %v3887_v42 = vmul.f32 %v7635_v49, %v3879_v63  ;;  %v3888_v13 = vmul.f32 %v7633_v10, %v3879_v63  ;;  %v3874_v41 = vpop.permute.xlu1 %3873  ;;  %v8266_v49 = vld [vmem:[#allocation26_spill] sm:$0xff] }
 0xf8f   : > { %v3886_v56 = vmul.f32 %v7627_v36, %v3874_v41  ;;  %v3885_v10 = vmul.f32 %v7629_v40, %v3874_v41 }
 0xf90   : > { %v7742_v43 = vadd.f32 %v3887_v42, %v8264_v29  ;;  %v7745_v57 = vadd.f32 %v3888_v13, %v8265_v4 }
 0xf91   : > { %v7754_v15 = vadd.f32 %v3886_v56, %v8266_v49  ;;  %v7761_v7 = vadd.f32 %v3885_v10, %v8267_v2 }
 0xf92   : > { %3935 = vrot.lane.b32.xlu0 %v7682_v3, %s8250_s2  ;;  %3917 = vrot.lane.b32.xlu1 %v7694_v17, %s8250_s2 }
 0xf96   : > { %3967 = vrot.lane.b32.xlu0 %v7685_v1, %s8245_s20  ;;  %3933 = vrot.lane.b32.xlu1 %v7701_v35, %s8250_s2 }
 0xf9a   : > { %3979 = vrot.lane.b32.xlu0 %v7682_v3, %s8245_s20  ;;  %3965 = vrot.lane.b32.xlu1 %v7694_v17, %s8245_s20 }
 0xf9e   : > { %4011 = vrot.lane.b32.xlu0 %v7685_v1, %s8246_s21  ;;  %3977 = vrot.lane.b32.xlu1 %v7701_v35, %s8245_s20 }
 0xfa2   : > { %4023 = vrot.lane.b32.xlu0 %v7682_v3, %s8246_s21  ;;  %4009 = vrot.lane.b32.xlu1 %v7694_v17, %s8246_s21 }
 0xfa6   : > { %4055 = vrot.lane.b32.xlu0 %v7685_v1, %s8237_s11  ;;  %4021 = vrot.lane.b32.xlu1 %v7701_v35, %s8246_s21 }
 0xfaa   : > { %4067 = vrot.lane.b32.xlu0 %v7682_v3, %s8237_s11  ;;  %4053 = vrot.lane.b32.xlu1 %v7694_v17, %s8237_s11 }
 0xfae   : > { %4103 = vrot.lane.b32.xlu0 %v7685_v1, %s8251_s0  ;;  %4065 = vrot.lane.b32.xlu1 %v7701_v35, %s8237_s11 }
 0xfb2   : > { %4099 = vrot.lane.b32.xlu0 %v7694_v17, %s8251_s0  ;;  %4097 = vrot.lane.b32.xlu1 %v7701_v35, %s8251_s0 }
 0xfb6   : > { %4143 = vrot.lane.b32.xlu0 %v7694_v17, %s8243_s12  ;;  %4141 = vrot.lane.b32.xlu1 %v7701_v35, %s8243_s12 }
 0xfba   : > { %3923 = vrot.lane.b32.xlu0 %v7745_v57, %s8250_s2  ;;  %4109 = vrot.lane.b32.xlu1 %v7742_v43, %s8251_s0 }
 0xfbe   : > { %3939 = vrot.lane.b32.xlu0 %v7742_v43, %s8250_s2  ;;  %3921 = vrot.lane.b32.xlu1 %v7754_v15, %s8250_s2 }
 0xfc2   : > { %3971 = vrot.lane.b32.xlu0 %v7745_v57, %s8245_s20  ;;  %3937 = vrot.lane.b32.xlu1 %v7761_v7, %s8250_s2  ;;  %s8268_s2 = sld [smem:[#allocation33_spill]] }
 0xfc6   : > { %3983 = vrot.lane.b32.xlu0 %v7742_v43, %s8245_s20  ;;  %3969 = vrot.lane.b32.xlu1 %v7754_v15, %s8245_s20 }
 0xfc8   : > { %v3898_v36 = vld [vmem:[%s8268_s2 + $0x8] sm:$0xff] }
 0xfc9   : > { %4369 = vmatprep.mubr.f32.mxu1 %v3898_v36 }
 0xfca   : > { %4015 = vrot.lane.b32.xlu0 %v7745_v57, %s8246_s21  ;;  %3981 = vrot.lane.b32.xlu1 %v7761_v7, %s8245_s20 }
 0xfce   : > { %4027 = vrot.lane.b32.xlu0 %v7742_v43, %s8246_s21  ;;  %4013 = vrot.lane.b32.xlu1 %v7754_v15, %s8246_s21 }
 0xfd2   : > { %4059 = vrot.lane.b32.xlu0 %v7745_v57, %s8237_s11  ;;  %4025 = vrot.lane.b32.xlu1 %v7761_v7, %s8246_s21 }
 0xfd6   : > { %4071 = vrot.lane.b32.xlu0 %v7742_v43, %s8237_s11  ;;  %4057 = vrot.lane.b32.xlu1 %v7754_v15, %s8237_s11 }
 0xfda   : > { %4111 = vrot.lane.b32.xlu0 %v7745_v57, %s8251_s0  ;;  %4069 = vrot.lane.b32.xlu1 %v7761_v7, %s8237_s11  ;;  %s4691_s11 = sshll.u32 %s5689_s17, 10  ;;  %s5502_s17 = scalar_lea.vmem %s8090_s24, 1024 }
 0xfdb   : > { %p5503_p4 = scmp.ne.s32.totalorder %s8090_s24, %s5502_s17 }
 0xfdd   : > { %p5504_p6 = pnand %p5503_p4, %p5759_p12 }
 0xfde   : > { %4147 = vrot.lane.b32.xlu0 %v7685_v1, %s8243_s12  ;;  %4145 = vrot.lane.b32.xlu1 %v7682_v3, %s8243_s12 }
 0xfdf   : > { %p5505_p8 = pneg %p5504_p6 }
 0xfe2   : > { %4155 = vrot.lane.b32.xlu0 %v7745_v57, %s8243_s12  ;;  %4153 = vrot.lane.b32.xlu1 %v7742_v43, %s8243_s12 }
 0xfe6   : > { %4187 = vrot.lane.b32.xlu0 %v7694_v17, %s8244_s29  ;;  %4185 = vrot.lane.b32.xlu1 %v7701_v35, %s8244_s29 }
 0xfea   : > { %4107 = vrot.lane.b32.xlu0 %v7754_v15, %s8251_s0  ;;  %4105 = vrot.lane.b32.xlu1 %v7761_v7, %s8251_s0  ;;  %s8269_s0 = sld [smem:[#allocation34_spill]] }
 0xfee   : > { %4191 = vrot.lane.b32.xlu0 %v7685_v1, %s8244_s29  ;;  %4189 = vrot.lane.b32.xlu1 %v7682_v3, %s8244_s29 }
 0xff0   : > { %v3910_v45 = vld [vmem:[%s8269_s0 + $0x8] sm:$0xff]  ;;  %v3909_v25 = vld [vmem:[%s8269_s0] sm:$0xff]  ;;  %v3912_v28 = vld [vmem:[%s8269_s0 + $0x18] sm:$0xff] }
 0xff1   : > { %v3911_v32 = vld [vmem:[%s8269_s0 + $0x10] sm:$0xff] }
 0xff2   : > { %4151 = vrot.lane.b32.xlu0 %v7754_v15, %s8243_s12  ;;  %4149 = vrot.lane.b32.xlu1 %v7761_v7, %s8243_s12 }
 0xff6   : > { %4199 = vrot.lane.b32.xlu0 %v7745_v57, %s8244_s29  ;;  %4197 = vrot.lane.b32.xlu1 %v7742_v43, %s8244_s29 }
 0xffa   : > { %4195 = vrot.lane.b32.xlu0 %v7754_v15, %s8244_s29  ;;  %4193 = vrot.lane.b32.xlu1 %v7761_v7, %s8244_s29  ;;  %s8278_s29 = sld [smem:[#allocation35_spill]] }
 0xffe   : > { %4231 = vrot.lane.b32.xlu0 %v7694_v17, %s8247_s14  ;;  %4229 = vrot.lane.b32.xlu1 %v7701_v35, %s8247_s14 }
0x1000   : > { %v3920_v40 = vpop.permute.xlu0 %3919  ;;  %v7830_v62 = vpop.permute.xlu1 %4101  ;;  %s8279_s19 = smov %s8278_s29  ;;  %s8097_s26 = scalar_lea.hbm %s8278_s29, %s4691_s11 }
0x1002   : > { %4235 = vrot.lane.b32.xlu0 %v7685_v1, %s8247_s14  ;;  %4233 = vrot.lane.b32.xlu1 %v7682_v3, %s8247_s14 }
0x1004   : > { %v3936_v33 = vpop.permute.xlu0 %3935  ;;  %v3918_v48 = vpop.permute.xlu1 %3917 }
0x1005   : > { %v3954_v60 = vsel %vm519_vm2, %v3920_v40, %v3936_v33  ;;  %v3942_v47 = vsel %vm519_vm2, %v3936_v33, %v3920_v40 }
0x1006   : > { %4239 = vrot.lane.b32.xlu0 %v7754_v15, %s8247_s14  ;;  %4237 = vrot.lane.b32.xlu1 %v7761_v7, %s8247_s14  ;;  %v3959_v16 = vmul.f32 %v3954_v60, %v5900_v30  ;;  %v3960_v26 = vmul.f32 %v3942_v47, %v5903_v31 }
0x1008   : > { %v3968_v20 = vpop.permute.xlu0 %3967  ;;  %v3934_v59 = vpop.permute.xlu1 %3933 }
0x1009   : > { %v3941_v0 = vsel %vm519_vm2, %v3934_v59, %v3918_v48  ;;  %v3953_v53 = vsel %vm519_vm2, %v3918_v48, %v3934_v59 }
0x100a   : > { %v3957_v12 = vmul.f32 %v3953_v53, %v5900_v30  ;;  %v3958_v58 = vmul.f32 %v3941_v0, %v5903_v31  ;;  %4243 = vrot.lane.b32.xlu0 %v7745_v57, %s8247_s14  ;;  %4241 = vrot.lane.b32.xlu1 %v7742_v43, %s8247_s14  ;;  %s5506_s14 = sshll.u32 %s5591_s6, 4  ;;  %s5507_s14 = int_to_ptr.vmem [resolvable:$false] %s5506_s14 }
0x100b   : > { %s5508_s23 = scalar_lea.vmem %s5507_s14, 2048  ;;  %p5509_p10 = scmp.lt.s32.totalorder %s8090_s24, %s5507_s14 }
0x100c   : > { %v5180_v50 = vpack.c.bf16 %v3959_v16, %v3957_v12  ;;  %v3980_v51 = vpop.permute.xlu0 %3979  ;;  %v3966_v34 = vpop.permute.xlu1 %3965  ;;  %v5178_v22 = vpack.c.bf16 %v3960_v26, %v3958_v58  ;;  %p5510_p13 = scmp.lt.s32.totalorder %s5508_s23, %s5502_s17 }
0x100d   : > { %v3986_v48 = vsel %vm539_vm0, %v3980_v51, %v3968_v20 }
0x100e   : > { %4280 = vperm.xlu0 %5403, %v3910_v45   ;;  %4275 = vperm.xlu1 %5404, %v3909_v25   ;;  %v3998_v25 = vsel %vm539_vm0, %v3968_v20, %v3980_v51  ;;  %p5511_p3 = por %p5510_p13, %p5509_p10 }
0x100f   : > { %5179 = vmatprep.subr.bf16.mxu1 %v5178_v22 }
0x1010   : > { %5181 = vmatpush1.bf16.msra.mxu1 %v5180_v50  ;;  %v4012_v11 = vpop.permute.xlu0 %4011  ;;  %v3978_v27 = vpop.permute.xlu1 %3977  ;;  %v4004_v50 = vmul.f32 %v3986_v48, %v5885_v19  ;;  %p5512_p7 = pnand %p5511_p3, %p5505_p8 }
0x1011   : > { %v3985_v36 = vsel %vm539_vm0, %v3978_v27, %v3966_v34  ;;  %v3997_v59 = vsel %vm539_vm0, %v3966_v34, %v3978_v27 }
0x1012   : > { %4290 = vperm.xlu0 %5403, %v3912_v28   ;;  %4285 = vperm.xlu1 %5404, %v3911_v32   ;;  %v4002_v16 = vmul.f32 %v3985_v36, %v5885_v19  ;;  %v4001_v34 = vmul.f32 %v3997_v59, %v5882_v18 }
0x1014   : > { %v4024_v44 = vpop.permute.xlu0 %4023  ;;  %v4010_v14 = vpop.permute.xlu1 %4009 }
0x1015   : > { %v4030_v51 = vsel %vm559_vm3, %v4024_v44, %v4012_v11 }
0x1018   : > { %v7864_v61 = vpop.permute.xlu0 %4055  ;;  %v4022_v46 = vpop.permute.xlu1 %4021 }
0x101c   : > { %v7866_v37 = vpop.permute.xlu0 %4067  ;;  %v7868_v52 = vpop.permute.xlu1 %4053 }
0x1020   : > { %v7870_v63 = vpop.permute.xlu0 %4103  ;;  %v7872_v42 = vpop.permute.xlu1 %4065 }
0x1024   : > { %v7874_v13 = vpop.permute.xlu0 %4099  ;;  %v7876_v41 = vpop.permute.xlu1 %4097 }
0x1028   : > { %v7878_v29 = vpop.permute.xlu0 %4143  ;;  %v7880_v4 = vpop.permute.xlu1 %4141 }
0x102c   : > { %v3924_v56 = vpop.permute.xlu0 %3923  ;;  %v7882_v10 = vpop.permute.xlu1 %4109 }
0x1030   : > { %v3940_v49 = vpop.permute.xlu0 %3939  ;;  %v3922_v2 = vpop.permute.xlu1 %3921 }
0x1031   : > { %v3944_v40 = vsel %vm519_vm2, %v3940_v49, %v3924_v56  ;;  %v3956_v33 = vsel %vm519_vm2, %v3924_v56, %v3940_v49  ;;  %v4003_v56 = vmul.f32 %v3998_v25, %v5882_v18  ;;  %v4029_v49 = vsel %vm559_vm3, %v4022_v46, %v4010_v14 }
0x1032   : > { %v3963_v26 = vmul.f32 %v3956_v33, %v5900_v30  ;;  %v3964_v12 = vmul.f32 %v3944_v40, %v5903_v31  ;;  %v4041_v33 = vsel %vm559_vm3, %v4010_v14, %v4022_v46  ;;  %v4046_v48 = vmul.f32 %v4029_v49, %v5915_v39 }
0x1033   : > { %v5188_v20 = vpack.c.bf16 %v4003_v56, %v4001_v34  ;;  %v4045_v14 = vmul.f32 %v4041_v33, %v5912_v38  ;;  %v4073_v34 = vsel %vm579_vm1, %v7872_v42, %v7868_v52 }
0x1034   : > { %v3972_v60 = vpop.permute.xlu0 %3971  ;;  %v3938_v47 = vpop.permute.xlu1 %3937  ;;  %v4090_v56 = vmul.f32 %v4073_v34, %v5894_v24  ;;  %v5210_v34 = vpack.c.bf16 %v7685_v1, %v7694_v17  ;;  %v5214_v17 = vpack.c.bf16 %v7745_v57, %v7754_v15 }
0x1035   : > { %v3943_v0 = vsel %vm519_vm2, %v3938_v47, %v3922_v2  ;;  %v3955_v53 = vsel %vm519_vm2, %v3922_v2, %v3938_v47  ;;  %v5186_v2 = vpack.c.bf16 %v4004_v50, %v4002_v16 }
0x1036   : > { %v3961_v58 = vmul.f32 %v3955_v53, %v5900_v30  ;;  %v3962_v45 = vmul.f32 %v3943_v0, %v5903_v31 }
0x1038   : > { %v5184_v22 = vpack.c.bf16 %v3963_v26, %v3961_v58  ;;  %v3984_v28 = vpop.permute.xlu0 %3983  ;;  %v3970_v32 = vpop.permute.xlu1 %3969  ;;  %v5182_v27 = vpack.c.bf16 %v3964_v12, %v3962_v45  ;;  %v4042_v26 = vsel %vm559_vm3, %v4012_v11, %v4024_v44  ;;  %v4048_v12 = vmul.f32 %v4030_v51, %v5915_v39 }
0x1039   : > { %v3988_v30 = vsel %vm539_vm0, %v3984_v28, %v3972_v60  ;;  %v4000_v31 = vsel %vm539_vm0, %v3972_v60, %v3984_v28  ;;  %v4047_v50 = vmul.f32 %v4042_v26, %v5912_v38 }
0x103a   : > { %5183 = vmatprep.subr.bf16.mxu1 %v5182_v27  ;;  %v4007_v16 = vmul.f32 %v4000_v31, %v5882_v18  ;;  %v4008_v0 = vmul.f32 %v3988_v30, %v5885_v19  ;;  %v4085_v27 = vsel %vm579_vm1, %v7868_v52, %v7872_v42 }
0x103b   : > { %5185 = vmatpush1.bf16.msra.mxu1 %v5184_v22  ;;  %v5196_v44 = vpack.c.bf16 %v4047_v50, %v4045_v14  ;;  %v4074_v22 = vsel %vm579_vm1, %v7866_v37, %v7864_v61 }
0x103c   : > { %v4016_v36 = vpop.permute.xlu0 %4015  ;;  %5187 = vmatprep.subr.bf16.mxu1 %v5186_v2  ;;  %v3982_v40 = vpop.permute.xlu1 %3981  ;;  %v4092_v52 = vmul.f32 %v4074_v22, %v5894_v24  ;;  %v4114_v22 = vsel %vm598_vm5, %v7830_v62, %v7870_v63 }
0x103d   : > { %v3987_v47 = vsel %vm539_vm0, %v3982_v40, %v3970_v32  ;;  %v3999_v59 = vsel %vm539_vm0, %v3970_v32, %v3982_v40 }
0x103e   : > { %v4005_v60 = vmul.f32 %v3999_v59, %v5882_v18  ;;  %v4006_v53 = vmul.f32 %v3987_v47, %v5885_v19  ;;  %v5194_v18 = vpack.c.bf16 %v4048_v12, %v4046_v48  ;;  %v4089_v47 = vmul.f32 %v4085_v27, %v5891_v23 }
0x103f   : > { %5189 = vmatpush1.bf16.msra.mxu1 %v5188_v20  ;;  %v5202_v59 = vpack.c.bf16 %v4092_v52, %v4090_v56  ;;  %v4173_v56 = vsel %vm618_vm7, %v7878_v29, %v7880_v4  ;;  %v4157_v52 = vsel %vm618_vm7, %v7880_v4, %v7878_v29 }
0x1040   : > { %v5192_v46 = vpack.c.bf16 %v4007_v16, %v4005_v60  ;;  %v4028_v58 = vpop.permute.xlu0 %4027  ;;  %v4014_v45 = vpop.permute.xlu1 %4013  ;;  %v5190_v25 = vpack.c.bf16 %v4008_v0, %v4006_v53 }
0x1041   : > { %v4032_v19 = vsel %vm559_vm3, %v4028_v58, %v4016_v36  ;;  %v4044_v11 = vsel %vm559_vm3, %v4016_v36, %v4028_v58  ;;  %v4086_v36 = vsel %vm579_vm1, %v7864_v61, %v7866_v37 }
0x1042   : > { %5191 = vmatprep.subr.bf16.mxu1 %v5190_v25  ;;  %v4051_v30 = vmul.f32 %v4044_v11, %v5912_v38  ;;  %v4052_v31 = vmul.f32 %v4032_v19, %v5915_v39  ;;  %v4091_v16 = vmul.f32 %v4086_v36, %v5891_v23 }
0x1043   : > { %5193 = vmatpush1.bf16.msra.mxu1 %v5192_v46 }
0x1044   : > { %v4060_v28 = vpop.permute.xlu0 %4059  ;;  %5195 = vmatprep.subr.bf16.mxu1 %v5194_v18  ;;  %v4026_v32 = vpop.permute.xlu1 %4025  ;;  %v5204_v37 = vpack.c.bf16 %v4091_v16, %v4089_v47  ;;  %v4129_v18 = vsel %vm598_vm5, %v7874_v13, %v7876_v41 }
0x1045   : > { %v4031_v49 = vsel %vm559_vm3, %v4026_v32, %v4014_v45  ;;  %v4043_v2 = vsel %vm559_vm3, %v4014_v45, %v4026_v32  ;;  %v4134_v1 = vmul.f32 %v4129_v18, %v5929_v55 }
0x1046   : > { %v4049_v20 = vmul.f32 %v4043_v2, %v5912_v38  ;;  %v4050_v51 = vmul.f32 %v4031_v49, %v5915_v39 }
0x1047   : > { %5197 = vmatpush1.bf16.msra.mxu1 %v5196_v44  ;;  %v5212_v44 = vpack.c.bf16 %v7682_v3, %v7701_v35  ;;  %v5216_v3 = vpack.c.bf16 %v7742_v43, %v7761_v7  ;;  %v4135_v35 = vmul.f32 %v4114_v22, %v5926_v54 }
0x1048   : > { %v5200_v42 = vpack.c.bf16 %v4051_v30, %v4049_v20  ;;  %v4072_v40 = vpop.permute.xlu0 %4071  ;;  %v4058_v33 = vpop.permute.xlu1 %4057  ;;  %v5198_v48 = vpack.c.bf16 %v4052_v31, %v4050_v51 }
0x1049   : > { %v4076_v38 = vsel %vm579_vm1, %v4072_v40, %v4060_v28  ;;  %v4088_v39 = vsel %vm579_vm1, %v4060_v28, %v4072_v40 }
0x104a   : > { %5199 = vmatprep.subr.bf16.mxu1 %v5198_v48  ;;  %v4095_v26 = vmul.f32 %v4088_v39, %v5891_v23  ;;  %v4096_v12 = vmul.f32 %v4076_v38, %v5894_v24  ;;  %v4177_v38 = vmul.f32 %v4157_v52, %v5951_v21 }
0x104b   : > { %5201 = vmatpush1.bf16.msra.mxu1 %v5200_v42  ;;  %v4178_v42 = vmul.f32 %v4173_v56, %v5954_v9  ;;  %v3897_v56 = vld [vmem:[%s8268_s2] sm:$0xff] }
0x104c   : > { %v4112_v0 = vpop.permute.xlu0 %4111  ;;  %5203 = vmatprep.subr.bf16.mxu1 %v5202_v59  ;;  %v4070_v61 = vpop.permute.xlu1 %4069 }
0x104d   : > { %v4075_v60 = vsel %vm579_vm1, %v4070_v61, %v4058_v33  ;;  %v4087_v53 = vsel %vm579_vm1, %v4058_v33, %v4070_v61  ;;  %v4116_v57 = vsel %vm598_vm5, %v7882_v10, %v4112_v0 }
0x104e   : > { %v4093_v14 = vmul.f32 %v4087_v53, %v5891_v23  ;;  %v4094_v46 = vmul.f32 %v4075_v60, %v5894_v24  ;;  %v4130_v23 = vsel %vm598_vm5, %v7870_v63, %v7830_v62  ;;  %v4113_v24 = vsel %vm598_vm5, %v7876_v41, %v7874_v13 }
0x104f   : > { %5205 = vmatpush1.bf16.msra.mxu1 %v5204_v37  ;;  %v4136_v28 = vmul.f32 %v4130_v23, %v5929_v55  ;;  %v4133_v32 = vmul.f32 %v4113_v24, %v5926_v54  ;;  %v4132_v62 = vsel %vm598_vm5, %v4112_v0, %v7882_v10  ;;  %v4139_v7 = vmul.f32 %v4116_v57, %v5926_v54 }
0x1050   : > { %v5208_v58 = vpack.c.bf16 %v4095_v26, %v4093_v14  ;;  %v4148_v45 = vpop.permute.xlu0 %4147  ;;  %v4146_v25 = vpop.permute.xlu1 %4145  ;;  %v5206_v50 = vpack.c.bf16 %v4096_v12, %v4094_v46  ;;  %v4140_v10 = vmul.f32 %v4132_v62, %v5929_v55 }
0x1051   : > { %v5218_v15 = vpack.c.bf16 %v4136_v28, %v4134_v1  ;;  %v4174_v63 = vsel %vm618_vm7, %v4148_v45, %v4146_v25  ;;  %v5220_v41 = vpack.c.bf16 %v4135_v35, %v4133_v32  ;;  %v4158_v2 = vsel %vm618_vm7, %v4146_v25, %v4148_v45 }
0x1052   : > { %5207 = vmatprep.subr.bf16.mxu1 %v5206_v50  ;;  %v4180_v20 = vmul.f32 %v4174_v63, %v5954_v9  ;;  %v4179_v40 = vmul.f32 %v4158_v2, %v5951_v21  ;;  %v5442_v2 = vld [vmem:[%s8145_s1 + $0x10] ss:$0 sm:$0xff] }
0x1053   : > { %5209 = vmatpush1.bf16.msra.mxu1 %v5208_v58 }
0x1054   : > { %v4156_v19 = vpop.permute.xlu0 %4155  ;;  %5211 = vmatprep.subr.bf16.mxu1 %v5210_v34  ;;  %v4154_v11 = vpop.permute.xlu1 %4153  ;;  %v5228_v29 = vpack.c.bf16 %v4179_v40, %v4177_v38 }
0x1055   : > { %v4160_v16 = vsel %vm618_vm7, %v4154_v11, %v4156_v19 }
0x1056   : > { %v4183_v4 = vmul.f32 %v4160_v16, %v5951_v21  ;;  %v3903_v16 = vld [vmem:[%s8268_s2 + $0x30] sm:$0xff] }
0x1057   : > { %5213 = vmatpush1.bf16.msra.mxu1 %v5212_v44 }
0x1058   : > { %v4188_v27 = vpop.permute.xlu0 %4187  ;;  %5215 = vmatprep.subr.bf16.mxu1 %v5214_v17  ;;  %v4186_v13 = vpop.permute.xlu1 %4185 }
0x1059   : > { %v4217_v60 = vsel %vm638_vm6, %v4188_v27, %v4186_v13  ;;  %v4201_v45 = vsel %vm638_vm6, %v4186_v13, %v4188_v27 }
0x105a   : > { %v4222_v25 = vmul.f32 %v4217_v60, %v5941_v6  ;;  %v4221_v24 = vmul.f32 %v4201_v45, %v5938_v5  ;;  %v3906_v60 = vld [vmem:[%s8268_s2 + $0x48] sm:$0xff] }
0x105b   : > { %5217 = vmatpush1.bf16.msra.mxu1 %v5216_v3 }
0x105c   : > { %v4108_v49 = vpop.permute.xlu0 %4107  ;;  %5219 = vmatprep.subr.bf16.mxu1 %v5218_v15  ;;  %v4106_v43 = vpop.permute.xlu1 %4105 }
0x105d   : > { %v4115_v30 = vsel %vm598_vm5, %v4106_v43, %v4108_v49  ;;  %v4131_v31 = vsel %vm598_vm5, %v4108_v49, %v4106_v43 }
0x105e   : > { %v4137_v51 = vmul.f32 %v4115_v30, %v5926_v54  ;;  %v4138_v36 = vmul.f32 %v4131_v31, %v5929_v55  ;;  %v4176_v54 = vsel %vm618_vm7, %v4156_v19, %v4154_v11  ;;  %v5226_v55 = vpack.c.bf16 %v4180_v20, %v4178_v42  ;;  %v5443_v31 = vld [vmem:[%s8145_s1 + $0x18] ss:$0 sm:$0xff] }
0x105f   : > { %5221 = vmatpush1.bf16.msra.mxu1 %v5220_v41  ;;  %v4184_v37 = vmul.f32 %v4176_v54, %v5954_v9 }
0x1060   : > { %v5224_v33 = vpack.c.bf16 %v4139_v7, %v4137_v51  ;;  %v4192_v48 = vpop.permute.xlu0 %4191  ;;  %v4190_v47 = vpop.permute.xlu1 %4189  ;;  %v5222_v59 = vpack.c.bf16 %v4140_v10, %v4138_v36  ;;  %v3900_v36 = vld [vmem:[%s8268_s2 + $0x18] sm:$0xff] }
0x1061   : > { %v4218_v39 = vsel %vm638_vm6, %v4192_v48, %v4190_v47  ;;  %v4202_v12 = vsel %vm638_vm6, %v4190_v47, %v4192_v48  ;;  %v3904_v48 = vld [vmem:[%s8268_s2 + $0x38] sm:$0xff] }
0x1062   : > { %5223 = vmatprep.subr.bf16.mxu1 %v5222_v59  ;;  %v4224_v14 = vmul.f32 %v4218_v39, %v5941_v6  ;;  %v4223_v11 = vmul.f32 %v4202_v12, %v5938_v5  ;;  %v3899_v12 = vld [vmem:[%s8268_s2 + $0x10] sm:$0xff] }
0x1063   : > { %5225 = vmatpush1.bf16.msra.mxu1 %v5224_v33 }
0x1064   : > { %v4152_v0 = vpop.permute.xlu0 %4151  ;;  %5227 = vmatprep.subr.bf16.mxu1 %v5226_v55  ;;  %v4150_v61 = vpop.permute.xlu1 %4149  ;;  %v5234_v23 = vpack.c.bf16 %v4224_v14, %v4222_v25  ;;  %v5236_v17 = vpack.c.bf16 %v4223_v11, %v4221_v24  ;;  %v3907_v55 = vld [vmem:[%s8268_s2 + $0x50] sm:$0xff]  ;;  %v3902_v14 = vld [vmem:[%s8268_s2 + $0x28] sm:$0xff]  ;;  %v8271_v24 = vld [vmem:[#allocation15_spill] sm:$0xff] }
0x1065   : > { %v4159_v53 = vsel %vm618_vm7, %v4150_v61, %v4152_v0  ;;  %v4175_v26 = vsel %vm618_vm7, %v4152_v0, %v4150_v61 }
0x1066   : > { %v4181_v46 = vmul.f32 %v4159_v53, %v5951_v21  ;;  %v4182_v58 = vmul.f32 %v4175_v26, %v5954_v9 }
0x1067   : > { %5229 = vmatpush1.bf16.msra.mxu1 %v5228_v29 }
0x1068   : > { %v5232_v50 = vpack.c.bf16 %v4183_v4, %v4181_v46  ;;  %v4200_v34 = vpop.permute.xlu0 %4199  ;;  %v4198_v18 = vpop.permute.xlu1 %4197  ;;  %v5230_v19 = vpack.c.bf16 %v4184_v37, %v4182_v58  ;;  %v3905_v46 = vld [vmem:[%s8268_s2 + $0x40] sm:$0xff]  ;;  %v3908_v58 = vld [vmem:[%s8268_s2 + $0x58] sm:$0xff] }
0x1069   : > { %v4204_v44 = vsel %vm638_vm6, %v4198_v18, %v4200_v34  ;;  %v4220_v21 = vsel %vm638_vm6, %v4200_v34, %v4198_v18 }
0x106a   : > { %5231 = vmatprep.subr.bf16.mxu1 %v5230_v19  ;;  %v4227_v32 = vmul.f32 %v4204_v44, %v5938_v5  ;;  %v4228_v27 = vmul.f32 %v4220_v21, %v5941_v6  ;;  %v8270_v19 = vld [vmem:[#allocation14_spill] sm:$0xff] }
0x106b   : > { %5233 = vmatpush1.bf16.msra.mxu1 %v5232_v50 }
0x106c   : > { %v4196_v9 = vpop.permute.xlu0 %4195  ;;  %5235 = vmatprep.subr.bf16.mxu1 %v5234_v23  ;;  %v4194_v1 = vpop.permute.xlu1 %4193 }
0x106d   : > { %v4203_v22 = vsel %vm638_vm6, %v4194_v1, %v4196_v9  ;;  %v4219_v28 = vsel %vm638_vm6, %v4196_v9, %v4194_v1 }
0x106e   : > { %v4225_v13 = vmul.f32 %v4203_v22, %v5938_v5  ;;  %v4226_v3 = vmul.f32 %v4219_v28, %v5941_v6  ;;  %v3901_v5 = vld [vmem:[%s8268_s2 + $0x20] sm:$0xff] }
0x106f   : > { %5237 = vmatpush1.bf16.msra.mxu1 %v5236_v17  ;;  %v8272_v17 = vld [vmem:[#allocation16_spill] sm:$0xff] }
0x1070   : > { %v5240_v35 = vpack.c.bf16 %v4227_v32, %v4225_v13  ;;  %v4232_v57 = vpop.permute.xlu0 %4231  ;;  %v4230_v15 = vpop.permute.xlu1 %4229  ;;  %v5238_v62 = vpack.c.bf16 %v4228_v27, %v4226_v3  ;;  %v8273_v32 = vld [vmem:[#allocation17_spill] sm:$0xff] }
0x1071   : > { %v4245_v63 = vsel %vm658_vm8, %v4230_v15, %v4232_v57  ;;  %v4261_v41 = vsel %vm658_vm8, %v4232_v57, %v4230_v15  ;;  %v8274_v15 = vld [vmem:[#allocation18_spill] sm:$0xff] }
0x1072   : > { %5239 = vmatprep.subr.bf16.mxu1 %v5238_v62  ;;  %v4265_v30 = vmul.f32 %v5442_v2, %v4245_v63  ;;  %v4266_v10 = vmul.f32 %v5443_v31, %v4261_v41  ;;  %v8275_v41 = vld [vmem:[#allocation20_spill] sm:$0xff] }
0x1073   : > { %5241 = vmatpush1.bf16.msra.mxu1 %v5240_v35 }
0x1074   : > { %v4236_v49 = vpop.permute.xlu0 %4235  ;;  %v4234_v43 = vpop.permute.xlu1 %4233 }
0x1075   : > { %v4246_v6 = vsel %vm658_vm8, %v4234_v43, %v4236_v49  ;;  %v4262_v7 = vsel %vm658_vm8, %v4236_v49, %v4234_v43 }
0x1076   : > { %v4267_v20 = vmul.f32 %v5442_v2, %v4246_v6  ;;  %v4268_v51 = vmul.f32 %v5443_v31, %v4262_v7  ;;  %4370 = vmatmul.mubr.f32.vlgmr.msra.gmra.mrb[20].mxu1 %v3897_v56  ;;  %v8276_v7 = vld [vmem:[#allocation19_spill] sm:$0xff] }
0x1077   : > { %4375 = vmatprep.mubr.f32.mxu1 %v3901_v5 }
0x1078   : > { %v5244_v52 = vpack.c.bf16 %v4267_v20, %v4265_v30  ;;  %v4240_v42 = vpop.permute.xlu0 %4239  ;;  %v4238_v40 = vpop.permute.xlu1 %4237  ;;  %v5242_v33 = vpack.c.bf16 %v4268_v51, %v4266_v10  ;;  %v8277_v30 = vld [vmem:[#allocation21_spill] sm:$0xff] }
0x1079   : > { %v4247_v47 = vsel %vm658_vm8, %v4238_v40, %v4240_v42  ;;  %v4263_v59 = vsel %vm658_vm8, %v4240_v42, %v4238_v40 }
0x107a   : > { %4376 = vmatmul.mubr.f32.gmra.mrb[22].mxu1 %v3900_v36  ;;  %5243 = vmatprep.subr.bf16.mxu1 %v5242_v33  ;;  %v4269_v4 = vmul.f32 %v5442_v2, %v4247_v47  ;;  %v4270_v0 = vmul.f32 %v5443_v31, %v4263_v59 }
0x107b   : > { %5245 = vmatpush1.bf16.msra.mxu1 %v5244_v52  ;;  %4381 = vmatprep.mubr.f32.mxu1 %v3904_v48 }
0x107c   : > { %v4244_v38 = vpop.permute.xlu0 %4243  ;;  %v4242_v54 = vpop.permute.xlu1 %4241 }
0x107d   : > { %v4248_v39 = vsel %vm658_vm8, %v4242_v54, %v4244_v38  ;;  %v4264_v29 = vsel %vm658_vm8, %v4244_v38, %v4242_v54 }
0x107e   : > { %v4271_v61 = vmul.f32 %v5442_v2, %v4248_v39  ;;  %v4272_v37 = vmul.f32 %v5443_v31, %v4264_v29  ;;  %4382 = vmatmul.mubr.f32.gmra.mrb[24].mxu1 %v3903_v16 }
0x107f   : > { %4387 = vmatprep.mubr.f32.mxu1 %v3907_v55 }
0x1080   : > { %v5248_v53 = vpack.c.bf16 %v4271_v61, %v4269_v4  ;;  %v5246_v26 = vpack.c.bf16 %v4272_v37, %v4270_v0 }
0x1082   : > { %4388 = vmatmul.mubr.f32.gmra.mrb[26].mxu1 %v3906_v60  ;;  %5247 = vmatprep.subr.bf16.mxu1 %v5246_v26 }
0x1083   : > { %5249 = vmatpush1.bf16.msra.mxu1 %v5248_v53  ;;  %4458 = vmatprep.mubr.f32.mxu1 %v8248_v8 }
0x1086   : > { %4681 = vmatmul.mubr.msk.f32.vlgmr.msra.gmra.mrb[20].mxu1 %vm1256_vm10, %v3899_v12 }
0x1087   : > { %4464 = vmatprep.mubr.f32.mxu1 %v8248_v8 }
0x108a   : > { %4682 = vmatmul.mubr.msk.f32.gmra.mrb[22].mxu1 %vm1256_vm10, %v3902_v14 }
0x108b   : > { %4470 = vmatprep.mubr.f32.mxu1 %v8248_v8 }
0x108d   : > { %v4276_v45 = vpop.permute.xlu1 %4275  ;;  %v4281_v23 = vpop.permute.xlu0 %4280 }
0x108e   : > { %4683 = vmatmul.mubr.msk.f32.gmra.mrb[24].mxu1 %vm1256_vm10, %v3905_v46 }
0x108f   : > { %4476 = vmatprep.mubr.f32.mxu1 %v8248_v8 }
0x1091   : > { %v4286_v28 = vpop.permute.xlu1 %4285  ;;  %v4291_v63 = vpop.permute.xlu0 %4290 }
0x1092   : > { %4684 = vmatmul.mubr.msk.f32.gmra.mrb[26].mxu1 %vm1256_vm10, %v3908_v58 }
0x1159   : > { %v4460_v25 = vpop.f32.mrb[20].mxu1 }
0x115a   : > { %v5282_v50 = vadd.f32 %v4460_v25, %v4276_v45  ;;  %v4462_v34 = vpop.f32.mrb[21].mxu1 }
0x115b   : > { %v5283_v18 = vadd.f32 %v4462_v34, %v4276_v45 }
0x115c   : > { %v4483_v11 = vadd.f32 %v5282_v50, %v8270_v19 }
0x115d   : > { %v4484_v44 = vadd.f32 %v5283_v18, %v8271_v24  ;;  %v4466_v21 = vpop.f32.mrb[22].mxu1 }
0x115e   : > { %4491 = vst [vmem:[%s8076_s22] sm:$0xff] %v4483_v11  ;;  %v5284_v8 = vadd.f32 %v4466_v21, %v4281_v23  ;;  %v4468_v9 = vpop.f32.mrb[23].mxu1 }
0x115f   : > { %4492 = vst [vmem:[%s8076_s22 + $0x8] sm:$0xff] %v4484_v44  ;;  %v5285_v1 = vadd.f32 %v4468_v9, %v4281_v23 }
0x1160   : > { %v4485_v22 = vadd.f32 %v5284_v8, %v8272_v17 }
0x1161   : > { %v4486_v27 = vadd.f32 %v5285_v1, %v8273_v32  ;;  %v4472_v13 = vpop.f32.mrb[24].mxu1 }
0x1162   : > { %4493 = vst [vmem:[%s8076_s22 + $0x10] sm:$0xff] %v4485_v22  ;;  %v5286_v3 = vadd.f32 %v4472_v13, %v4286_v28  ;;  %v4474_v35 = vpop.f32.mrb[25].mxu1 }
0x1163   : > { %4494 = vst [vmem:[%s8076_s22 + $0x18] sm:$0xff] %v4486_v27  ;;  %v5287_v57 = vadd.f32 %v4474_v35, %v4286_v28 }
0x1164   : > { %v4487_v62 = vadd.f32 %v5286_v3, %v8274_v15 }
0x1165   : > { %v4488_v56 = vadd.f32 %v5287_v57, %v8275_v41  ;;  %v4478_v49 = vpop.f32.mrb[26].mxu1 }
0x1166   : > { %4495 = vst [vmem:[%s8076_s22 + $0x20] sm:$0xff] %v4487_v62  ;;  %v5288_v43 = vadd.f32 %v4478_v49, %v4291_v63  ;;  %v4480_v5 = vpop.f32.mrb[27].mxu1 }
0x1167   : > { %4496 = vst [vmem:[%s8076_s22 + $0x28] sm:$0xff] %v4488_v56  ;;  %v5289_v6 = vadd.f32 %v4480_v5, %v4291_v63 }
0x1168   : > { %v4489_v2 = vadd.f32 %v5288_v43, %v8276_v7 }
0x1169   : > { %v4490_v31 = vadd.f32 %v5289_v6, %v8277_v30 }
0x116a   : > { %4497 = vst [vmem:[%s8076_s22 + $0x30] sm:$0xff] %v4489_v2 }
0x116b   : > { %4498 = vst [vmem:[%s8076_s22 + $0x38] sm:$0xff] %v4490_v31 }
0x116c   : > { %5515 = shalt.err (!%p5512_p7)
}
0x116d   : > { %s5516_s18 = scalar_lea.hbm %s8097_s26, 1024  ;;  %s5520_s21 = scalar_lea.hbm %s8279_s19, 2048 }
0x116e   : > { %p5517_p9 = scmp.ne.s32.totalorder %s8097_s26, %s5516_s18  ;;  %p5521_p0 = scmp.lt.u32.totalorder %s8097_s26, %s8279_s19 }
0x116f   : > { %p5522_p1 = scmp.lt.u32.totalorder %s5520_s21, %s5516_s18  ;;  %p5524_p4 = scmp.lt.u32.totalorder %s5516_s18, %s8097_s26 }
0x1170   : > { %p5518_p2 = pnand %p5517_p9, %p5759_p12 }
0x1171   : > { %p5523_p11 = por %p5522_p1, %p5521_p0 }
0x1172   : > { %p5519_p5 = pneg %p5518_p2 }
0x1173   : > { %p5525_p6 = por %p5524_p4, %p5523_p11 }
0x1175   : > { %p5526_p8 = pnand %p5525_p6, %p5519_p5 }
0x1177   : > { %5529 = shalt.err (!%p5526_p8)
}
0x1178   : > { %s5592_s17 = smov 256  }
0x1179   : > { %5336 = dma.vmem_to_hbm [thread:$0]  (%p5759_p12), %s8090_s24, 1024, %s8097_s26, %s4500_s3, %s5592_s17, %s5592_s17, %s8245_s20  }
0x117a PF: > { %s8280_s6 = sld [smem:[#allocation11_spill]]  ;;  %s8281_s14 = sld [smem:[#allocation12_spill]] }
0x117b   : > { %p8283_p13 = scmp.ge.s32.totalorder %s5572_s16, 2 }
0x1180   : > { %s4528_s23 = sand.u32 1, %s8280_s6   ;;  %p8282_p10 = scmp.ne.s32.totalorder %s8281_s14, 0 }
0x1181   : > { %s4529_s18 = scalar_lea.sflag [#allocation4], %s4528_s23 }
0x1182   : > { %p5347_p3 = pnand %p8283_p13, %p8282_p10 }
0x1184   : > { %5555 = dma.done.wait (!%p5347_p3), %s4529_s18, 1024  }
0x1185   : > { %5557 = vsyncadd (!%p5347_p3), %s4529_s18, 4294966272  ;;  %s8284_s16 = sld [smem:[#allocation13_spill]]  ;;  %s8285_s29 = smov %s5564_s30 }
0x1186   : > { %s8286_s30 = smov %s5568_s15  ;;  %s8287_s15 = smov %s5755_s25 }
0x118b   : > { %p28_p7 = scmp.ge.s32.totalorder %s8284_s16, 4  }
0x118d   :  { %30 = sbr.rel (!%p28_p7) target bundleno = 15 (0xf), region = 133 }
0x1194   :  { %4534 = vsyncpa [#allocation3], 1 }
0x1195   :  { %4536 = vsyncpa [#allocation3 + $0x1], 1 }
0x1196   :  { %4537 = vsyncpa [#allocation6], 1 }
0x1197   :  { %4538 = vsyncpa [#allocation4], 1 }
0x1198   :  { %4540 = vsyncpa [#allocation4 + $0x1], 1 }

</bundles_post_ra>
